<compile_context>
chip_gen: v6e
topology: v6e:2x2x1
jax: 0.10.0
libtpu: 0.0.40
codegen_flags: <defaults>
</compile_context>

<pallas_src>
import functools
import math

import jax
import jax.numpy as jnp
from jax import lax
from jax.experimental import pallas as pl
from jax.experimental.pallas import tpu as pltpu

BN_EPS = 1e-5
OUT_LANES = 128
NUM_HEADS = 4
LANE = 128


def _round_up(x, m):
    return (x + m - 1) // m * m


# ----------------------------------------------------------------------------
# Kernel
# ----------------------------------------------------------------------------
def multitask_kernel(
    xq_ref, kv_ref,
    wq_ref, bq_ref,
    w1x_ref, w1a_ref, b1_ref,
    w2_ref, b2_ref,
    ws1_ref, bs1_ref,
    wv1_ref, bv1_ref, wv2_ref, bv2_ref,
    wc1_ref, bc1_ref, wc2_ref, bc2_ref,
    wspec_ref, wsev_ref, wchr_ref, bout_ref,
    out_ref,
    *, hp, chronic_lane,
):
    f32 = jnp.float32
    bf16 = jnp.bfloat16

    xq = xq_ref[...].astype(bf16)           # (bt, D)  bf16 MXU operand
    kv = kv_ref[...]                         # (B, 8*hp) bf16, precomputed K|V (pad lanes = 0)

    # Fused Q projection for all 4 heads (1/sqrt(d) scale folded into wq/bq);
    # bias add in f32, then one bf16 copy for the score matmuls.
    q_all = (jnp.dot(xq, wq_ref[...], preferred_element_type=f32)
             + bq_ref[...]).astype(bf16)     # (bt, 4*hp)

    dn = (((1,), (1,)), ((), ()))            # contract last axes: q @ k^T, no transpose
    heads = []
    for h in range(NUM_HEADS):
        q = q_all[:, h * hp:(h + 1) * hp]                            # lane-aligned (hp % 128 == 0)
        k = kv[:, h * hp:(h + 1) * hp]
        v = kv[:, (NUM_HEADS + h) * hp:(NUM_HEADS + h + 1) * hp]
        s = lax.dot_general(q, k, dn, preferred_element_type=f32)    # (bt, B) f32 scores
        m = jnp.max(s, axis=-1, keepdims=True)
        e = jnp.exp(s - m)
        # TODO(synk): switch to approx=False if bit-faithful softmax parity is required.
        p = e * pl.reciprocal(jnp.sum(e, axis=-1, keepdims=True), approx=True)
        heads.append(jnp.dot(p.astype(bf16), v, preferred_element_type=f32))  # (bt, hp)

    # One lane-aligned concat + a single (bt, 4*hp) @ (4*hp, 512) matmul replaces
    # four narrow per-head matmuls against shared_input's attention rows.
    attn = jnp.concatenate(heads, axis=-1).astype(bf16)              # (bt, 4*hp)
    acc = (jnp.dot(xq, w1x_ref[...], preferred_element_type=f32)
           + jnp.dot(attn, w1a_ref[...], preferred_element_type=f32)
           + b1_ref[...])                                            # (bt, 512) f32

    # Shared trunk: BN1 folded into w2, BN2 folded into the branch-first linears;
    # Dropout layers are identity in eval mode.  ReLU/bias in f32, matmul operands bf16.
    shared = jnp.maximum(acc, 0.0).astype(bf16)
    shared = jnp.maximum(
        jnp.dot(shared, w2_ref[...], preferred_element_type=f32) + b2_ref[...], 0.0).astype(bf16)

    # Specialty branch.
    sh = jnp.maximum(
        jnp.dot(shared, ws1_ref[...], preferred_element_type=f32) + bs1_ref[...], 0.0).astype(bf16)
    # Severity branch (branch BN folded into wv2).
    vh = jnp.maximum(
        jnp.dot(shared, wv1_ref[...], preferred_element_type=f32) + bv1_ref[...], 0.0).astype(bf16)
    vh = jnp.maximum(
        jnp.dot(vh, wv2_ref[...], preferred_element_type=f32) + bv2_ref[...], 0.0).astype(bf16)
    # Chronic branch (branch BN folded into wc2).
    ch = jnp.maximum(
        jnp.dot(shared, wc1_ref[...], preferred_element_type=f32) + bc1_ref[...], 0.0).astype(bf16)
    ch = jnp.maximum(
        jnp.dot(ch, wc2_ref[...], preferred_element_type=f32) + bc2_ref[...], 0.0).astype(bf16)

    # All three heads written into one lane-dense (bt, 128) slab (unmasked vst).
    out = (jnp.dot(sh, wspec_ref[...], preferred_element_type=f32)
           + jnp.dot(vh, wsev_ref[...], preferred_element_type=f32)
           + jnp.dot(ch, wchr_ref[...], preferred_element_type=f32)
           + bout_ref[...])
    lane = lax.broadcasted_iota(jnp.int32, out.shape, 1)
    out_ref[...] = jnp.where(lane == chronic_lane, jax.nn.sigmoid(out), out)


# ----------------------------------------------------------------------------
# Parameter init (PyTorch-layout, transposed) and host-side fusion/folding
# ----------------------------------------------------------------------------
def init_raw_params(key, input_dim, num_specialties, num_severities):
    d_head = input_dim // 4
    keys = iter(jax.random.split(key, 128))

    def lin(in_f, out_f):
        w = jax.random.normal(next(keys), (in_f, out_f), jnp.float32) * 0.05
        b = jax.random.normal(next(keys), (1, out_f), jnp.float32) * 0.05
        return w, b

    def bn(c):  # non-trivial eval-mode stats so the folding is actually exercised
        gamma = 1.0 + 0.1 * jax.random.normal(next(keys), (1, c), jnp.float32)
        beta = 0.1 * jax.random.normal(next(keys), (1, c), jnp.float32)
        rmean = 0.1 * jax.random.normal(next(keys), (1, c), jnp.float32)
        rvar = jax.random.uniform(next(keys), (1, c), jnp.float32, 0.5, 1.5)
        return gamma, beta, rmean, rvar

    p = {}
    wq, bq, wk, bk, wv, bv = [], [], [], [], [], []
    for _ in range(NUM_HEADS):
        w, b = lin(input_dim, d_head); wq.append(w); bq.append(b)
        w, b = lin(input_dim, d_head); wk.append(w); bk.append(b)
        w, b = lin(input_dim, d_head); wv.append(w); bv.append(b)
    p['wq'], p['bq'] = jnp.stack(wq), jnp.stack(bq)
    p['wk'], p['bk'] = jnp.stack(wk), jnp.stack(bk)
    p['wv'], p['bv'] = jnp.stack(wv), jnp.stack(bv)

    p['w1'], p['b1'] = lin(input_dim * 2, 512)
    p['bn1'] = bn(512)
    p['w2'], p['b2'] = lin(512, 256)
    p['bn2'] = bn(256)

    p['ws1'], p['bs1'] = lin(256, 128)
    p['ws2'], p['bs2'] = lin(128, num_specialties)

    p['wv1'], p['bv1'] = lin(256, 128)
    p['bn_sev'] = bn(128)
    p['wv2'], p['bv2'] = lin(128, 128)
    p['wv3'], p['bv3'] = lin(128, num_severities)

    p['wc1'], p['bc1'] = lin(256, 128)
    p['bn_chr'] = bn(128)
    p['wc2'], p['bc2'] = lin(128, 64)
    p['wc3'], p['bc3'] = lin(64, 1)
    return p


def _bn_scale_shift(bn):
    gamma, beta, rmean, rvar = bn
    s = gamma * lax.rsqrt(rvar + BN_EPS)    # (1, C)
    t = beta - rmean * s                    # (1, C)
    return s, t


def _fold_bn_into_next(bn, w, b):
    """Eval BN followed (through identity Dropout) by y = z @ w + b."""
    s, t = _bn_scale_shift(bn)
    return w * s.reshape(-1, 1), b + t @ w


def fuse_params(raw, input_dim, num_specialties, num_severities):
    d_head = input_dim // 4
    hp = _round_up(d_head, LANE)            # per-head lane-aligned width (padding exact)
    scale = 1.0 / math.sqrt(d_head)
    f32, bf16 = jnp.float32, jnp.bfloat16

    def pad_heads(ws, bs, col_scale=1.0):
        n = len(ws)
        in_f = ws[0].shape[0]
        w = jnp.zeros((in_f, n * hp), f32)
        b = jnp.zeros((1, n * hp), f32)
        for h in range(n):
            w = w.at[:, h * hp:h * hp + d_head].set(ws[h] * col_scale)
            b = b.at[:, h * hp:h * hp + d_head].set(bs[h] * col_scale)
        return w, b

    # Fused QKV projections; attention scale folded into Wq / bq; each head's
    # column block zero-padded to hp lanes so in-kernel slices are lane-aligned.
    w_q, b_q = pad_heads([raw['wq'][h] for h in range(NUM_HEADS)],
                         [raw['bq'][h] for h in range(NUM_HEADS)], scale)
    w_kv, b_kv = pad_heads(
        [raw['wk'][h] for h in range(NUM_HEADS)] + [raw['wv'][h] for h in range(NUM_HEADS)],
        [raw['bk'][h] for h in range(NUM_HEADS)] + [raw['bv'][h] for h in range(NUM_HEADS)])

    # shared_input weight split: rows for x and per-head rows scattered into a
    # zero-padded (4*hp, 512) block so the fused single head-matmul is exact.
    w1 = raw['w1']
    w1_x = w1[:input_dim]
    w1_a = jnp.zeros((NUM_HEADS * hp, 512), f32)
    for h in range(NUM_HEADS):
        rows = w1[input_dim + h * d_head: input_dim + (h + 1) * d_head]
        w1_a = w1_a.at[h * hp:h * hp + d_head].set(rows)
    b1 = raw['b1']

    # Fold all four eval-mode BatchNorms into the following Linear layers.
    w2f, b2f = _fold_bn_into_next(raw['bn1'], raw['w2'], raw['b2'])
    ws1f, bs1f = _fold_bn_into_next(raw['bn2'], raw['ws1'], raw['bs1'])
    wv1f, bv1f = _fold_bn_into_next(raw['bn2'], raw['wv1'], raw['bv1'])
    wc1f, bc1f = _fold_bn_into_next(raw['bn2'], raw['wc1'], raw['bc1'])
    wv2f, bv2f = _fold_bn_into_next(raw['bn_sev'], raw['wv2'], raw['bv2'])
    wc2f, bc2f = _fold_bn_into_next(raw['bn_chr'], raw['wc2'], raw['bc2'])

    # Lane-dense padded output heads: [spec | sev | chronic | zero padding].
    ns, nv = num_specialties, num_severities
    assert ns + nv + 1 <= OUT_LANES
    w_spec = jnp.zeros((128, OUT_LANES), f32).at[:, :ns].set(raw['ws2'])
    w_sev = jnp.zeros((128, OUT_LANES), f32).at[:, ns:ns + nv].set(raw['wv3'])
    w_chr = jnp.zeros((64, OUT_LANES), f32).at[:, ns + nv:ns + nv + 1].set(raw['wc3'])
    b_out = (jnp.zeros((1, OUT_LANES), f32)
             .at[:, :ns].set(raw['bs2'])
             .at[:, ns:ns + nv].set(raw['bv3'])
             .at[:, ns + nv:ns + nv + 1].set(raw['bc3']))

    # Kernel-side weights stored bf16 (MXU fast path, half the VMEM/DMA bytes);
    # biases stay f32 for exact VPU adds.
    kernel_params = (
        w_q.astype(bf16), b_q,
        w1_x.astype(bf16), w1_a.astype(bf16), b1,
        w2f.astype(bf16), b2f,
        ws1f.astype(bf16), bs1f,
        wv1f.astype(bf16), bv1f, wv2f.astype(bf16), bv2f,
        wc1f.astype(bf16), bc1f, wc2f.astype(bf16), bc2f,
        w_spec.astype(bf16), w_sev.astype(bf16), w_chr.astype(bf16), b_out,
    )
    # K/V projection weights kept f32 for the one-time wrapper-side precompute.
    kv_proj = (w_kv, b_kv)
    return kernel_params, kv_proj, hp


# ----------------------------------------------------------------------------
# Wrapper
# ----------------------------------------------------------------------------
def _vmem_limit_bytes():
    try:
        cap = int(pltpu.get_tpu_info().vmem_capacity_bytes)
    except Exception:
        cap = 64 << 20                       # conservative (v7x-sized) fallback
    # ~96 MiB on 128 MiB chips (v5e/v6e), ~48 MiB on v7x's 64 MiB.
    return max(cap * 3 // 4, 32 << 20)


def _pick_batch_tile(batch, input_dim, hp, kernel_params, vmem_limit):
    """Largest batch tile that fits the VMEM budget and keeps >=2 grid steps."""
    weight_bytes = sum(int(p.size) * p.dtype.itemsize for p in kernel_params)
    # Residents: bf16 K|V for the full batch + weights (counted double-buffered
    # in case the single-buffering fallback is taken).
    resident = batch * 2 * NUM_HEADS * hp * 2 + 2 * weight_bytes
    avail = max(vmem_limit - resident - (4 << 20), 1 << 20)        # 4 MiB slack
    per_row = (4 * batch                                  # (bt, B) f32 score tile
               + 14 * NUM_HEADS * hp                      # q_all / head outs / attn (f32 + bf16)
               + 6 * (512 + 256 + 3 * 128 + 64)           # trunk / branch activations
               + 10 * input_dim + 8 * OUT_LANES)          # x tile + out tile (double-buffered)
    bt_cap = max(8, min(1024, avail // per_row))

    best = None
    for t in range(batch, 0, -1):
        if batch % t or t % 8:
            continue
        if t > bt_cap:
            continue
        if batch >= 16 and t > batch // 2:   # guarantee >= 2 grid steps (v7x: 2 TCs)
            continue
        best = t
        break
    return best if best is not None else batch   # tiny / ragged batch: single full block


def multitask_forward(x, kernel_params, kv_proj, *, hp, num_specialties, num_severities,
                      single_buffer_consts=True):
    batch, input_dim = x.shape
    w_kv, b_kv = kv_proj

    # Hoisted K/V projection: one full-batch matmul per forward (plain XLA op)
    # instead of recomputing it on every grid step inside the kernel.
    kv_all = (jnp.dot(x, w_kv) + b_kv).astype(jnp.bfloat16)         # (B, 8*hp)

    vmem_limit = _vmem_limit_bytes()
    bt = _pick_batch_tile(batch, input_dim, hp, kernel_params, vmem_limit)
    grid = (batch // bt,)

    if single_buffer_consts:
        def const_spec(p):   # constant block index -> single buffer is enough
            return pl.BlockSpec(p.shape, lambda i: (0, 0), pipeline_mode=pl.Buffered(1))
    else:
        def const_spec(p):
            return pl.BlockSpec(p.shape, lambda i: (0, 0))

    in_specs = ([pl.BlockSpec((bt, input_dim), lambda i: (i, 0)),    # query-row tile
                 const_spec(kv_all)]                                 # resident full-batch K|V
                + [const_spec(p) for p in kernel_params])

    kernel = functools.partial(
        multitask_kernel, hp=hp,
        chronic_lane=num_specialties + num_severities)

    out = pl.pallas_call(
        kernel,
        out_shape=jax.ShapeDtypeStruct((batch, OUT_LANES), jnp.float32),
        grid=grid,
        in_specs=in_specs,
        out_specs=pl.BlockSpec((bt, OUT_LANES), lambda i: (i, 0)),
        compiler_params=pltpu.CompilerParams(
            dimension_semantics=("parallel",),
            vmem_limit_bytes=int(vmem_limit)),
    )(x, kv_all, *kernel_params)

    ns, nv = num_specialties, num_severities
    return out[:, :ns], out[:, ns:ns + nv], out[:, ns + nv:ns + nv + 1]


# ----------------------------------------------------------------------------
# Pure-JAX reference of the original PyTorch module (eval mode, f32)
# ----------------------------------------------------------------------------
def _bn_eval(z, bn):
    gamma, beta, rmean, rvar = bn
    return (z - rmean) * gamma * lax.rsqrt(rvar + BN_EPS) + beta


def reference_forward(x, raw):
    d_head = raw['wq'].shape[-1]
    scale = 1.0 / math.sqrt(d_head)
    heads = []
    for h in range(NUM_HEADS):
        q = x @ raw['wq'][h] + raw['bq'][h]
        k = x @ raw['wk'][h] + raw['bk'][h]
        v = x @ raw['wv'][h] + raw['bv'][h]
        p = jax.nn.softmax((q @ k.T) * scale, axis=-1)
        heads.append(p @ v)
    attention = jnp.concatenate(heads, axis=1)
    combined = jnp.concatenate([x, attention], axis=1)
    z = _bn_eval(jax.nn.relu(combined @ raw['w1'] + raw['b1']), raw['bn1'])
    z = _bn_eval(jax.nn.relu(z @ raw['w2'] + raw['b2']), raw['bn2'])
    sh = jax.nn.relu(z @ raw['ws1'] + raw['bs1'])
    spec = sh @ raw['ws2'] + raw['bs2']
    vh = _bn_eval(jax.nn.relu(z @ raw['wv1'] + raw['bv1']), raw['bn_sev'])
    vh = jax.nn.relu(vh @ raw['wv2'] + raw['bv2'])
    sev = vh @ raw['wv3'] + raw['bv3']
    ch = _bn_eval(jax.nn.relu(z @ raw['wc1'] + raw['bc1']), raw['bn_chr'])
    ch = jax.nn.relu(ch @ raw['wc2'] + raw['bc2'])
    chron = jax.nn.sigmoid(ch @ raw['wc3'] + raw['bc3'])
    return spec, sev, chron


# ----------------------------------------------------------------------------
if __name__ == "__main__":
    B = 8
    INPUT_DIM = 32
    NUM_SPECIALTIES = 5
    NUM_SEVERITIES = 3

    key = jax.random.PRNGKey(0)
    x_key, p_key = jax.random.split(key)
    x = jax.random.normal(x_key, (B, INPUT_DIM), jnp.float32)

    raw = init_raw_params(p_key, INPUT_DIM, NUM_SPECIALTIES, NUM_SEVERITIES)
    kparams, kv_proj, hp = fuse_params(raw, INPUT_DIM, NUM_SPECIALTIES, NUM_SEVERITIES)

    def build(single_buffer):
        return jax.jit(functools.partial(
            multitask_forward, hp=hp,
            num_specialties=NUM_SPECIALTIES, num_severities=NUM_SEVERITIES,
            single_buffer_consts=single_buffer))

    try:
        fwd = build(True)
        spec, sev, chron = fwd(x, kparams, kv_proj)
        jax.block_until_ready((spec, sev, chron))
    except Exception:
        # This JAX version rejected pl.Buffered(1) on constant-index inputs:
        # fall back to default double buffering (correctness unchanged).
        fwd = build(False)
        spec, sev, chron = fwd(x, kparams, kv_proj)
        jax.block_until_ready((spec, sev, chron))

    assert spec.shape == (B, NUM_SPECIALTIES)
    assert sev.shape == (B, NUM_SEVERITIES)
    assert chron.shape == (B, 1)
    assert bool(jnp.all(jnp.isfinite(spec)))
    assert bool(jnp.all(jnp.isfinite(sev)))
    assert bool(jnp.all((chron >= 0.0) & (chron <= 1.0)))

    # Numerical check against a pure-JAX f32 mirror of the original module
    # (tolerance loosened for bf16 MXU operands; accumulation stays f32).
    spec_r, sev_r, chron_r = reference_forward(x, raw)
    for got, want in ((spec, spec_r), (sev, sev_r), (chron, chron_r)):
        assert bool(jnp.allclose(got, want, atol=2e-2, rtol=2e-2)), (
            float(jnp.max(jnp.abs(got - want))))

    print("KERNEL_OK")
</pallas_src>

<mosaic_0001>
module attributes {stable_mosaic.version = 11 : i64} {
  func.func @multitask_kernel(%arg0: i32, %arg1: memref<8x32xf32, #tpu.memory_space<vmem>>, %arg2: memref<8x1024xbf16, #tpu.memory_space<vmem>>, %arg3: memref<32x512xbf16, #tpu.memory_space<vmem>>, %arg4: memref<1x512xf32, #tpu.memory_space<vmem>>, %arg5: memref<32x512xbf16, #tpu.memory_space<vmem>>, %arg6: memref<512x512xbf16, #tpu.memory_space<vmem>>, %arg7: memref<1x512xf32, #tpu.memory_space<vmem>>, %arg8: memref<512x256xbf16, #tpu.memory_space<vmem>>, %arg9: memref<1x256xf32, #tpu.memory_space<vmem>>, %arg10: memref<256x128xbf16, #tpu.memory_space<vmem>>, %arg11: memref<1x128xf32, #tpu.memory_space<vmem>>, %arg12: memref<256x128xbf16, #tpu.memory_space<vmem>>, %arg13: memref<1x128xf32, #tpu.memory_space<vmem>>, %arg14: memref<128x128xbf16, #tpu.memory_space<vmem>>, %arg15: memref<1x128xf32, #tpu.memory_space<vmem>>, %arg16: memref<256x128xbf16, #tpu.memory_space<vmem>>, %arg17: memref<1x128xf32, #tpu.memory_space<vmem>>, %arg18: memref<128x64xbf16, #tpu.memory_space<vmem>>, %arg19: memref<1x64xf32, #tpu.memory_space<vmem>>, %arg20: memref<128x128xbf16, #tpu.memory_space<vmem>>, %arg21: memref<128x128xbf16, #tpu.memory_space<vmem>>, %arg22: memref<64x128xbf16, #tpu.memory_space<vmem>>, %arg23: memref<1x128xf32, #tpu.memory_space<vmem>>, %arg24: memref<8x128xf32, #tpu.memory_space<vmem>>) attributes {dimension_semantics = [#tpu.dimension_semantics<parallel>], iteration_bounds = array<i64: 1>, scalar_prefetch = 0 : i64, scratch_operands = 0 : i64, tpu.core_type = #tpu.core_type<tc>, window_params = [{transform_indices = @transform_0, window_bounds = array<i64: 8, 32>}, {pipeline_mode = #tpu.pipeline_mode<synchronous>, transform_indices = @transform_1, window_bounds = array<i64: 8, 1024>}, {pipeline_mode = #tpu.pipeline_mode<synchronous>, transform_indices = @transform_2, window_bounds = array<i64: 32, 512>}, {pipeline_mode = #tpu.pipeline_mode<synchronous>, transform_indices = @transform_3, window_bounds = array<i64: 1, 512>}, {pipeline_mode = #tpu.pipeline_mode<synchronous>, transform_indices = @transform_4, window_bounds = array<i64: 32, 512>}, {pipeline_mode = #tpu.pipeline_mode<synchronous>, transform_indices = @transform_5, window_bounds = array<i64: 512, 512>}, {pipeline_mode = #tpu.pipeline_mode<synchronous>, transform_indices = @transform_6, window_bounds = array<i64: 1, 512>}, {pipeline_mode = #tpu.pipeline_mode<synchronous>, transform_indices = @transform_7, window_bounds = array<i64: 512, 256>}, {pipeline_mode = #tpu.pipeline_mode<synchronous>, transform_indices = @transform_8, window_bounds = array<i64: 1, 256>}, {pipeline_mode = #tpu.pipeline_mode<synchronous>, transform_indices = @transform_9, window_bounds = array<i64: 256, 128>}, {pipeline_mode = #tpu.pipeline_mode<synchronous>, transform_indices = @transform_10, window_bounds = array<i64: 1, 128>}, {pipeline_mode = #tpu.pipeline_mode<synchronous>, transform_indices = @transform_11, window_bounds = array<i64: 256, 128>}, {pipeline_mode = #tpu.pipeline_mode<synchronous>, transform_indices = @transform_12, window_bounds = array<i64: 1, 128>}, {pipeline_mode = #tpu.pipeline_mode<synchronous>, transform_indices = @transform_13, window_bounds = array<i64: 128, 128>}, {pipeline_mode = #tpu.pipeline_mode<synchronous>, transform_indices = @transform_14, window_bounds = array<i64: 1, 128>}, {pipeline_mode = #tpu.pipeline_mode<synchronous>, transform_indices = @transform_15, window_bounds = array<i64: 256, 128>}, {pipeline_mode = #tpu.pipeline_mode<synchronous>, transform_indices = @transform_16, window_bounds = array<i64: 1, 128>}, {pipeline_mode = #tpu.pipeline_mode<synchronous>, transform_indices = @transform_17, window_bounds = array<i64: 128, 64>}, {pipeline_mode = #tpu.pipeline_mode<synchronous>, transform_indices = @transform_18, window_bounds = array<i64: 1, 64>}, {pipeline_mode = #tpu.pipeline_mode<synchronous>, transform_indices = @transform_19, window_bounds = array<i64: 128, 128>}, {pipeline_mode = #tpu.pipeline_mode<synchronous>, transform_indices = @transform_20, window_bounds = array<i64: 128, 128>}, {pipeline_mode = #tpu.pipeline_mode<synchronous>, transform_indices = @transform_21, window_bounds = array<i64: 64, 128>}, {pipeline_mode = #tpu.pipeline_mode<synchronous>, transform_indices = @transform_22, window_bounds = array<i64: 1, 128>}, {transform_indices = @transform_23, window_bounds = array<i64: 8, 128>}]} {
    %c0 = arith.constant 0 : index
    %c0_0 = arith.constant 0 : index
    %0 = vector.load %arg1[%c0, %c0_0] : memref<8x32xf32, #tpu.memory_space<vmem>>, vector<8x32xf32>
    %1 = arith.truncf %0 : vector<8x32xf32> to vector<8x32xbf16>
    %c0_1 = arith.constant 0 : index
    %c0_2 = arith.constant 0 : index
    %2 = vector.load %arg2[%c0_1, %c0_2] : memref<8x1024xbf16, #tpu.memory_space<vmem>>, vector<8x1024xbf16>
    %c0_3 = arith.constant 0 : index
    %c0_4 = arith.constant 0 : index
    %3 = vector.load %arg3[%c0_3, %c0_4] : memref<32x512xbf16, #tpu.memory_space<vmem>>, vector<32x512xbf16>
    %cst = arith.constant dense<0.000000e+00> : vector<8x512xf32>
    %4 = tpu.matmul %1, %3, %cst {dimension_numbers = #tpu.dot_dimension_numbers<[1], [0], [0], [1], [0, 0, 1, 1], [], []>} : vector<8x32xbf16>, vector<32x512xbf16>, vector<8x512xf32> -> vector<8x512xf32>
    %c0_5 = arith.constant 0 : index
    %c0_6 = arith.constant 0 : index
    %5 = vector.load %arg4[%c0_5, %c0_6] : memref<1x512xf32, #tpu.memory_space<vmem>>, vector<1x512xf32>
    %6 = vector.broadcast %5 : vector<1x512xf32> to vector<8x512xf32>
    %7 = arith.addf %4, %6 : vector<8x512xf32>
    %8 = arith.truncf %7 : vector<8x512xf32> to vector<8x512xbf16>
    %9 = vector.extract_strided_slice %8 {offsets = [0, 0], sizes = [8, 128], strides = [1, 1]} : vector<8x512xbf16> to vector<8x128xbf16>
    %10 = vector.extract_strided_slice %2 {offsets = [0, 0], sizes = [8, 128], strides = [1, 1]} : vector<8x1024xbf16> to vector<8x128xbf16>
    %11 = vector.extract_strided_slice %2 {offsets = [0, 512], sizes = [8, 128], strides = [1, 1]} : vector<8x1024xbf16> to vector<8x128xbf16>
    %cst_7 = arith.constant dense<0.000000e+00> : vector<8x8xf32>
    %12 = tpu.matmul %9, %10, %cst_7 {dimension_numbers = #tpu.dot_dimension_numbers<[1], [1], [0], [0], [0, 0, 1, 0], [], []>} : vector<8x128xbf16>, vector<8x128xbf16>, vector<8x8xf32> -> vector<8x8xf32>
    %cst_8 = arith.constant dense<0xFF800000> : vector<8xf32>
    %13 = vector.multi_reduction <maximumf>, %12, %cst_8 [1] : vector<8x8xf32> to vector<8xf32>
    %14 = vector.shape_cast %13 : vector<8xf32> to vector<8x1xf32>
    %15 = vector.broadcast %14 : vector<8x1xf32> to vector<8x8xf32>
    %16 = arith.subf %12, %15 : vector<8x8xf32>
    %17 = math.exp %16 : vector<8x8xf32>
    %cst_9 = arith.constant dense<0.000000e+00> : vector<8xf32>
    %18 = vector.multi_reduction <add>, %17, %cst_9 [1] : vector<8x8xf32> to vector<8xf32>
    %19 = vector.shape_cast %18 : vector<8xf32> to vector<8x1xf32>
    %20 = tpu.reciprocal %19 {approx = true} : vector<8x1xf32> -> vector<8x1xf32>
    %21 = vector.broadcast %20 : vector<8x1xf32> to vector<8x8xf32>
    %22 = arith.mulf %17, %21 : vector<8x8xf32>
    %23 = arith.truncf %22 : vector<8x8xf32> to vector<8x8xbf16>
    %cst_10 = arith.constant dense<0.000000e+00> : vector<8x128xf32>
    %24 = tpu.matmul %23, %11, %cst_10 {dimension_numbers = #tpu.dot_dimension_numbers<[1], [0], [0], [1], [0, 0, 1, 1], [], []>} : vector<8x8xbf16>, vector<8x128xbf16>, vector<8x128xf32> -> vector<8x128xf32>
    %25 = vector.extract_strided_slice %8 {offsets = [0, 128], sizes = [8, 128], strides = [1, 1]} : vector<8x512xbf16> to vector<8x128xbf16>
    %26 = vector.extract_strided_slice %2 {offsets = [0, 128], sizes = [8, 128], strides = [1, 1]} : vector<8x1024xbf16> to vector<8x128xbf16>
    %27 = vector.extract_strided_slice %2 {offsets = [0, 640], sizes = [8, 128], strides = [1, 1]} : vector<8x1024xbf16> to vector<8x128xbf16>
    %cst_11 = arith.constant dense<0.000000e+00> : vector<8x8xf32>
    %28 = tpu.matmul %25, %26, %cst_11 {dimension_numbers = #tpu.dot_dimension_numbers<[1], [1], [0], [0], [0, 0, 1, 0], [], []>} : vector<8x128xbf16>, vector<8x128xbf16>, vector<8x8xf32> -> vector<8x8xf32>
    %cst_12 = arith.constant dense<0xFF800000> : vector<8xf32>
    %29 = vector.multi_reduction <maximumf>, %28, %cst_12 [1] : vector<8x8xf32> to vector<8xf32>
    %30 = vector.shape_cast %29 : vector<8xf32> to vector<8x1xf32>
    %31 = vector.broadcast %30 : vector<8x1xf32> to vector<8x8xf32>
    %32 = arith.subf %28, %31 : vector<8x8xf32>
    %33 = math.exp %32 : vector<8x8xf32>
    %cst_13 = arith.constant dense<0.000000e+00> : vector<8xf32>
    %34 = vector.multi_reduction <add>, %33, %cst_13 [1] : vector<8x8xf32> to vector<8xf32>
    %35 = vector.shape_cast %34 : vector<8xf32> to vector<8x1xf32>
    %36 = tpu.reciprocal %35 {approx = true} : vector<8x1xf32> -> vector<8x1xf32>
    %37 = vector.broadcast %36 : vector<8x1xf32> to vector<8x8xf32>
    %38 = arith.mulf %33, %37 : vector<8x8xf32>
    %39 = arith.truncf %38 : vector<8x8xf32> to vector<8x8xbf16>
    %cst_14 = arith.constant dense<0.000000e+00> : vector<8x128xf32>
    %40 = tpu.matmul %39, %27, %cst_14 {dimension_numbers = #tpu.dot_dimension_numbers<[1], [0], [0], [1], [0, 0, 1, 1], [], []>} : vector<8x8xbf16>, vector<8x128xbf16>, vector<8x128xf32> -> vector<8x128xf32>
    %41 = vector.extract_strided_slice %8 {offsets = [0, 256], sizes = [8, 128], strides = [1, 1]} : vector<8x512xbf16> to vector<8x128xbf16>
    %42 = vector.extract_strided_slice %2 {offsets = [0, 256], sizes = [8, 128], strides = [1, 1]} : vector<8x1024xbf16> to vector<8x128xbf16>
    %43 = vector.extract_strided_slice %2 {offsets = [0, 768], sizes = [8, 128], strides = [1, 1]} : vector<8x1024xbf16> to vector<8x128xbf16>
    %cst_15 = arith.constant dense<0.000000e+00> : vector<8x8xf32>
    %44 = tpu.matmul %41, %42, %cst_15 {dimension_numbers = #tpu.dot_dimension_numbers<[1], [1], [0], [0], [0, 0, 1, 0], [], []>} : vector<8x128xbf16>, vector<8x128xbf16>, vector<8x8xf32> -> vector<8x8xf32>
    %cst_16 = arith.constant dense<0xFF800000> : vector<8xf32>
    %45 = vector.multi_reduction <maximumf>, %44, %cst_16 [1] : vector<8x8xf32> to vector<8xf32>
    %46 = vector.shape_cast %45 : vector<8xf32> to vector<8x1xf32>
    %47 = vector.broadcast %46 : vector<8x1xf32> to vector<8x8xf32>
    %48 = arith.subf %44, %47 : vector<8x8xf32>
    %49 = math.exp %48 : vector<8x8xf32>
    %cst_17 = arith.constant dense<0.000000e+00> : vector<8xf32>
    %50 = vector.multi_reduction <add>, %49, %cst_17 [1] : vector<8x8xf32> to vector<8xf32>
    %51 = vector.shape_cast %50 : vector<8xf32> to vector<8x1xf32>
    %52 = tpu.reciprocal %51 {approx = true} : vector<8x1xf32> -> vector<8x1xf32>
    %53 = vector.broadcast %52 : vector<8x1xf32> to vector<8x8xf32>
    %54 = arith.mulf %49, %53 : vector<8x8xf32>
    %55 = arith.truncf %54 : vector<8x8xf32> to vector<8x8xbf16>
    %cst_18 = arith.constant dense<0.000000e+00> : vector<8x128xf32>
    %56 = tpu.matmul %55, %43, %cst_18 {dimension_numbers = #tpu.dot_dimension_numbers<[1], [0], [0], [1], [0, 0, 1, 1], [], []>} : vector<8x8xbf16>, vector<8x128xbf16>, vector<8x128xf32> -> vector<8x128xf32>
    %57 = vector.extract_strided_slice %8 {offsets = [0, 384], sizes = [8, 128], strides = [1, 1]} : vector<8x512xbf16> to vector<8x128xbf16>
    %58 = vector.extract_strided_slice %2 {offsets = [0, 384], sizes = [8, 128], strides = [1, 1]} : vector<8x1024xbf16> to vector<8x128xbf16>
    %59 = vector.extract_strided_slice %2 {offsets = [0, 896], sizes = [8, 128], strides = [1, 1]} : vector<8x1024xbf16> to vector<8x128xbf16>
    %cst_19 = arith.constant dense<0.000000e+00> : vector<8x8xf32>
    %60 = tpu.matmul %57, %58, %cst_19 {dimension_numbers = #tpu.dot_dimension_numbers<[1], [1], [0], [0], [0, 0, 1, 0], [], []>} : vector<8x128xbf16>, vector<8x128xbf16>, vector<8x8xf32> -> vector<8x8xf32>
    %cst_20 = arith.constant dense<0xFF800000> : vector<8xf32>
    %61 = vector.multi_reduction <maximumf>, %60, %cst_20 [1] : vector<8x8xf32> to vector<8xf32>
    %62 = vector.shape_cast %61 : vector<8xf32> to vector<8x1xf32>
    %63 = vector.broadcast %62 : vector<8x1xf32> to vector<8x8xf32>
    %64 = arith.subf %60, %63 : vector<8x8xf32>
    %65 = math.exp %64 : vector<8x8xf32>
    %cst_21 = arith.constant dense<0.000000e+00> : vector<8xf32>
    %66 = vector.multi_reduction <add>, %65, %cst_21 [1] : vector<8x8xf32> to vector<8xf32>
    %67 = vector.shape_cast %66 : vector<8xf32> to vector<8x1xf32>
    %68 = tpu.reciprocal %67 {approx = true} : vector<8x1xf32> -> vector<8x1xf32>
    %69 = vector.broadcast %68 : vector<8x1xf32> to vector<8x8xf32>
    %70 = arith.mulf %65, %69 : vector<8x8xf32>
    %71 = arith.truncf %70 : vector<8x8xf32> to vector<8x8xbf16>
    %cst_22 = arith.constant dense<0.000000e+00> : vector<8x128xf32>
    %72 = tpu.matmul %71, %59, %cst_22 {dimension_numbers = #tpu.dot_dimension_numbers<[1], [0], [0], [1], [0, 0, 1, 1], [], []>} : vector<8x8xbf16>, vector<8x128xbf16>, vector<8x128xf32> -> vector<8x128xf32>
    %73 = tpu.concatenate %24, %40, %56, %72 in 1 : vector<8x128xf32>, vector<8x128xf32>, vector<8x128xf32>, vector<8x128xf32> -> vector<8x512xf32>
    %74 = arith.truncf %73 : vector<8x512xf32> to vector<8x512xbf16>
    %c0_23 = arith.constant 0 : index
    %c0_24 = arith.constant 0 : index
    %75 = vector.load %arg5[%c0_23, %c0_24] : memref<32x512xbf16, #tpu.memory_space<vmem>>, vector<32x512xbf16>
    %cst_25 = arith.constant dense<0.000000e+00> : vector<8x512xf32>
    %76 = tpu.matmul %1, %75, %cst_25 {dimension_numbers = #tpu.dot_dimension_numbers<[1], [0], [0], [1], [0, 0, 1, 1], [], []>} : vector<8x32xbf16>, vector<32x512xbf16>, vector<8x512xf32> -> vector<8x512xf32>
    %c0_26 = arith.constant 0 : index
    %c0_27 = arith.constant 0 : index
    %77 = vector.load %arg6[%c0_26, %c0_27] : memref<512x512xbf16, #tpu.memory_space<vmem>>, vector<512x512xbf16>
    %cst_28 = arith.constant dense<0.000000e+00> : vector<8x512xf32>
    %78 = tpu.matmul %74, %77, %cst_28 {dimension_numbers = #tpu.dot_dimension_numbers<[1], [0], [0], [1], [0, 0, 1, 1], [], []>} : vector<8x512xbf16>, vector<512x512xbf16>, vector<8x512xf32> -> vector<8x512xf32>
    %79 = arith.addf %76, %78 : vector<8x512xf32>
    %c0_29 = arith.constant 0 : index
    %c0_30 = arith.constant 0 : index
    %80 = vector.load %arg7[%c0_29, %c0_30] : memref<1x512xf32, #tpu.memory_space<vmem>>, vector<1x512xf32>
    %81 = vector.broadcast %80 : vector<1x512xf32> to vector<8x512xf32>
    %82 = arith.addf %79, %81 : vector<8x512xf32>
    %cst_31 = arith.constant 0.000000e+00 : f32
    %83 = vector.broadcast %cst_31 : f32 to vector<8x512xf32>
    %84 = arith.maximumf %82, %83 : vector<8x512xf32>
    %85 = arith.truncf %84 : vector<8x512xf32> to vector<8x512xbf16>
    %c0_32 = arith.constant 0 : index
    %c0_33 = arith.constant 0 : index
    %86 = vector.load %arg8[%c0_32, %c0_33] : memref<512x256xbf16, #tpu.memory_space<vmem>>, vector<512x256xbf16>
    %cst_34 = arith.constant dense<0.000000e+00> : vector<8x256xf32>
    %87 = tpu.matmul %85, %86, %cst_34 {dimension_numbers = #tpu.dot_dimension_numbers<[1], [0], [0], [1], [0, 0, 1, 1], [], []>} : vector<8x512xbf16>, vector<512x256xbf16>, vector<8x256xf32> -> vector<8x256xf32>
    %c0_35 = arith.constant 0 : index
    %c0_36 = arith.constant 0 : index
    %88 = vector.load %arg9[%c0_35, %c0_36] : memref<1x256xf32, #tpu.memory_space<vmem>>, vector<1x256xf32>
    %89 = vector.broadcast %88 : vector<1x256xf32> to vector<8x256xf32>
    %90 = arith.addf %87, %89 : vector<8x256xf32>
    %cst_37 = arith.constant 0.000000e+00 : f32
    %91 = vector.broadcast %cst_37 : f32 to vector<8x256xf32>
    %92 = arith.maximumf %90, %91 : vector<8x256xf32>
    %93 = arith.truncf %92 : vector<8x256xf32> to vector<8x256xbf16>
    %c0_38 = arith.constant 0 : index
    %c0_39 = arith.constant 0 : index
    %94 = vector.load %arg10[%c0_38, %c0_39] : memref<256x128xbf16, #tpu.memory_space<vmem>>, vector<256x128xbf16>
    %cst_40 = arith.constant dense<0.000000e+00> : vector<8x128xf32>
    %95 = tpu.matmul %93, %94, %cst_40 {dimension_numbers = #tpu.dot_dimension_numbers<[1], [0], [0], [1], [0, 0, 1, 1], [], []>} : vector<8x256xbf16>, vector<256x128xbf16>, vector<8x128xf32> -> vector<8x128xf32>
    %c0_41 = arith.constant 0 : index
    %c0_42 = arith.constant 0 : index
    %96 = vector.load %arg11[%c0_41, %c0_42] : memref<1x128xf32, #tpu.memory_space<vmem>>, vector<1x128xf32>
    %97 = vector.broadcast %96 : vector<1x128xf32> to vector<8x128xf32>
    %98 = arith.addf %95, %97 : vector<8x128xf32>
    %cst_43 = arith.constant 0.000000e+00 : f32
    %99 = vector.broadcast %cst_43 : f32 to vector<8x128xf32>
    %100 = arith.maximumf %98, %99 : vector<8x128xf32>
    %101 = arith.truncf %100 : vector<8x128xf32> to vector<8x128xbf16>
    %c0_44 = arith.constant 0 : index
    %c0_45 = arith.constant 0 : index
    %102 = vector.load %arg12[%c0_44, %c0_45] : memref<256x128xbf16, #tpu.memory_space<vmem>>, vector<256x128xbf16>
    %cst_46 = arith.constant dense<0.000000e+00> : vector<8x128xf32>
    %103 = tpu.matmul %93, %102, %cst_46 {dimension_numbers = #tpu.dot_dimension_numbers<[1], [0], [0], [1], [0, 0, 1, 1], [], []>} : vector<8x256xbf16>, vector<256x128xbf16>, vector<8x128xf32> -> vector<8x128xf32>
    %c0_47 = arith.constant 0 : index
    %c0_48 = arith.constant 0 : index
    %104 = vector.load %arg13[%c0_47, %c0_48] : memref<1x128xf32, #tpu.memory_space<vmem>>, vector<1x128xf32>
    %105 = vector.broadcast %104 : vector<1x128xf32> to vector<8x128xf32>
    %106 = arith.addf %103, %105 : vector<8x128xf32>
    %cst_49 = arith.constant 0.000000e+00 : f32
    %107 = vector.broadcast %cst_49 : f32 to vector<8x128xf32>
    %108 = arith.maximumf %106, %107 : vector<8x128xf32>
    %109 = arith.truncf %108 : vector<8x128xf32> to vector<8x128xbf16>
    %c0_50 = arith.constant 0 : index
    %c0_51 = arith.constant 0 : index
    %110 = vector.load %arg14[%c0_50, %c0_51] : memref<128x128xbf16, #tpu.memory_space<vmem>>, vector<128x128xbf16>
    %cst_52 = arith.constant dense<0.000000e+00> : vector<8x128xf32>
    %111 = tpu.matmul %109, %110, %cst_52 {dimension_numbers = #tpu.dot_dimension_numbers<[1], [0], [0], [1], [0, 0, 1, 1], [], []>} : vector<8x128xbf16>, vector<128x128xbf16>, vector<8x128xf32> -> vector<8x128xf32>
    %c0_53 = arith.constant 0 : index
    %c0_54 = arith.constant 0 : index
    %112 = vector.load %arg15[%c0_53, %c0_54] : memref<1x128xf32, #tpu.memory_space<vmem>>, vector<1x128xf32>
    %113 = vector.broadcast %112 : vector<1x128xf32> to vector<8x128xf32>
    %114 = arith.addf %111, %113 : vector<8x128xf32>
    %cst_55 = arith.constant 0.000000e+00 : f32
    %115 = vector.broadcast %cst_55 : f32 to vector<8x128xf32>
    %116 = arith.maximumf %114, %115 : vector<8x128xf32>
    %117 = arith.truncf %116 : vector<8x128xf32> to vector<8x128xbf16>
    %c0_56 = arith.constant 0 : index
    %c0_57 = arith.constant 0 : index
    %118 = vector.load %arg16[%c0_56, %c0_57] : memref<256x128xbf16, #tpu.memory_space<vmem>>, vector<256x128xbf16>
    %cst_58 = arith.constant dense<0.000000e+00> : vector<8x128xf32>
    %119 = tpu.matmul %93, %118, %cst_58 {dimension_numbers = #tpu.dot_dimension_numbers<[1], [0], [0], [1], [0, 0, 1, 1], [], []>} : vector<8x256xbf16>, vector<256x128xbf16>, vector<8x128xf32> -> vector<8x128xf32>
    %c0_59 = arith.constant 0 : index
    %c0_60 = arith.constant 0 : index
    %120 = vector.load %arg17[%c0_59, %c0_60] : memref<1x128xf32, #tpu.memory_space<vmem>>, vector<1x128xf32>
    %121 = vector.broadcast %120 : vector<1x128xf32> to vector<8x128xf32>
    %122 = arith.addf %119, %121 : vector<8x128xf32>
    %cst_61 = arith.constant 0.000000e+00 : f32
    %123 = vector.broadcast %cst_61 : f32 to vector<8x128xf32>
    %124 = arith.maximumf %122, %123 : vector<8x128xf32>
    %125 = arith.truncf %124 : vector<8x128xf32> to vector<8x128xbf16>
    %c0_62 = arith.constant 0 : index
    %c0_63 = arith.constant 0 : index
    %126 = vector.load %arg18[%c0_62, %c0_63] : memref<128x64xbf16, #tpu.memory_space<vmem>>, vector<128x64xbf16>
    %cst_64 = arith.constant dense<0.000000e+00> : vector<8x64xf32>
    %127 = tpu.matmul %125, %126, %cst_64 {dimension_numbers = #tpu.dot_dimension_numbers<[1], [0], [0], [1], [0, 0, 1, 1], [], []>} : vector<8x128xbf16>, vector<128x64xbf16>, vector<8x64xf32> -> vector<8x64xf32>
    %c0_65 = arith.constant 0 : index
    %c0_66 = arith.constant 0 : index
    %128 = vector.load %arg19[%c0_65, %c0_66] : memref<1x64xf32, #tpu.memory_space<vmem>>, vector<1x64xf32>
    %129 = vector.broadcast %128 : vector<1x64xf32> to vector<8x64xf32>
    %130 = arith.addf %127, %129 : vector<8x64xf32>
    %cst_67 = arith.constant 0.000000e+00 : f32
    %131 = vector.broadcast %cst_67 : f32 to vector<8x64xf32>
    %132 = arith.maximumf %130, %131 : vector<8x64xf32>
    %133 = arith.truncf %132 : vector<8x64xf32> to vector<8x64xbf16>
    %c0_68 = arith.constant 0 : index
    %c0_69 = arith.constant 0 : index
    %134 = vector.load %arg20[%c0_68, %c0_69] : memref<128x128xbf16, #tpu.memory_space<vmem>>, vector<128x128xbf16>
    %cst_70 = arith.constant dense<0.000000e+00> : vector<8x128xf32>
    %135 = tpu.matmul %101, %134, %cst_70 {dimension_numbers = #tpu.dot_dimension_numbers<[1], [0], [0], [1], [0, 0, 1, 1], [], []>} : vector<8x128xbf16>, vector<128x128xbf16>, vector<8x128xf32> -> vector<8x128xf32>
    %c0_71 = arith.constant 0 : index
    %c0_72 = arith.constant 0 : index
    %136 = vector.load %arg21[%c0_71, %c0_72] : memref<128x128xbf16, #tpu.memory_space<vmem>>, vector<128x128xbf16>
    %cst_73 = arith.constant dense<0.000000e+00> : vector<8x128xf32>
    %137 = tpu.matmul %117, %136, %cst_73 {dimension_numbers = #tpu.dot_dimension_numbers<[1], [0], [0], [1], [0, 0, 1, 1], [], []>} : vector<8x128xbf16>, vector<128x128xbf16>, vector<8x128xf32> -> vector<8x128xf32>
    %138 = arith.addf %135, %137 : vector<8x128xf32>
    %c0_74 = arith.constant 0 : index
    %c0_75 = arith.constant 0 : index
    %139 = vector.load %arg22[%c0_74, %c0_75] : memref<64x128xbf16, #tpu.memory_space<vmem>>, vector<64x128xbf16>
    %cst_76 = arith.constant dense<0.000000e+00> : vector<8x128xf32>
    %140 = tpu.matmul %133, %139, %cst_76 {dimension_numbers = #tpu.dot_dimension_numbers<[1], [0], [0], [1], [0, 0, 1, 1], [], []>} : vector<8x64xbf16>, vector<64x128xbf16>, vector<8x128xf32> -> vector<8x128xf32>
    %141 = arith.addf %138, %140 : vector<8x128xf32>
    %c0_77 = arith.constant 0 : index
    %c0_78 = arith.constant 0 : index
    %142 = vector.load %arg23[%c0_77, %c0_78] : memref<1x128xf32, #tpu.memory_space<vmem>>, vector<1x128xf32>
    %143 = vector.broadcast %142 : vector<1x128xf32> to vector<8x128xf32>
    %144 = arith.addf %141, %143 : vector<8x128xf32>
    %145 = tpu.iota {dimensions = array<i32: 1>} : vector<8x128xi32>
    %c8_i32 = arith.constant 8 : i32
    %146 = vector.broadcast %c8_i32 : i32 to vector<8x128xi32>
    %147 = arith.cmpi eq, %145, %146 : vector<8x128xi32>
    %148 = arith.negf %144 : vector<8x128xf32>
    %149 = math.exp %148 : vector<8x128xf32>
    %cst_79 = arith.constant 1.000000e+00 : f32
    %150 = vector.broadcast %cst_79 : f32 to vector<8x128xf32>
    %151 = arith.addf %150, %149 : vector<8x128xf32>
    %152 = arith.divf %150, %151 : vector<8x128xf32>
    %153 = arith.select %147, %152, %144 : vector<8x128xi1>, vector<8x128xf32>
    %c0_80 = arith.constant 0 : index
    %c0_81 = arith.constant 0 : index
    %154 = vector.load %arg24[%c0_80, %c0_81] : memref<8x128xf32, #tpu.memory_space<vmem>>, vector<8x128xf32>
    tpu.vector_store %arg24[%c0_80, %c0_81], %153 {strides = array<i32>} : memref<8x128xf32, #tpu.memory_space<vmem>>, vector<8x128xf32>,
    return
  }
  func.func @transform_0(%arg0: i32) -> (i32, i32) {
    %c0_i32 = arith.constant 0 : i32
    %c0_i32_0 = arith.constant 0 : i32
    return %arg0, %c0_i32 : i32, i32
  }
  func.func @transform_1(%arg0: i32) -> (i32, i32) {
    %c0_i32 = arith.constant 0 : i32
    %c0_i32_0 = arith.constant 0 : i32
    %c0_i32_1 = arith.constant 0 : i32
    return %c0_i32, %c0_i32_0 : i32, i32
  }
  func.func @transform_2(%arg0: i32) -> (i32, i32) {
    %c0_i32 = arith.constant 0 : i32
    %c0_i32_0 = arith.constant 0 : i32
    %c0_i32_1 = arith.constant 0 : i32
    return %c0_i32, %c0_i32_0 : i32, i32
  }
  func.func @transform_3(%arg0: i32) -> (i32, i32) {
    %c0_i32 = arith.constant 0 : i32
    %c0_i32_0 = arith.constant 0 : i32
    %c0_i32_1 = arith.constant 0 : i32
    return %c0_i32, %c0_i32_0 : i32, i32
  }
  func.func @transform_4(%arg0: i32) -> (i32, i32) {
    %c0_i32 = arith.constant 0 : i32
    %c0_i32_0 = arith.constant 0 : i32
    %c0_i32_1 = arith.constant 0 : i32
    return %c0_i32, %c0_i32_0 : i32, i32
  }
  func.func @transform_5(%arg0: i32) -> (i32, i32) {
    %c0_i32 = arith.constant 0 : i32
    %c0_i32_0 = arith.constant 0 : i32
    %c0_i32_1 = arith.constant 0 : i32
    return %c0_i32, %c0_i32_0 : i32, i32
  }
  func.func @transform_6(%arg0: i32) -> (i32, i32) {
    %c0_i32 = arith.constant 0 : i32
    %c0_i32_0 = arith.constant 0 : i32
    %c0_i32_1 = arith.constant 0 : i32
    return %c0_i32, %c0_i32_0 : i32, i32
  }
  func.func @transform_7(%arg0: i32) -> (i32, i32) {
    %c0_i32 = arith.constant 0 : i32
    %c0_i32_0 = arith.constant 0 : i32
    %c0_i32_1 = arith.constant 0 : i32
    return %c0_i32, %c0_i32_0 : i32, i32
  }
  func.func @transform_8(%arg0: i32) -> (i32, i32) {
    %c0_i32 = arith.constant 0 : i32
    %c0_i32_0 = arith.constant 0 : i32
    %c0_i32_1 = arith.constant 0 : i32
    return %c0_i32, %c0_i32_0 : i32, i32
  }
  func.func @transform_9(%arg0: i32) -> (i32, i32) {
    %c0_i32 = arith.constant 0 : i32
    %c0_i32_0 = arith.constant 0 : i32
    %c0_i32_1 = arith.constant 0 : i32
    return %c0_i32, %c0_i32_0 : i32, i32
  }
  func.func @transform_10(%arg0: i32) -> (i32, i32) {
    %c0_i32 = arith.constant 0 : i32
    %c0_i32_0 = arith.constant 0 : i32
    %c0_i32_1 = arith.constant 0 : i32
    return %c0_i32, %c0_i32_0 : i32, i32
  }
  func.func @transform_11(%arg0: i32) -> (i32, i32) {
    %c0_i32 = arith.constant 0 : i32
    %c0_i32_0 = arith.constant 0 : i32
    %c0_i32_1 = arith.constant 0 : i32
    return %c0_i32, %c0_i32_0 : i32, i32
  }
  func.func @transform_12(%arg0: i32) -> (i32, i32) {
    %c0_i32 = arith.constant 0 : i32
    %c0_i32_0 = arith.constant 0 : i32
    %c0_i32_1 = arith.constant 0 : i32
    return %c0_i32, %c0_i32_0 : i32, i32
  }
  func.func @transform_13(%arg0: i32) -> (i32, i32) {
    %c0_i32 = arith.constant 0 : i32
    %c0_i32_0 = arith.constant 0 : i32
    %c0_i32_1 = arith.constant 0 : i32
    return %c0_i32, %c0_i32_0 : i32, i32
  }
  func.func @transform_14(%arg0: i32) -> (i32, i32) {
    %c0_i32 = arith.constant 0 : i32
    %c0_i32_0 = arith.constant 0 : i32
    %c0_i32_1 = arith.constant 0 : i32
    return %c0_i32, %c0_i32_0 : i32, i32
  }
  func.func @transform_15(%arg0: i32) -> (i32, i32) {
    %c0_i32 = arith.constant 0 : i32
    %c0_i32_0 = arith.constant 0 : i32
    %c0_i32_1 = arith.constant 0 : i32
    return %c0_i32, %c0_i32_0 : i32, i32
  }
  func.func @transform_16(%arg0: i32) -> (i32, i32) {
    %c0_i32 = arith.constant 0 : i32
    %c0_i32_0 = arith.constant 0 : i32
    %c0_i32_1 = arith.constant 0 : i32
    return %c0_i32, %c0_i32_0 : i32, i32
  }
  func.func @transform_17(%arg0: i32) -> (i32, i32) {
    %c0_i32 = arith.constant 0 : i32
    %c0_i32_0 = arith.constant 0 : i32
    %c0_i32_1 = arith.constant 0 : i32
    return %c0_i32, %c0_i32_0 : i32, i32
  }
  func.func @transform_18(%arg0: i32) -> (i32, i32) {
    %c0_i32 = arith.constant 0 : i32
    %c0_i32_0 = arith.constant 0 : i32
    %c0_i32_1 = arith.constant 0 : i32
    return %c0_i32, %c0_i32_0 : i32, i32
  }
  func.func @transform_19(%arg0: i32) -> (i32, i32) {
    %c0_i32 = arith.constant 0 : i32
    %c0_i32_0 = arith.constant 0 : i32
    %c0_i32_1 = arith.constant 0 : i32
    return %c0_i32, %c0_i32_0 : i32, i32
  }
  func.func @transform_20(%arg0: i32) -> (i32, i32) {
    %c0_i32 = arith.constant 0 : i32
    %c0_i32_0 = arith.constant 0 : i32
    %c0_i32_1 = arith.constant 0 : i32
    return %c0_i32, %c0_i32_0 : i32, i32
  }
  func.func @transform_21(%arg0: i32) -> (i32, i32) {
    %c0_i32 = arith.constant 0 : i32
    %c0_i32_0 = arith.constant 0 : i32
    %c0_i32_1 = arith.constant 0 : i32
    return %c0_i32, %c0_i32_0 : i32, i32
  }
  func.func @transform_22(%arg0: i32) -> (i32, i32) {
    %c0_i32 = arith.constant 0 : i32
    %c0_i32_0 = arith.constant 0 : i32
    %c0_i32_1 = arith.constant 0 : i32
    return %c0_i32, %c0_i32_0 : i32, i32
  }
  func.func @transform_23(%arg0: i32) -> (i32, i32) {
    %c0_i32 = arith.constant 0 : i32
    %c0_i32_0 = arith.constant 0 : i32
    return %arg0, %c0_i32 : i32, i32
  }
}

module attributes {stable_mosaic.version = 11 : i64} {
  func.func @multitask_kernel(%arg0: i32, %arg1: memref<8x32xf32, #tpu.memory_space<vmem>>, %arg2: memref<8x1024xbf16, #tpu.memory_space<vmem>>, %arg3: memref<32x512xbf16, #tpu.memory_space<vmem>>, %arg4: memref<1x512xf32, #tpu.memory_space<vmem>>, %arg5: memref<32x512xbf16, #tpu.memory_space<vmem>>, %arg6: memref<512x512xbf16, #tpu.memory_space<vmem>>, %arg7: memref<1x512xf32, #tpu.memory_space<vmem>>, %arg8: memref<512x256xbf16, #tpu.memory_space<vmem>>, %arg9: memref<1x256xf32, #tpu.memory_space<vmem>>, %arg10: memref<256x128xbf16, #tpu.memory_space<vmem>>, %arg11: memref<1x128xf32, #tpu.memory_space<vmem>>, %arg12: memref<256x128xbf16, #tpu.memory_space<vmem>>, %arg13: memref<1x128xf32, #tpu.memory_space<vmem>>, %arg14: memref<128x128xbf16, #tpu.memory_space<vmem>>, %arg15: memref<1x128xf32, #tpu.memory_space<vmem>>, %arg16: memref<256x128xbf16, #tpu.memory_space<vmem>>, %arg17: memref<1x128xf32, #tpu.memory_space<vmem>>, %arg18: memref<128x64xbf16, #tpu.memory_space<vmem>>, %arg19: memref<1x64xf32, #tpu.memory_space<vmem>>, %arg20: memref<128x128xbf16, #tpu.memory_space<vmem>>, %arg21: memref<128x128xbf16, #tpu.memory_space<vmem>>, %arg22: memref<64x128xbf16, #tpu.memory_space<vmem>>, %arg23: memref<1x128xf32, #tpu.memory_space<vmem>>, %arg24: memref<8x128xf32, #tpu.memory_space<vmem>>) attributes {dimension_semantics = [#tpu.dimension_semantics<parallel>], iteration_bounds = array<i64: 1>, scalar_prefetch = 0 : i64, scratch_operands = 0 : i64, tpu.core_type = #tpu.core_type<tc>, window_params = [{transform_indices = @transform_0, window_bounds = array<i64: 8, 32>}, {pipeline_mode = #tpu.pipeline_mode<synchronous>, transform_indices = @transform_1, window_bounds = array<i64: 8, 1024>}, {pipeline_mode = #tpu.pipeline_mode<synchronous>, transform_indices = @transform_2, window_bounds = array<i64: 32, 512>}, {pipeline_mode = #tpu.pipeline_mode<synchronous>, transform_indices = @transform_3, window_bounds = array<i64: 1, 512>}, {pipeline_mode = #tpu.pipeline_mode<synchronous>, transform_indices = @transform_4, window_bounds = array<i64: 32, 512>}, {pipeline_mode = #tpu.pipeline_mode<synchronous>, transform_indices = @transform_5, window_bounds = array<i64: 512, 512>}, {pipeline_mode = #tpu.pipeline_mode<synchronous>, transform_indices = @transform_6, window_bounds = array<i64: 1, 512>}, {pipeline_mode = #tpu.pipeline_mode<synchronous>, transform_indices = @transform_7, window_bounds = array<i64: 512, 256>}, {pipeline_mode = #tpu.pipeline_mode<synchronous>, transform_indices = @transform_8, window_bounds = array<i64: 1, 256>}, {pipeline_mode = #tpu.pipeline_mode<synchronous>, transform_indices = @transform_9, window_bounds = array<i64: 256, 128>}, {pipeline_mode = #tpu.pipeline_mode<synchronous>, transform_indices = @transform_10, window_bounds = array<i64: 1, 128>}, {pipeline_mode = #tpu.pipeline_mode<synchronous>, transform_indices = @transform_11, window_bounds = array<i64: 256, 128>}, {pipeline_mode = #tpu.pipeline_mode<synchronous>, transform_indices = @transform_12, window_bounds = array<i64: 1, 128>}, {pipeline_mode = #tpu.pipeline_mode<synchronous>, transform_indices = @transform_13, window_bounds = array<i64: 128, 128>}, {pipeline_mode = #tpu.pipeline_mode<synchronous>, transform_indices = @transform_14, window_bounds = array<i64: 1, 128>}, {pipeline_mode = #tpu.pipeline_mode<synchronous>, transform_indices = @transform_15, window_bounds = array<i64: 256, 128>}, {pipeline_mode = #tpu.pipeline_mode<synchronous>, transform_indices = @transform_16, window_bounds = array<i64: 1, 128>}, {pipeline_mode = #tpu.pipeline_mode<synchronous>, transform_indices = @transform_17, window_bounds = array<i64: 128, 64>}, {pipeline_mode = #tpu.pipeline_mode<synchronous>, transform_indices = @transform_18, window_bounds = array<i64: 1, 64>}, {pipeline_mode = #tpu.pipeline_mode<synchronous>, transform_indices = @transform_19, window_bounds = array<i64: 128, 128>}, {pipeline_mode = #tpu.pipeline_mode<synchronous>, transform_indices = @transform_20, window_bounds = array<i64: 128, 128>}, {pipeline_mode = #tpu.pipeline_mode<synchronous>, transform_indices = @transform_21, window_bounds = array<i64: 64, 128>}, {pipeline_mode = #tpu.pipeline_mode<synchronous>, transform_indices = @transform_22, window_bounds = array<i64: 1, 128>}, {transform_indices = @transform_23, window_bounds = array<i64: 8, 128>}]} {
    %c0 = arith.constant 0 : index
    %c0_0 = arith.constant 0 : index
    %0 = vector.load %arg1[%c0, %c0_0] : memref<8x32xf32, #tpu.memory_space<vmem>>, vector<8x32xf32>
    %1 = arith.truncf %0 : vector<8x32xf32> to vector<8x32xbf16>
    %c0_1 = arith.constant 0 : index
    %c0_2 = arith.constant 0 : index
    %2 = vector.load %arg2[%c0_1, %c0_2] : memref<8x1024xbf16, #tpu.memory_space<vmem>>, vector<8x1024xbf16>
    %c0_3 = arith.constant 0 : index
    %c0_4 = arith.constant 0 : index
    %3 = vector.load %arg3[%c0_3, %c0_4] : memref<32x512xbf16, #tpu.memory_space<vmem>>, vector<32x512xbf16>
    %cst = arith.constant dense<0.000000e+00> : vector<8x512xf32>
    %4 = tpu.matmul %1, %3, %cst {dimension_numbers = #tpu.dot_dimension_numbers<[1], [0], [0], [1], [0, 0, 1, 1], [], []>} : vector<8x32xbf16>, vector<32x512xbf16>, vector<8x512xf32> -> vector<8x512xf32>
    %c0_5 = arith.constant 0 : index
    %c0_6 = arith.constant 0 : index
    %5 = vector.load %arg4[%c0_5, %c0_6] : memref<1x512xf32, #tpu.memory_space<vmem>>, vector<1x512xf32>
    %6 = vector.broadcast %5 : vector<1x512xf32> to vector<8x512xf32>
    %7 = arith.addf %4, %6 : vector<8x512xf32>
    %8 = arith.truncf %7 : vector<8x512xf32> to vector<8x512xbf16>
    %9 = vector.extract_strided_slice %8 {offsets = [0, 0], sizes = [8, 128], strides = [1, 1]} : vector<8x512xbf16> to vector<8x128xbf16>
    %10 = vector.extract_strided_slice %2 {offsets = [0, 0], sizes = [8, 128], strides = [1, 1]} : vector<8x1024xbf16> to vector<8x128xbf16>
    %11 = vector.extract_strided_slice %2 {offsets = [0, 512], sizes = [8, 128], strides = [1, 1]} : vector<8x1024xbf16> to vector<8x128xbf16>
    %cst_7 = arith.constant dense<0.000000e+00> : vector<8x8xf32>
    %12 = tpu.matmul %9, %10, %cst_7 {dimension_numbers = #tpu.dot_dimension_numbers<[1], [1], [0], [0], [0, 0, 1, 0], [], []>} : vector<8x128xbf16>, vector<8x128xbf16>, vector<8x8xf32> -> vector<8x8xf32>
    %cst_8 = arith.constant dense<0xFF800000> : vector<8xf32>
    %13 = vector.multi_reduction <maximumf>, %12, %cst_8 [1] : vector<8x8xf32> to vector<8xf32>
    %14 = vector.shape_cast %13 : vector<8xf32> to vector<8x1xf32>
    %15 = vector.broadcast %14 : vector<8x1xf32> to vector<8x8xf32>
    %16 = arith.subf %12, %15 : vector<8x8xf32>
    %17 = math.exp %16 : vector<8x8xf32>
    %cst_9 = arith.constant dense<0.000000e+00> : vector<8xf32>
    %18 = vector.multi_reduction <add>, %17, %cst_9 [1] : vector<8x8xf32> to vector<8xf32>
    %19 = vector.shape_cast %18 : vector<8xf32> to vector<8x1xf32>
    %20 = tpu.reciprocal %19 {approx = true} : vector<8x1xf32> -> vector<8x1xf32>
    %21 = vector.broadcast %20 : vector<8x1xf32> to vector<8x8xf32>
    %22 = arith.mulf %17, %21 : vector<8x8xf32>
    %23 = arith.truncf %22 : vector<8x8xf32> to vector<8x8xbf16>
    %cst_10 = arith.constant dense<0.000000e+00> : vector<8x128xf32>
    %24 = tpu.matmul %23, %11, %cst_10 {dimension_numbers = #tpu.dot_dimension_numbers<[1], [0], [0], [1], [0, 0, 1, 1], [], []>} : vector<8x8xbf16>, vector<8x128xbf16>, vector<8x128xf32> -> vector<8x128xf32>
    %25 = vector.extract_strided_slice %8 {offsets = [0, 128], sizes = [8, 128], strides = [1, 1]} : vector<8x512xbf16> to vector<8x128xbf16>
    %26 = vector.extract_strided_slice %2 {offsets = [0, 128], sizes = [8, 128], strides = [1, 1]} : vector<8x1024xbf16> to vector<8x128xbf16>
    %27 = vector.extract_strided_slice %2 {offsets = [0, 640], sizes = [8, 128], strides = [1, 1]} : vector<8x1024xbf16> to vector<8x128xbf16>
    %cst_11 = arith.constant dense<0.000000e+00> : vector<8x8xf32>
    %28 = tpu.matmul %25, %26, %cst_11 {dimension_numbers = #tpu.dot_dimension_numbers<[1], [1], [0], [0], [0, 0, 1, 0], [], []>} : vector<8x128xbf16>, vector<8x128xbf16>, vector<8x8xf32> -> vector<8x8xf32>
    %cst_12 = arith.constant dense<0xFF800000> : vector<8xf32>
    %29 = vector.multi_reduction <maximumf>, %28, %cst_12 [1] : vector<8x8xf32> to vector<8xf32>
    %30 = vector.shape_cast %29 : vector<8xf32> to vector<8x1xf32>
    %31 = vector.broadcast %30 : vector<8x1xf32> to vector<8x8xf32>
    %32 = arith.subf %28, %31 : vector<8x8xf32>
    %33 = math.exp %32 : vector<8x8xf32>
    %cst_13 = arith.constant dense<0.000000e+00> : vector<8xf32>
    %34 = vector.multi_reduction <add>, %33, %cst_13 [1] : vector<8x8xf32> to vector<8xf32>
    %35 = vector.shape_cast %34 : vector<8xf32> to vector<8x1xf32>
    %36 = tpu.reciprocal %35 {approx = true} : vector<8x1xf32> -> vector<8x1xf32>
    %37 = vector.broadcast %36 : vector<8x1xf32> to vector<8x8xf32>
    %38 = arith.mulf %33, %37 : vector<8x8xf32>
    %39 = arith.truncf %38 : vector<8x8xf32> to vector<8x8xbf16>
    %cst_14 = arith.constant dense<0.000000e+00> : vector<8x128xf32>
    %40 = tpu.matmul %39, %27, %cst_14 {dimension_numbers = #tpu.dot_dimension_numbers<[1], [0], [0], [1], [0, 0, 1, 1], [], []>} : vector<8x8xbf16>, vector<8x128xbf16>, vector<8x128xf32> -> vector<8x128xf32>
    %41 = vector.extract_strided_slice %8 {offsets = [0, 256], sizes = [8, 128], strides = [1, 1]} : vector<8x512xbf16> to vector<8x128xbf16>
    %42 = vector.extract_strided_slice %2 {offsets = [0, 256], sizes = [8, 128], strides = [1, 1]} : vector<8x1024xbf16> to vector<8x128xbf16>
    %43 = vector.extract_strided_slice %2 {offsets = [0, 768], sizes = [8, 128], strides = [1, 1]} : vector<8x1024xbf16> to vector<8x128xbf16>
    %cst_15 = arith.constant dense<0.000000e+00> : vector<8x8xf32>
    %44 = tpu.matmul %41, %42, %cst_15 {dimension_numbers = #tpu.dot_dimension_numbers<[1], [1], [0], [0], [0, 0, 1, 0], [], []>} : vector<8x128xbf16>, vector<8x128xbf16>, vector<8x8xf32> -> vector<8x8xf32>
    %cst_16 = arith.constant dense<0xFF800000> : vector<8xf32>
    %45 = vector.multi_reduction <maximumf>, %44, %cst_16 [1] : vector<8x8xf32> to vector<8xf32>
    %46 = vector.shape_cast %45 : vector<8xf32> to vector<8x1xf32>
    %47 = vector.broadcast %46 : vector<8x1xf32> to vector<8x8xf32>
    %48 = arith.subf %44, %47 : vector<8x8xf32>
    %49 = math.exp %48 : vector<8x8xf32>
    %cst_17 = arith.constant dense<0.000000e+00> : vector<8xf32>
    %50 = vector.multi_reduction <add>, %49, %cst_17 [1] : vector<8x8xf32> to vector<8xf32>
    %51 = vector.shape_cast %50 : vector<8xf32> to vector<8x1xf32>
    %52 = tpu.reciprocal %51 {approx = true} : vector<8x1xf32> -> vector<8x1xf32>
    %53 = vector.broadcast %52 : vector<8x1xf32> to vector<8x8xf32>
    %54 = arith.mulf %49, %53 : vector<8x8xf32>
    %55 = arith.truncf %54 : vector<8x8xf32> to vector<8x8xbf16>
    %cst_18 = arith.constant dense<0.000000e+00> : vector<8x128xf32>
    %56 = tpu.matmul %55, %43, %cst_18 {dimension_numbers = #tpu.dot_dimension_numbers<[1], [0], [0], [1], [0, 0, 1, 1], [], []>} : vector<8x8xbf16>, vector<8x128xbf16>, vector<8x128xf32> -> vector<8x128xf32>
    %57 = vector.extract_strided_slice %8 {offsets = [0, 384], sizes = [8, 128], strides = [1, 1]} : vector<8x512xbf16> to vector<8x128xbf16>
    %58 = vector.extract_strided_slice %2 {offsets = [0, 384], sizes = [8, 128], strides = [1, 1]} : vector<8x1024xbf16> to vector<8x128xbf16>
    %59 = vector.extract_strided_slice %2 {offsets = [0, 896], sizes = [8, 128], strides = [1, 1]} : vector<8x1024xbf16> to vector<8x128xbf16>
    %cst_19 = arith.constant dense<0.000000e+00> : vector<8x8xf32>
    %60 = tpu.matmul %57, %58, %cst_19 {dimension_numbers = #tpu.dot_dimension_numbers<[1], [1], [0], [0], [0, 0, 1, 0], [], []>} : vector<8x128xbf16>, vector<8x128xbf16>, vector<8x8xf32> -> vector<8x8xf32>
    %cst_20 = arith.constant dense<0xFF800000> : vector<8xf32>
    %61 = vector.multi_reduction <maximumf>, %60, %cst_20 [1] : vector<8x8xf32> to vector<8xf32>
    %62 = vector.shape_cast %61 : vector<8xf32> to vector<8x1xf32>
    %63 = vector.broadcast %62 : vector<8x1xf32> to vector<8x8xf32>
    %64 = arith.subf %60, %63 : vector<8x8xf32>
    %65 = math.exp %64 : vector<8x8xf32>
    %cst_21 = arith.constant dense<0.000000e+00> : vector<8xf32>
    %66 = vector.multi_reduction <add>, %65, %cst_21 [1] : vector<8x8xf32> to vector<8xf32>
    %67 = vector.shape_cast %66 : vector<8xf32> to vector<8x1xf32>
    %68 = tpu.reciprocal %67 {approx = true} : vector<8x1xf32> -> vector<8x1xf32>
    %69 = vector.broadcast %68 : vector<8x1xf32> to vector<8x8xf32>
    %70 = arith.mulf %65, %69 : vector<8x8xf32>
    %71 = arith.truncf %70 : vector<8x8xf32> to vector<8x8xbf16>
    %cst_22 = arith.constant dense<0.000000e+00> : vector<8x128xf32>
    %72 = tpu.matmul %71, %59, %cst_22 {dimension_numbers = #tpu.dot_dimension_numbers<[1], [0], [0], [1], [0, 0, 1, 1], [], []>} : vector<8x8xbf16>, vector<8x128xbf16>, vector<8x128xf32> -> vector<8x128xf32>
    %73 = tpu.concatenate %24, %40, %56, %72 in 1 : vector<8x128xf32>, vector<8x128xf32>, vector<8x128xf32>, vector<8x128xf32> -> vector<8x512xf32>
    %74 = arith.truncf %73 : vector<8x512xf32> to vector<8x512xbf16>
    %c0_23 = arith.constant 0 : index
    %c0_24 = arith.constant 0 : index
    %75 = vector.load %arg5[%c0_23, %c0_24] : memref<32x512xbf16, #tpu.memory_space<vmem>>, vector<32x512xbf16>
    %cst_25 = arith.constant dense<0.000000e+00> : vector<8x512xf32>
    %76 = tpu.matmul %1, %75, %cst_25 {dimension_numbers = #tpu.dot_dimension_numbers<[1], [0], [0], [1], [0, 0, 1, 1], [], []>} : vector<8x32xbf16>, vector<32x512xbf16>, vector<8x512xf32> -> vector<8x512xf32>
    %c0_26 = arith.constant 0 : index
    %c0_27 = arith.constant 0 : index
    %77 = vector.load %arg6[%c0_26, %c0_27] : memref<512x512xbf16, #tpu.memory_space<vmem>>, vector<512x512xbf16>
    %cst_28 = arith.constant dense<0.000000e+00> : vector<8x512xf32>
    %78 = tpu.matmul %74, %77, %cst_28 {dimension_numbers = #tpu.dot_dimension_numbers<[1], [0], [0], [1], [0, 0, 1, 1], [], []>} : vector<8x512xbf16>, vector<512x512xbf16>, vector<8x512xf32> -> vector<8x512xf32>
    %79 = arith.addf %76, %78 : vector<8x512xf32>
    %c0_29 = arith.constant 0 : index
    %c0_30 = arith.constant 0 : index
    %80 = vector.load %arg7[%c0_29, %c0_30] : memref<1x512xf32, #tpu.memory_space<vmem>>, vector<1x512xf32>
    %81 = vector.broadcast %80 : vector<1x512xf32> to vector<8x512xf32>
    %82 = arith.addf %79, %81 : vector<8x512xf32>
    %cst_31 = arith.constant 0.000000e+00 : f32
    %83 = vector.broadcast %cst_31 : f32 to vector<8x512xf32>
    %84 = arith.maximumf %82, %83 : vector<8x512xf32>
    %85 = arith.truncf %84 : vector<8x512xf32> to vector<8x512xbf16>
    %c0_32 = arith.constant 0 : index
    %c0_33 = arith.constant 0 : index
    %86 = vector.load %arg8[%c0_32, %c0_33] : memref<512x256xbf16, #tpu.memory_space<vmem>>, vector<512x256xbf16>
    %cst_34 = arith.constant dense<0.000000e+00> : vector<8x256xf32>
    %87 = tpu.matmul %85, %86, %cst_34 {dimension_numbers = #tpu.dot_dimension_numbers<[1], [0], [0], [1], [0, 0, 1, 1], [], []>} : vector<8x512xbf16>, vector<512x256xbf16>, vector<8x256xf32> -> vector<8x256xf32>
    %c0_35 = arith.constant 0 : index
    %c0_36 = arith.constant 0 : index
    %88 = vector.load %arg9[%c0_35, %c0_36] : memref<1x256xf32, #tpu.memory_space<vmem>>, vector<1x256xf32>
    %89 = vector.broadcast %88 : vector<1x256xf32> to vector<8x256xf32>
    %90 = arith.addf %87, %89 : vector<8x256xf32>
    %cst_37 = arith.constant 0.000000e+00 : f32
    %91 = vector.broadcast %cst_37 : f32 to vector<8x256xf32>
    %92 = arith.maximumf %90, %91 : vector<8x256xf32>
    %93 = arith.truncf %92 : vector<8x256xf32> to vector<8x256xbf16>
    %c0_38 = arith.constant 0 : index
    %c0_39 = arith.constant 0 : index
    %94 = vector.load %arg10[%c0_38, %c0_39] : memref<256x128xbf16, #tpu.memory_space<vmem>>, vector<256x128xbf16>
    %cst_40 = arith.constant dense<0.000000e+00> : vector<8x128xf32>
    %95 = tpu.matmul %93, %94, %cst_40 {dimension_numbers = #tpu.dot_dimension_numbers<[1], [0], [0], [1], [0, 0, 1, 1], [], []>} : vector<8x256xbf16>, vector<256x128xbf16>, vector<8x128xf32> -> vector<8x128xf32>
    %c0_41 = arith.constant 0 : index
    %c0_42 = arith.constant 0 : index
    %96 = vector.load %arg11[%c0_41, %c0_42] : memref<1x128xf32, #tpu.memory_space<vmem>>, vector<1x128xf32>
    %97 = vector.broadcast %96 : vector<1x128xf32> to vector<8x128xf32>
    %98 = arith.addf %95, %97 : vector<8x128xf32>
    %cst_43 = arith.constant 0.000000e+00 : f32
    %99 = vector.broadcast %cst_43 : f32 to vector<8x128xf32>
    %100 = arith.maximumf %98, %99 : vector<8x128xf32>
    %101 = arith.truncf %100 : vector<8x128xf32> to vector<8x128xbf16>
    %c0_44 = arith.constant 0 : index
    %c0_45 = arith.constant 0 : index
    %102 = vector.load %arg12[%c0_44, %c0_45] : memref<256x128xbf16, #tpu.memory_space<vmem>>, vector<256x128xbf16>
    %cst_46 = arith.constant dense<0.000000e+00> : vector<8x128xf32>
    %103 = tpu.matmul %93, %102, %cst_46 {dimension_numbers = #tpu.dot_dimension_numbers<[1], [0], [0], [1], [0, 0, 1, 1], [], []>} : vector<8x256xbf16>, vector<256x128xbf16>, vector<8x128xf32> -> vector<8x128xf32>
    %c0_47 = arith.constant 0 : index
    %c0_48 = arith.constant 0 : index
    %104 = vector.load %arg13[%c0_47, %c0_48] : memref<1x128xf32, #tpu.memory_space<vmem>>, vector<1x128xf32>
    %105 = vector.broadcast %104 : vector<1x128xf32> to vector<8x128xf32>
    %106 = arith.addf %103, %105 : vector<8x128xf32>
    %cst_49 = arith.constant 0.000000e+00 : f32
    %107 = vector.broadcast %cst_49 : f32 to vector<8x128xf32>
    %108 = arith.maximumf %106, %107 : vector<8x128xf32>
    %109 = arith.truncf %108 : vector<8x128xf32> to vector<8x128xbf16>
    %c0_50 = arith.constant 0 : index
    %c0_51 = arith.constant 0 : index
    %110 = vector.load %arg14[%c0_50, %c0_51] : memref<128x128xbf16, #tpu.memory_space<vmem>>, vector<128x128xbf16>
    %cst_52 = arith.constant dense<0.000000e+00> : vector<8x128xf32>
    %111 = tpu.matmul %109, %110, %cst_52 {dimension_numbers = #tpu.dot_dimension_numbers<[1], [0], [0], [1], [0, 0, 1, 1], [], []>} : vector<8x128xbf16>, vector<128x128xbf16>, vector<8x128xf32> -> vector<8x128xf32>
    %c0_53 = arith.constant 0 : index
    %c0_54 = arith.constant 0 : index
    %112 = vector.load %arg15[%c0_53, %c0_54] : memref<1x128xf32, #tpu.memory_space<vmem>>, vector<1x128xf32>
    %113 = vector.broadcast %112 : vector<1x128xf32> to vector<8x128xf32>
    %114 = arith.addf %111, %113 : vector<8x128xf32>
    %cst_55 = arith.constant 0.000000e+00 : f32
    %115 = vector.broadcast %cst_55 : f32 to vector<8x128xf32>
    %116 = arith.maximumf %114, %115 : vector<8x128xf32>
    %117 = arith.truncf %116 : vector<8x128xf32> to vector<8x128xbf16>
    %c0_56 = arith.constant 0 : index
    %c0_57 = arith.constant 0 : index
    %118 = vector.load %arg16[%c0_56, %c0_57] : memref<256x128xbf16, #tpu.memory_space<vmem>>, vector<256x128xbf16>
    %cst_58 = arith.constant dense<0.000000e+00> : vector<8x128xf32>
    %119 = tpu.matmul %93, %118, %cst_58 {dimension_numbers = #tpu.dot_dimension_numbers<[1], [0], [0], [1], [0, 0, 1, 1], [], []>} : vector<8x256xbf16>, vector<256x128xbf16>, vector<8x128xf32> -> vector<8x128xf32>
    %c0_59 = arith.constant 0 : index
    %c0_60 = arith.constant 0 : index
    %120 = vector.load %arg17[%c0_59, %c0_60] : memref<1x128xf32, #tpu.memory_space<vmem>>, vector<1x128xf32>
    %121 = vector.broadcast %120 : vector<1x128xf32> to vector<8x128xf32>
    %122 = arith.addf %119, %121 : vector<8x128xf32>
    %cst_61 = arith.constant 0.000000e+00 : f32
    %123 = vector.broadcast %cst_61 : f32 to vector<8x128xf32>
    %124 = arith.maximumf %122, %123 : vector<8x128xf32>
    %125 = arith.truncf %124 : vector<8x128xf32> to vector<8x128xbf16>
    %c0_62 = arith.constant 0 : index
    %c0_63 = arith.constant 0 : index
    %126 = vector.load %arg18[%c0_62, %c0_63] : memref<128x64xbf16, #tpu.memory_space<vmem>>, vector<128x64xbf16>
    %cst_64 = arith.constant dense<0.000000e+00> : vector<8x64xf32>
    %127 = tpu.matmul %125, %126, %cst_64 {dimension_numbers = #tpu.dot_dimension_numbers<[1], [0], [0], [1], [0, 0, 1, 1], [], []>} : vector<8x128xbf16>, vector<128x64xbf16>, vector<8x64xf32> -> vector<8x64xf32>
    %c0_65 = arith.constant 0 : index
    %c0_66 = arith.constant 0 : index
    %128 = vector.load %arg19[%c0_65, %c0_66] : memref<1x64xf32, #tpu.memory_space<vmem>>, vector<1x64xf32>
    %129 = vector.broadcast %128 : vector<1x64xf32> to vector<8x64xf32>
    %130 = arith.addf %127, %129 : vector<8x64xf32>
    %cst_67 = arith.constant 0.000000e+00 : f32
    %131 = vector.broadcast %cst_67 : f32 to vector<8x64xf32>
    %132 = arith.maximumf %130, %131 : vector<8x64xf32>
    %133 = arith.truncf %132 : vector<8x64xf32> to vector<8x64xbf16>
    %c0_68 = arith.constant 0 : index
    %c0_69 = arith.constant 0 : index
    %134 = vector.load %arg20[%c0_68, %c0_69] : memref<128x128xbf16, #tpu.memory_space<vmem>>, vector<128x128xbf16>
    %cst_70 = arith.constant dense<0.000000e+00> : vector<8x128xf32>
    %135 = tpu.matmul %101, %134, %cst_70 {dimension_numbers = #tpu.dot_dimension_numbers<[1], [0], [0], [1], [0, 0, 1, 1], [], []>} : vector<8x128xbf16>, vector<128x128xbf16>, vector<8x128xf32> -> vector<8x128xf32>
    %c0_71 = arith.constant 0 : index
    %c0_72 = arith.constant 0 : index
    %136 = vector.load %arg21[%c0_71, %c0_72] : memref<128x128xbf16, #tpu.memory_space<vmem>>, vector<128x128xbf16>
    %cst_73 = arith.constant dense<0.000000e+00> : vector<8x128xf32>
    %137 = tpu.matmul %117, %136, %cst_73 {dimension_numbers = #tpu.dot_dimension_numbers<[1], [0], [0], [1], [0, 0, 1, 1], [], []>} : vector<8x128xbf16>, vector<128x128xbf16>, vector<8x128xf32> -> vector<8x128xf32>
    %138 = arith.addf %135, %137 : vector<8x128xf32>
    %c0_74 = arith.constant 0 : index
    %c0_75 = arith.constant 0 : index
    %139 = vector.load %arg22[%c0_74, %c0_75] : memref<64x128xbf16, #tpu.memory_space<vmem>>, vector<64x128xbf16>
    %cst_76 = arith.constant dense<0.000000e+00> : vector<8x128xf32>
    %140 = tpu.matmul %133, %139, %cst_76 {dimension_numbers = #tpu.dot_dimension_numbers<[1], [0], [0], [1], [0, 0, 1, 1], [], []>} : vector<8x64xbf16>, vector<64x128xbf16>, vector<8x128xf32> -> vector<8x128xf32>
    %141 = arith.addf %138, %140 : vector<8x128xf32>
    %c0_77 = arith.constant 0 : index
    %c0_78 = arith.constant 0 : index
    %142 = vector.load %arg23[%c0_77, %c0_78] : memref<1x128xf32, #tpu.memory_space<vmem>>, vector<1x128xf32>
    %143 = vector.broadcast %142 : vector<1x128xf32> to vector<8x128xf32>
    %144 = arith.addf %141, %143 : vector<8x128xf32>
    %145 = tpu.iota {dimensions = array<i32: 1>} : vector<8x128xi32>
    %c8_i32 = arith.constant 8 : i32
    %146 = vector.broadcast %c8_i32 : i32 to vector<8x128xi32>
    %147 = arith.cmpi eq, %145, %146 : vector<8x128xi32>
    %148 = arith.negf %144 : vector<8x128xf32>
    %149 = math.exp %148 : vector<8x128xf32>
    %cst_79 = arith.constant 1.000000e+00 : f32
    %150 = vector.broadcast %cst_79 : f32 to vector<8x128xf32>
    %151 = arith.addf %150, %149 : vector<8x128xf32>
    %152 = arith.divf %150, %151 : vector<8x128xf32>
    %153 = arith.select %147, %152, %144 : vector<8x128xi1>, vector<8x128xf32>
    %c0_80 = arith.constant 0 : index
    %c0_81 = arith.constant 0 : index
    %154 = vector.load %arg24[%c0_80, %c0_81] : memref<8x128xf32, #tpu.memory_space<vmem>>, vector<8x128xf32>
    tpu.vector_store %arg24[%c0_80, %c0_81], %153 {strides = array<i32>} : memref<8x128xf32, #tpu.memory_space<vmem>>, vector<8x128xf32>,
    return
  }
  func.func @transform_0(%arg0: i32) -> (i32, i32) {
    %c0_i32 = arith.constant 0 : i32
    %c0_i32_0 = arith.constant 0 : i32
    return %arg0, %c0_i32 : i32, i32
  }
  func.func @transform_1(%arg0: i32) -> (i32, i32) {
    %c0_i32 = arith.constant 0 : i32
    %c0_i32_0 = arith.constant 0 : i32
    %c0_i32_1 = arith.constant 0 : i32
    return %c0_i32, %c0_i32_0 : i32, i32
  }
  func.func @transform_2(%arg0: i32) -> (i32, i32) {
    %c0_i32 = arith.constant 0 : i32
    %c0_i32_0 = arith.constant 0 : i32
    %c0_i32_1 = arith.constant 0 : i32
    return %c0_i32, %c0_i32_0 : i32, i32
  }
  func.func @transform_3(%arg0: i32) -> (i32, i32) {
    %c0_i32 = arith.constant 0 : i32
    %c0_i32_0 = arith.constant 0 : i32
    %c0_i32_1 = arith.constant 0 : i32
    return %c0_i32, %c0_i32_0 : i32, i32
  }
  func.func @transform_4(%arg0: i32) -> (i32, i32) {
    %c0_i32 = arith.constant 0 : i32
    %c0_i32_0 = arith.constant 0 : i32
    %c0_i32_1 = arith.constant 0 : i32
    return %c0_i32, %c0_i32_0 : i32, i32
  }
  func.func @transform_5(%arg0: i32) -> (i32, i32) {
    %c0_i32 = arith.constant 0 : i32
    %c0_i32_0 = arith.constant 0 : i32
    %c0_i32_1 = arith.constant 0 : i32
    return %c0_i32, %c0_i32_0 : i32, i32
  }
  func.func @transform_6(%arg0: i32) -> (i32, i32) {
    %c0_i32 = arith.constant 0 : i32
    %c0_i32_0 = arith.constant 0 : i32
    %c0_i32_1 = arith.constant 0 : i32
    return %c0_i32, %c0_i32_0 : i32, i32
  }
  func.func @transform_7(%arg0: i32) -> (i32, i32) {
    %c0_i32 = arith.constant 0 : i32
    %c0_i32_0 = arith.constant 0 : i32
    %c0_i32_1 = arith.constant 0 : i32
    return %c0_i32, %c0_i32_0 : i32, i32
  }
  func.func @transform_8(%arg0: i32) -> (i32, i32) {
    %c0_i32 = arith.constant 0 : i32
    %c0_i32_0 = arith.constant 0 : i32
    %c0_i32_1 = arith.constant 0 : i32
    return %c0_i32, %c0_i32_0 : i32, i32
  }
  func.func @transform_9(%arg0: i32) -> (i32, i32) {
    %c0_i32 = arith.constant 0 : i32
    %c0_i32_0 = arith.constant 0 : i32
    %c0_i32_1 = arith.constant 0 : i32
    return %c0_i32, %c0_i32_0 : i32, i32
  }
  func.func @transform_10(%arg0: i32) -> (i32, i32) {
    %c0_i32 = arith.constant 0 : i32
    %c0_i32_0 = arith.constant 0 : i32
    %c0_i32_1 = arith.constant 0 : i32
    return %c0_i32, %c0_i32_0 : i32, i32
  }
  func.func @transform_11(%arg0: i32) -> (i32, i32) {
    %c0_i32 = arith.constant 0 : i32
    %c0_i32_0 = arith.constant 0 : i32
    %c0_i32_1 = arith.constant 0 : i32
    return %c0_i32, %c0_i32_0 : i32, i32
  }
  func.func @transform_12(%arg0: i32) -> (i32, i32) {
    %c0_i32 = arith.constant 0 : i32
    %c0_i32_0 = arith.constant 0 : i32
    %c0_i32_1 = arith.constant 0 : i32
    return %c0_i32, %c0_i32_0 : i32, i32
  }
  func.func @transform_13(%arg0: i32) -> (i32, i32) {
    %c0_i32 = arith.constant 0 : i32
    %c0_i32_0 = arith.constant 0 : i32
    %c0_i32_1 = arith.constant 0 : i32
    return %c0_i32, %c0_i32_0 : i32, i32
  }
  func.func @transform_14(%arg0: i32) -> (i32, i32) {
    %c0_i32 = arith.constant 0 : i32
    %c0_i32_0 = arith.constant 0 : i32
    %c0_i32_1 = arith.constant 0 : i32
    return %c0_i32, %c0_i32_0 : i32, i32
  }
  func.func @transform_15(%arg0: i32) -> (i32, i32) {
    %c0_i32 = arith.constant 0 : i32
    %c0_i32_0 = arith.constant 0 : i32
    %c0_i32_1 = arith.constant 0 : i32
    return %c0_i32, %c0_i32_0 : i32, i32
  }
  func.func @transform_16(%arg0: i32) -> (i32, i32) {
    %c0_i32 = arith.constant 0 : i32
    %c0_i32_0 = arith.constant 0 : i32
    %c0_i32_1 = arith.constant 0 : i32
    return %c0_i32, %c0_i32_0 : i32, i32
  }
  func.func @transform_17(%arg0: i32) -> (i32, i32) {
    %c0_i32 = arith.constant 0 : i32
    %c0_i32_0 = arith.constant 0 : i32
    %c0_i32_1 = arith.constant 0 : i32
    return %c0_i32, %c0_i32_0 : i32, i32
  }
  func.func @transform_18(%arg0: i32) -> (i32, i32) {
    %c0_i32 = arith.constant 0 : i32
    %c0_i32_0 = arith.constant 0 : i32
    %c0_i32_1 = arith.constant 0 : i32
    return %c0_i32, %c0_i32_0 : i32, i32
  }
  func.func @transform_19(%arg0: i32) -> (i32, i32) {
    %c0_i32 = arith.constant 0 : i32
    %c0_i32_0 = arith.constant 0 : i32
    %c0_i32_1 = arith.constant 0 : i32
    return %c0_i32, %c0_i32_0 : i32, i32
  }
  func.func @transform_20(%arg0: i32) -> (i32, i32) {
    %c0_i32 = arith.constant 0 : i32
    %c0_i32_0 = arith.constant 0 : i32
    %c0_i32_1 = arith.constant 0 : i32
    return %c0_i32, %c0_i32_0 : i32, i32
  }
  func.func @transform_21(%arg0: i32) -> (i32, i32) {
    %c0_i32 = arith.constant 0 : i32
    %c0_i32_0 = arith.constant 0 : i32
    %c0_i32_1 = arith.constant 0 : i32
    return %c0_i32, %c0_i32_0 : i32, i32
  }
  func.func @transform_22(%arg0: i32) -> (i32, i32) {
    %c0_i32 = arith.constant 0 : i32
    %c0_i32_0 = arith.constant 0 : i32
    %c0_i32_1 = arith.constant 0 : i32
    return %c0_i32, %c0_i32_0 : i32, i32
  }
  func.func @transform_23(%arg0: i32) -> (i32, i32) {
    %c0_i32 = arith.constant 0 : i32
    %c0_i32_0 = arith.constant 0 : i32
    return %arg0, %c0_i32 : i32, i32
  }
}

</mosaic_0001>

<bundles_post_ra>
// kernel: multitask_forward.1
= control target key start
LH: loop header
LB: loop body
LE: loop exit
PB: predicated region body
PF: predicated region fallthrough
CT: control target
= control target key end

     0   :  { %s5143_s0 = inlined_call_operand.vmem [shape: f32[8,32], index: 0, kind: input, shape index: {}]   ;;  %s5144_s1 = inlined_call_operand.vmem [shape: bf16[8,1024], index: 1, kind: input, shape index: {}]   ;;  %s5145_s2 = inlined_call_operand.hbm [shape: bf16[32,512], index: 2, kind: input, shape index: {}]   ;;  %s5146_s3 = inlined_call_operand.vmem [shape: f32[1,512], index: 3, kind: input, shape index: {}]   ;;  %s5147_s4 = inlined_call_operand.hbm [shape: bf16[32,512], index: 4, kind: input, shape index: {}]   ;;  %s5148_s5 = inlined_call_operand.hbm [shape: bf16[512,512], index: 5, kind: input, shape index: {}]   ;;  %s5149_s6 = inlined_call_operand.vmem [shape: f32[1,512], index: 6, kind: input, shape index: {}]   ;;  %s5150_s7 = inlined_call_operand.hbm [shape: bf16[512,256], index: 7, kind: input, shape index: {}]   ;;  %s5151_s8 = inlined_call_operand.vmem [shape: f32[1,256], index: 8, kind: input, shape index: {}]   ;;  %s5152_s9 = inlined_call_operand.vmem [shape: bf16[256,128], index: 9, kind: input, shape index: {}]   ;;  %s5153_s10 = inlined_call_operand.vmem [shape: f32[1,128], index: 10, kind: input, shape index: {}]   ;;  %s5154_s11 = inlined_call_operand.vmem [shape: bf16[256,128], index: 11, kind: input, shape index: {}]   ;;  %s5155_s12 = inlined_call_operand.vmem [shape: f32[1,128], index: 12, kind: input, shape index: {}]   ;;  %s5156_s13 = inlined_call_operand.hbm [shape: bf16[128,128], index: 13, kind: input, shape index: {}]   ;;  %s5157_s14 = inlined_call_operand.vmem [shape: f32[1,128], index: 14, kind: input, shape index: {}]   ;;  %s5158_s15 = inlined_call_operand.vmem [shape: bf16[256,128], index: 15, kind: input, shape index: {}]   ;;  %s5159_s16 = inlined_call_operand.vmem [shape: f32[1,128], index: 16, kind: input, shape index: {}]   ;;  %s5160_s17 = inlined_call_operand.vmem [shape: bf16[128,64], index: 17, kind: input, shape index: {}]   ;;  %s5161_s18 = inlined_call_operand.vmem [shape: f32[1,64], index: 18, kind: input, shape index: {}]   ;;  %s5162_s19 = inlined_call_operand.hbm [shape: bf16[128,128], index: 19, kind: input, shape index: {}]   ;;  %s5163_s20 = inlined_call_operand.hbm [shape: bf16[128,128], index: 20, kind: input, shape index: {}]   ;;  %s5164_s21 = inlined_call_operand.hbm [shape: bf16[64,128], index: 21, kind: input, shape index: {}]   ;;  %s5165_s22 = inlined_call_operand.vmem [shape: f32[1,128], index: 22, kind: input, shape index: {}]   ;;  %s5166_s23 = inlined_call_operand.vmem [shape: f32[8,128], index: 23, kind: output, shape index: {}]  }
   0x1   :  { %5168 = sst [smem:[#allocation20_spill]] %s5143_s0 }
   0x2   :  { %5169 = sst [smem:[#allocation21_spill]] %s5144_s1 }
   0x3   :  { %5170 = sst [smem:[#allocation22_spill]] %s5145_s2 }
   0x4   :  { %5171 = sst [smem:[#allocation23_spill]] %s5146_s3 }
   0x5   :  { %5172 = sst [smem:[#allocation24_spill]] %s5147_s4 }
   0x6   :  { %5173 = sst [smem:[#allocation25_spill]] %s5148_s5 }
   0x7   :  { %5174 = sst [smem:[#allocation26_spill]] %s5149_s6 }
   0x8   :  { %5175 = sst [smem:[#allocation27_spill]] %s5150_s7 }
   0x9   :  { %5176 = sst [smem:[#allocation28_spill]] %s5165_s22 }
   0xa   :  { %5177 = sst [smem:[#allocation29_spill]] %s5166_s23 }
   0xb   :  { %28 = vsyncpa [#allocation3], 0 }
   0xc   :  { %29 = vsyncpa [#allocation5], 0 }
   0xd   :  { %30 = vsyncpa [#allocation8], 0 }
   0xe   :  { %31 = vsyncpa [#allocation11], 0 }
   0xf   :  { %32 = vsyncpa [#allocation14], 0  ;;  %s4592_s4 = smov [#allocation4]   ;;  %s4593_s24 = smov [#allocation7]  }
  0x10   :  { %s56_s30 = sshll.u32 %s4592_s4, 4  ;;  %s82_s25 = sshll.u32 %s4593_s24, 4  ;;  %s57_s30 = int_to_ptr.vmem [resolvable:$true] %s56_s30  ;;  %s83_s25 = int_to_ptr.vmem [resolvable:$true] %s82_s25 }
  0x11   :  { %s4430_s5 = scalar_lea.vmem %s57_s30, 1024  ;;  %p4435_p1 = scmp.lt.s32.totalorder %s57_s30, %s57_s30 }
  0x12   :  { %p4431_p0 = scmp.ne.s32.totalorder %s57_s30, %s4430_s5  ;;  %p4436_p2 = scmp.lt.s32.totalorder %s4430_s5, %s4430_s5 }
  0x14   :  { %p4437_p3 = por %p4436_p2, %p4435_p1 }
  0x16   :  { %p4438_p4 = pnand %p4437_p3, %p4431_p0 }
  0x18   :  { %4441 = shalt.err (!%p4438_p4)
}
  0x19   :  { %s4594_s1 = smov 256   ;;  %s4595_s26 = smov 16  }
  0x1a   :  { %s5178_s27 = sld [smem:[#allocation24_spill]]  ;;  %s4450_s7 = scalar_lea.vmem %s83_s25, 8192 }
  0x1b   :  { %p4451_p5 = scmp.ne.s32.totalorder %s83_s25, %s4450_s7  ;;  %p4455_p6 = scmp.lt.s32.totalorder %s83_s25, %s83_s25 }
  0x1c   :  { %p4456_p7 = scmp.lt.s32.totalorder %s4450_s7, %s4450_s7 }
  0x1e   :  { %p4457_p8 = por %p4456_p7, %p4455_p6 }
  0x20   :  { %62 = dma.hbm_to_vmem [thread:$0]  %s5178_s27, 1024, %s57_s30, [#allocation5], %s4594_s1, %s4594_s1, %s4595_s26  }
  0x21   :  { %p4458_p9 = pnand %p4457_p8, %p4451_p5 }
  0x23   :  { %4461 = shalt.err (!%p4458_p9)
}
  0x24   :  { %s4596_s28 = smov 128   ;;  %s4597_s29 = smov 8  }
  0x25   :  { %s5179_s4 = sld [smem:[#allocation27_spill]]  ;;  %s4598_s24 = smov [#allocation10]  }
  0x26   :  { %s126_s5 = sshll.u32 %s4598_s24, 4  ;;  %s4599_s23 = smov [#allocation2]   ;;  %s127_s5 = int_to_ptr.vmem [resolvable:$true] %s126_s5 }
  0x27   :  { %s42_s22 = sshll.u32 %s4599_s23, 4  ;;  %s4470_s30 = scalar_lea.vmem %s127_s5, 1024  ;;  %s43_s22 = int_to_ptr.vmem [resolvable:$true] %s42_s22 }
  0x28   :  { %p4471_p10 = scmp.ne.s32.totalorder %s127_s5, %s4470_s30  ;;  %p4475_p11 = scmp.lt.s32.totalorder %s127_s5, %s127_s5 }
  0x29   :  { %p4476_p12 = scmp.lt.s32.totalorder %s4470_s30, %s4470_s30 }
  0x2b   :  { %88 = dma.hbm_to_vmem [thread:$0]  %s5179_s4, 8192, %s83_s25, [#allocation8], %s4596_s28, %s4596_s28, %s4597_s29  }
  0x2c   :  { %p4477_p13 = por %p4476_p12, %p4475_p11 }
  0x2e   :  { %p4478_p0 = pnand %p4477_p13, %p4471_p10 }
  0x30   :  { %4481 = shalt.err (!%p4478_p0)
}
  0x31   :  { %s4600_s2 = smov 64   ;;  %s4601_s6 = smov 4  }
  0x32   :  { %132 = dma.hbm_to_vmem [thread:$0]  %s5162_s19, 1024, %s127_s5, [#allocation11], %s4600_s2, %s4600_s2, %s4601_s6  }
  0x33   :  { %s4490_s7 = scalar_lea.vmem %s43_s22, 1024  ;;  %p4495_p2 = scmp.lt.s32.totalorder %s43_s22, %s43_s22 }
  0x34   :  { %p4491_p1 = scmp.ne.s32.totalorder %s43_s22, %s4490_s7  ;;  %p4496_p3 = scmp.lt.s32.totalorder %s4490_s7, %s4490_s7 }
  0x36   :  { %p4497_p4 = por %p4496_p3, %p4495_p2 }
  0x38   :  { %p4498_p5 = pnand %p4497_p4, %p4491_p1 }
  0x3a   :  { %4501 = shalt.err (!%p4498_p5)
}
  0x3b   :  { %s5180_s29 = sld [smem:[#allocation22_spill]]  ;;  %s4602_s3 = smov [#allocation6]  }
  0x3c   :  { %s68_s0 = sshll.u32 %s4602_s3, 4  ;;  %s4603_s4 = smov [#allocation9]   ;;  %s69_s0 = int_to_ptr.vmem [resolvable:$true] %s68_s0 }
  0x3d   :  { %s104_s24 = sshll.u32 %s4603_s4, 4  ;;  %s4510_s19 = scalar_lea.vmem %s69_s0, 16384  ;;  %s105_s24 = int_to_ptr.vmem [resolvable:$true] %s104_s24 }
  0x3e   :  { %p4511_p6 = scmp.ne.s32.totalorder %s69_s0, %s4510_s19  ;;  %p4515_p7 = scmp.lt.s32.totalorder %s69_s0, %s69_s0 }
  0x3f   :  { %p4516_p8 = scmp.lt.s32.totalorder %s4510_s19, %s4510_s19 }
  0x41   :  { %48 = dma.hbm_to_vmem [thread:$0]  %s5180_s29, 1024, %s43_s22, [#allocation3], %s4594_s1, %s4594_s1, %s4595_s26  }
  0x42   :  { %p4517_p9 = por %p4516_p8, %p4515_p7 }
  0x44   :  { %p4518_p10 = pnand %p4517_p9, %p4511_p6 }
  0x46   :  { %4521 = shalt.err (!%p4518_p10)
}
  0x47   :  { %s5181_s27 = sld [smem:[#allocation25_spill]]  ;;  %s4530_s22 = scalar_lea.vmem %s105_s24, 1024 }
  0x48   :  { %p4531_p11 = scmp.ne.s32.totalorder %s105_s24, %s4530_s22  ;;  %p4535_p12 = scmp.lt.s32.totalorder %s105_s24, %s105_s24 }
  0x49   :  { %p4536_p13 = scmp.lt.s32.totalorder %s4530_s22, %s4530_s22 }
  0x4b   :  { %p4537_p0 = por %p4536_p13, %p4535_p12 }
  0x4d   :  { %74 = dma.hbm_to_vmem [thread:$0]  %s5181_s27, 16384, %s69_s0, [#allocation5], %s4594_s1, %s4594_s1, %s4595_s26  }
  0x4e   :  { %p4538_p1 = pnand %p4537_p0, %p4531_p11 }
  0x50   :  { %4541 = shalt.err (!%p4538_p1)
}
  0x51   :  { %110 = dma.hbm_to_vmem [thread:$0]  %s5156_s13, 1024, %s105_s24, [#allocation8], %s4600_s2, %s4600_s2, %s4601_s6  }
  0x52   :  { %s4604_s23 = smov [#allocation12]   ;;  %s4605_s29 = smov [#allocation13]  }
  0x53   :  { %s138_s28 = sshll.u32 %s4604_s23, 4  ;;  %s150_s3 = sshll.u32 %s4605_s29, 4  ;;  %s139_s28 = int_to_ptr.vmem [resolvable:$true] %s138_s28  ;;  %s151_s3 = int_to_ptr.vmem [resolvable:$true] %s150_s3 }
  0x54   :  { %s4550_s1 = scalar_lea.vmem %s139_s28, 1024  ;;  %p4555_p3 = scmp.lt.s32.totalorder %s139_s28, %s139_s28 }
  0x55   :  { %p4551_p2 = scmp.ne.s32.totalorder %s139_s28, %s4550_s1  ;;  %p4556_p4 = scmp.lt.s32.totalorder %s4550_s1, %s4550_s1 }
  0x57   :  { %p4557_p5 = por %p4556_p4, %p4555_p3 }
  0x59   :  { %p4558_p6 = pnand %p4557_p5, %p4551_p2 }
  0x5b   :  { %4561 = shalt.err (!%p4558_p6)
}
  0x5c   :  { %144 = dma.hbm_to_vmem [thread:$0]  %s5163_s20, 1024, %s139_s28, [#allocation11], %s4600_s2, %s4600_s2, %s4601_s6  }
  0x5d   :  { %s4570_s13 = scalar_lea.vmem %s151_s3, 512  ;;  %p4575_p8 = scmp.lt.s32.totalorder %s151_s3, %s151_s3 }
  0x5e   :  { %p4571_p7 = scmp.ne.s32.totalorder %s151_s3, %s4570_s13  ;;  %p4576_p9 = scmp.lt.s32.totalorder %s4570_s13, %s4570_s13 }
  0x60   :  { %p4577_p10 = por %p4576_p9, %p4575_p8 }
  0x62   :  { %p4578_p11 = pnand %p4577_p10, %p4571_p7 }
  0x64   :  { %4581 = shalt.err (!%p4578_p11)
}
  0x65   :  { %156 = dma.hbm_to_vmem [thread:$0]  %s5164_s21, 512, %s151_s3, [#allocation14], %s4600_s2, %s4600_s2, %s4601_s6  }
  0x66   :  { %4582 = dma.done.wait [#allocation3], 1024  }
  0x67   :  { %4583 = vsyncadd [#allocation3], 4294966272 }
  0x68   :  { %4584 = dma.done.wait [#allocation5], 17408  }
  0x69   :  { %4585 = vsyncadd [#allocation5], 4294949888 }
  0x6a   :  { %4586 = dma.done.wait [#allocation8], 9216  }
  0x6b   :  { %4587 = vsyncadd [#allocation8], 4294958080 }
  0x6c   :  { %4588 = dma.done.wait [#allocation11], 2048  }
  0x6d   :  { %4589 = vsyncadd [#allocation11], 4294965248 }
  0x6e   :  { %4590 = dma.done.wait [#allocation14], 512  }
  0x6f   :  { %4591 = vsyncadd [#allocation14], 4294966784  ;;  %v4606_v0 = vmov 0   ;;  %v4607_v1 = vmov 0.0   ;;  %v4002_v2 = vld [vmem:[#allocation2 + $0x24] ss:$16 sps:$4 sm:$0xff]   ;;  %v200_v13 = vlaneseq }
  0x70   :  { %296 = vmatprep.mubr.bf16.mxu1 %v4606_v0  ;;  %3845 = vmatprep.subr.bf16.mxu0 %v4607_v1  ;;  %v4004_v3 = vld [vmem:[#allocation2 + $0x20] ss:$16 sps:$4 sm:$0xff]   ;;  %v4005_v4 = vld [vmem:[#allocation2 + $0x4] ss:$16 sps:$4 sm:$0xff]   ;;  %s5182_s2 = sld [smem:[#allocation20_spill]]  ;;  %vm260_vm0 = vcmask 261120  }
  0x71   :  { %276 = vmatprep.subr.bf16.mxu1 %v4002_v2  ;;  %v4007_v5 = vld [vmem:[#allocation2] ss:$16 sps:$4 sm:$0xff]   ;;  %v4010_v7 = vld [vmem:[#allocation2 + $0x2c] ss:$16 sps:$4 sm:$0xff]   ;;  %v4008_v8 = vld [vmem:[#allocation2 + $0x28] ss:$16 sps:$4 sm:$0xff]  }
  0x72   :  { %277 = vmatpush1.bf16.msra.mxu1 %v4004_v3  ;;  %s5183_s5 = sld [smem:[#allocation21_spill]]  ;;  %v4013_v11 = vld [vmem:[#allocation2 + $0xc] ss:$16 sps:$4 sm:$0xff]   ;;  %v4011_v12 = vld [vmem:[#allocation2 + $0x8] ss:$16 sps:$4 sm:$0xff]   ;;  %vm4608_vm1 = vmmov 0  }
  0x73   :  { %278 = vmatprep.subr.bf16.mxu1 %v4005_v4  ;;  %3847 = vmatprep.mubr.msk.bf16.mxu0 %vm4608_vm1, %v4607_v1  ;;  %v4796_v14 = vshrl.u32 %v200_v13, 7  ;;  %s5184_s22 = sld [smem:[#allocation23_spill]]  ;;  %vm390_vm2 = vcmask 64512   ;;  %vm406_vm3 = vcmask 1043456   ;;  %vm3337_vm4 = vcmask 523264  }
  0x74   :  { %s5185_s20 = sld [smem:[#allocation26_spill]] }
  0x75   :  { %v4799_v15 = vsub.s32 0, %v4796_v14  ;;  %v4806_v18 = vsub.s32 1, %v4796_v14  ;;  %v210_v26 = vsub.s32 2, %v4796_v14  ;;  %v214_v37 = vsub.s32 3, %v4796_v14  ;;  %v4322_v14 = vld [vmem:[%s5154_s11 + $0x70] sm:$0xff]  }
  0x76   :  { %v184_v6 = vld [vmem:[%s5182_s2] sm:$0xff]  ;;  %279 = vmatpush1.bf16.msra.mxu1 %v4007_v5  ;;  %s5186_s2 = sld [smem:[#allocation28_spill]] }
  0x77   :  { %v4782_v10 = vpack.c.bf16 %v184_v6, %v184_v6  ;;  %317 = vmatprep.subr.bf16.mxu1 %v4010_v7 }
  0x78   :  { %v186_v9 = vld [vmem:[%s5183_s5] sm:$0xff]  ;;  %v187_v33 = vld [vmem:[%s5183_s5 + $0x8] sm:$0xff] }
  0x79   :  { %3846 = vmatpush3.bf16.xpose.msra.mxu0 %v186_v9  ;;  %3418 = vmatmul.mubr.msk.bf16.vlgmr.msra.gmra.mxu1 %vm260_vm0, %v4782_v10  ;;  %v198_v16 = vld [vmem:[%s5184_s22] sm:$0xf]  ;;  %v3421_v21 = vcombine.high %v186_v9, %v186_v9  ;;  %v3425_v39 = vcombine.high %v187_v33, %v187_v33 }
  0x7a   :  { %3857 = vmatprep.subr.bf16.mxu0 %v4607_v1  ;;  %318 = vmatpush1.bf16.msra.mxu1 %v4008_v8  ;;  %v203_v17 = vrot.slane %v198_v16, %v4799_v15  ;;  %v207_v24 = vrot.slane %v198_v16, %v4806_v18  ;;  %v211_v30 = vrot.slane %v198_v16, %v210_v26 }
  0x7b   :  { %337 = vmatprep.mubr.bf16.mxu1 %v4606_v0  ;;  %319 = vmatprep.subr.bf16.mxu1 %v4013_v11  ;;  %v215_v40 = vrot.slane %v198_v16, %v214_v37 }
  0x7e   :  { %320 = vmatpush1.bf16.msra.mxu1 %v4011_v12 }
  0x7f   :  { %3851 = vmatprep.subr.bf16.mxu1 %v4607_v1 }
  0x81   :  { %3419 = vmatmul.mubr.msk.bf16.vlgmr.msra.gmra.mxu1 %vm260_vm0, %v4782_v10 }
  0x82   :  { %3853 = vmatprep.mubr.msk.bf16.mxu1 %vm4608_vm1, %v4607_v1 }
 0x139   :  { %v298_v19 = vpop.f32.mrf.mxu1 }
 0x13a   :  { %v299_v20 = vadd.f32 %v298_v19, %v203_v17 }
 0x13b   :  { %v300_v22 = vpop.f32.mrf.mxu1 }
 0x13c   :  { %v346_v23 = vpack.c.bf16 %v299_v20, %v299_v20  ;;  %v301_v28 = vadd.f32 %v300_v22, %v207_v24  ;;  %v188_v24 = vld [vmem:[%s5183_s5 + $0x10] sm:$0xff] }
 0x13d   :  { %v302_v25 = vpop.f32.mrf.mxu1 }
 0x13e   :  { %3848 = vmatmul.mubr.bf16.vlgmr.msra.gmra.mxu0 %v346_v23  ;;  %v347_v32 = vpack.c.bf16 %v301_v28, %v301_v28  ;;  %v408_v25 = vsel %vm406_vm3, %v188_v24, 0 }
 0x13f   :  { %v303_v27 = vpop.f32.mrf.mxu1  ;;  %3858 = vmatpush3.bf16.xpose.msra.mxu0 %v3421_v21  ;;  %3859 = vmatprep.mubr.msk.bf16.mxu0 %vm4608_vm1, %v4607_v1 }
 0x140   :  { %3869 = vmatprep.subr.bf16.mxu0 %v4607_v1  ;;  %3852 = vmatpush3.bf16.msra.mxu1 %v408_v25 }
 0x141   :  { %v339_v29 = vpop.f32.mrf.mxu1  ;;  %3863 = vmatprep.subr.bf16.mxu1 %v4607_v1 }
 0x142   :  { %v340_v35 = vadd.f32 %v339_v29, %v211_v30  ;;  %v3422_v29 = vcombine.high %v188_v24, %v188_v24  ;;  %v4033_v24 = vld [vmem:[#allocation6 + $0x2e0] ss:$16 sps:$4 sm:$0xff]  }
 0x143   :  { %v341_v31 = vpop.f32.mrf.mxu1 }
 0x144   :  { %v348_v38 = vpack.c.bf16 %v340_v35, %v340_v35  ;;  %v342_v41 = vadd.f32 %v341_v31, %v215_v40  ;;  %v4852_v30 = vsel %vm406_vm3, %v3422_v29, 0  ;;  %v4018_v31 = vld [vmem:[#allocation6 + $0xe0] ss:$16 sps:$4 sm:$0xff]   ;;  %v4026_v35 = vld [vmem:[#allocation6 + $0xa4] ss:$16 sps:$4 sm:$0xff]  }
 0x145   :  { %v343_v34 = vpop.f32.mrf.mxu1  ;;  %v4032_v40 = vld [vmem:[#allocation6 + $0x64] ss:$16 sps:$4 sm:$0xff]  }
 0x146   :  { %3860 = vmatmul.mubr.bf16.vlgmr.msra.gmra.mxu0 %v347_v32  ;;  %v349_v42 = vpack.c.bf16 %v342_v41, %v342_v41  ;;  %v4020_v32 = vld [vmem:[#allocation6 + $0xe4] ss:$16 sps:$4 sm:$0xff]   ;;  %v4021_v34 = vld [vmem:[#allocation6 + $0xc0] ss:$16 sps:$4 sm:$0xff]  }
 0x147   :  { %3870 = vmatpush3.bf16.xpose.msra.mxu0 %v187_v33  ;;  %v344_v36 = vpop.f32.mrf.mxu1  ;;  %3871 = vmatprep.mubr.msk.bf16.mxu0 %vm4608_vm1, %v4607_v1  ;;  %v4023_v33 = vld [vmem:[#allocation6 + $0xc4] ss:$16 sps:$4 sm:$0xff]   ;;  %v4030_v41 = vld [vmem:[#allocation6 + $0x60] ss:$16 sps:$4 sm:$0xff]  }
 0x148   :  { %3881 = vmatprep.subr.bf16.mxu0 %v4607_v1  ;;  %v4024_v36 = vld [vmem:[#allocation6 + $0xa0] ss:$16 sps:$4 sm:$0xff]   ;;  %v4047_v29 = vld [vmem:[#allocation6 + $0x2a4] ss:$16 sps:$4 sm:$0xff]  }
 0x14e   :  { %3872 = vmatmul.mubr.bf16.vlgmr.msra.gmra.mxu0 %v348_v38  ;;  %v4029_v38 = vld [vmem:[#allocation6 + $0x84] ss:$16 sps:$4 sm:$0xff]  }
 0x14f   :  { %3882 = vmatpush3.bf16.xpose.msra.mxu0 %v3425_v39  ;;  %3883 = vmatprep.mubr.msk.bf16.mxu0 %vm4608_vm1, %v4607_v1  ;;  %v4027_v39 = vld [vmem:[#allocation6 + $0x80] ss:$16 sps:$4 sm:$0xff]  }
 0x150   :  { %1538 = vmatprep.subr.bf16.mxu0 %v4020_v32  ;;  %v4051_v32 = vld [vmem:[#allocation6 + $0x280] ss:$16 sps:$4 sm:$0xff]  }
 0x156   :  { %3884 = vmatmul.mubr.bf16.vlgmr.msra.gmra.mxu0 %v349_v42  ;;  %v4038_v42 = vld [vmem:[#allocation6 + $0x44] ss:$16 sps:$4 sm:$0xff]  }
 0x157   :  { %1539 = vmatpush1.bf16.msra.mxu0 %v4018_v31  ;;  %v4053_v31 = vld [vmem:[#allocation6 + $0x284] ss:$16 sps:$4 sm:$0xff]  }
 0x158   :  { %1540 = vmatprep.subr.bf16.mxu0 %v4023_v33  ;;  %v4059_v33 = vld [vmem:[#allocation6 + $0x264] ss:$16 sps:$4 sm:$0xff]  }
 0x15b   :  { %1541 = vmatpush1.bf16.msra.mxu0 %v4021_v34  ;;  %v4057_v34 = vld [vmem:[#allocation6 + $0x260] ss:$16 sps:$4 sm:$0xff]  }
 0x15c   :  { %1542 = vmatprep.subr.bf16.mxu0 %v4026_v35  ;;  %v4063_v35 = vld [vmem:[#allocation6 + $0x240] ss:$16 sps:$4 sm:$0xff]  }
 0x15f   :  { %1543 = vmatpush1.bf16.msra.mxu0 %v4024_v36  ;;  %v4071_v36 = vld [vmem:[#allocation6 + $0x224] ss:$16 sps:$4 sm:$0xff]  }
 0x160   :  { %1544 = vmatprep.subr.bf16.mxu0 %v4029_v38  ;;  %v4069_v38 = vld [vmem:[#allocation6 + $0x220] ss:$16 sps:$4 sm:$0xff]  }
 0x163   :  { %1545 = vmatpush1.bf16.msra.mxu0 %v4027_v39  ;;  %v4077_v39 = vld [vmem:[#allocation6 + $0x204] ss:$16 sps:$4 sm:$0xff]  }
 0x164   :  { %1546 = vmatprep.subr.bf16.mxu0 %v4032_v40  ;;  %v4075_v40 = vld [vmem:[#allocation6 + $0x200] ss:$16 sps:$4 sm:$0xff]  }
 0x167   :  { %1547 = vmatpush1.bf16.msra.mxu0 %v4030_v41  ;;  %v4083_v41 = vld [vmem:[#allocation6 + $0x3e4] ss:$16 sps:$4 sm:$0xff]  }
 0x168   :  { %1548 = vmatprep.subr.bf16.mxu0 %v4038_v42  ;;  %v4081_v42 = vld [vmem:[#allocation6 + $0x3e0] ss:$16 sps:$4 sm:$0xff]  }
 0x1fe   :  { %v384_v43 = vpop.f32.mrf.mxu0 }
 0x1ff   :  { %v391_v44 = vsel %vm390_vm2, %v384_v43, -inf }
 0x200   :  { %392 = vmax.xlane.f32.xlu0 %v391_v44  ;;  %v3849_v45 = vpop.f32.mrf.mxu0  ;;  %v4044_v44 = vld [vmem:[#allocation6 + $0x24] ss:$16 sps:$4 sm:$0xff]  }
 0x201   :  { %v4042_v45 = vld [vmem:[#allocation6 + $0x20] ss:$16 sps:$4 sm:$0xff]  }
 0x202   :  { %v387_v46 = vpop.f32.mrf.mxu0 }
 0x203   :  { %v4050_v46 = vld [vmem:[#allocation6 + $0x4] ss:$16 sps:$4 sm:$0xff]  }
 0x204   :  { %v3850_v47 = vpop.f32.mrf.mxu0 }
 0x205   :  { %v4048_v47 = vld [vmem:[#allocation6] ss:$16 sps:$4 sm:$0xff]  }
 0x206   :  { %v488_v48 = vpop.f32.mrf.mxu0 }
 0x207   :  { %v494_v49 = vsel %vm390_vm2, %v488_v48, -inf }
 0x208   :  { %495 = vmax.xlane.f32.xlu0 %v494_v49  ;;  %v3861_v50 = vpop.f32.mrf.mxu0  ;;  %v4054_v49 = vld [vmem:[#allocation6 + $0x1e0] ss:$16 sps:$4 sm:$0xff]  }
 0x209   :  { %v4062_v50 = vld [vmem:[#allocation6 + $0x1c4] ss:$16 sps:$4 sm:$0xff]  }
 0x20a   :  { %v491_v51 = vpop.f32.mrf.mxu0 }
 0x20b   :  { %v4060_v51 = vld [vmem:[#allocation6 + $0x1c0] ss:$16 sps:$4 sm:$0xff]  }
 0x20c   :  { %v3862_v52 = vpop.f32.mrf.mxu0 }
 0x20d   :  { %v4068_v52 = vld [vmem:[#allocation6 + $0x1a4] ss:$16 sps:$4 sm:$0xff]  }
 0x20e   :  { %v589_v53 = vpop.f32.mrf.mxu0 }
 0x20f   :  { %v595_v54 = vsel %vm390_vm2, %v589_v53, -inf }
 0x210   :  { %596 = vmax.xlane.f32.xlu1 %v595_v54  ;;  %v3873_v55 = vpop.f32.mrf.mxu0  ;;  %v4074_v54 = vld [vmem:[#allocation6 + $0x184] ss:$16 sps:$4 sm:$0xff]  }
 0x211   :  { %v4072_v55 = vld [vmem:[#allocation6 + $0x180] ss:$16 sps:$4 sm:$0xff]  }
 0x212   :  { %v592_v56 = vpop.f32.mrf.mxu0 }
 0x213   :  { %v4080_v56 = vld [vmem:[#allocation6 + $0x164] ss:$16 sps:$4 sm:$0xff]  }
 0x214   :  { %v3874_v57 = vpop.f32.mrf.mxu0 }
 0x215   :  { %v4078_v57 = vld [vmem:[#allocation6 + $0x160] ss:$16 sps:$4 sm:$0xff]  }
 0x216   :  { %v691_v58 = vpop.f32.mrf.mxu0 }
 0x217   :  { %v697_v59 = vsel %vm390_vm2, %v691_v58, -inf }
 0x218   :  { %698 = vmax.xlane.f32.xlu1 %v697_v59  ;;  %v3885_v60 = vpop.f32.mrf.mxu0  ;;  %v4084_v59 = vld [vmem:[#allocation6 + $0x140] ss:$16 sps:$4 sm:$0xff]  }
 0x21a   :  { %v694_v61 = vpop.f32.mrf.mxu0 }
 0x21c   :  { %v3886_v62 = vpop.f32.mrf.mxu0 }
 0x289   :  { %v393_v63 = vpop.xlane.xlu0 %392 }
 0x28a   :  { %v394_v2 = vsub.f32 %v384_v43, %v393_v63  ;;  %v4036_v43 = vld [vmem:[#allocation6 + $0x40] ss:$16 sps:$4 sm:$0xff]  }
 0x28b   :  { %1549 = vmatpush1.bf16.msra.mxu0 %v4036_v43  ;;  %v4089_v43 = vld [vmem:[#allocation6 + $0x3c4] ss:$16 sps:$4 sm:$0xff]  }
 0x28c   :  { %v395_v3 = vmul.f32 1.442695, %v394_v2  ;;  %1550 = vmatprep.subr.bf16.mxu0 %v4044_v44  ;;  %v4087_v44 = vld [vmem:[#allocation6 + $0x3c0] ss:$16 sps:$4 sm:$0xff]  }
 0x28e   :  { %4402 = vpow2.f32 %v395_v3 }
 0x28f   :  { %1551 = vmatpush1.bf16.msra.mxu0 %v4042_v45  ;;  %v4092_v45 = vld [vmem:[#allocation6 + $0x124] ss:$16 sps:$4 sm:$0xff]  }
 0x290   :  { %1552 = vmatprep.subr.bf16.mxu0 %v4050_v46  ;;  %v4095_v46 = vld [vmem:[#allocation6 + $0x3a4] ss:$16 sps:$4 sm:$0xff]  }
 0x291   :  { %v496_v4 = vpop.xlane.xlu0 %495 }
 0x292   :  { %v497_v5 = vsub.f32 %v488_v48, %v496_v4  ;;  %v4056_v48 = vld [vmem:[#allocation6 + $0x1e4] ss:$16 sps:$4 sm:$0xff]  }
 0x293   :  { %1553 = vmatpush1.bf16.msra.mxu0 %v4048_v47  ;;  %v4090_v47 = vld [vmem:[#allocation6 + $0x120] ss:$16 sps:$4 sm:$0xff]  }
 0x294   :  { %v498_v6 = vmul.f32 1.442695, %v497_v5  ;;  %1554 = vmatprep.subr.bf16.mxu0 %v4056_v48  ;;  %v189_v5 = vld [vmem:[%s5183_s5 + $0x18] sm:$0xff]  ;;  %v4093_v48 = vld [vmem:[#allocation6 + $0x3a0] ss:$16 sps:$4 sm:$0xff]  }
 0x296   :  { %4404 = vpow2.f32 %v498_v6 }
 0x297   :  { %1555 = vmatpush2.bf16.msra.mxu0 %v4054_v49  ;;  %v4098_v49 = vld [vmem:[#allocation6 + $0x104] ss:$16 sps:$4 sm:$0xff]  }
 0x298   :  { %1556 = vmatprep.subr.bf16.mxu0 %v4062_v50  ;;  %v4101_v50 = vld [vmem:[#allocation6 + $0x384] ss:$16 sps:$4 sm:$0xff]  }
 0x299   :  { %v597_v7 = vpop.xlane.xlu1 %596 }
 0x29a   :  { %v598_v8 = vsub.f32 %v589_v53, %v597_v7  ;;  %v4066_v53 = vld [vmem:[#allocation6 + $0x1a0] ss:$16 sps:$4 sm:$0xff]  }
 0x29b   :  { %v4830_v9 = vpop.eup %4402  ;;  %1557 = vmatpush2.bf16.msra.mxu0 %v4060_v51  ;;  %v4096_v51 = vld [vmem:[#allocation6 + $0x100] ss:$16 sps:$4 sm:$0xff]  }
 0x29c   :  { %v599_v11 = vmul.f32 1.442695, %v598_v8  ;;  %v397_v12 = vsel %vm390_vm2, %v4830_v9, 0.0  ;;  %1558 = vmatprep.subr.bf16.mxu0 %v4068_v52  ;;  %v4099_v52 = vld [vmem:[#allocation6 + $0x380] ss:$16 sps:$4 sm:$0xff]  }
 0x29d   :  { %398 = vadd.xlane.f32.xlu0 %v397_v12 }
 0x29e   :  { %4406 = vpow2.f32 %v599_v11  ;;  %v3426_v11 = vcombine.high %v189_v5, %v189_v5 }
 0x29f   :  { %1559 = vmatpush2.bf16.msra.mxu0 %v4066_v53  ;;  %v4104_v53 = vld [vmem:[#allocation6 + $0x364] ss:$16 sps:$4 sm:$0xff]  }
 0x2a0   :  { %1560 = vmatprep.subr.bf16.mxu0 %v4074_v54  ;;  %v4107_v54 = vld [vmem:[#allocation6 + $0xec] ss:$16 sps:$4 sm:$0xff]  }
 0x2a1   :  { %v699_v16 = vpop.xlane.xlu1 %698 }
 0x2a2   :  { %v700_v17 = vsub.f32 %v691_v58, %v699_v16  ;;  %v4086_v58 = vld [vmem:[#allocation6 + $0x144] ss:$16 sps:$4 sm:$0xff]  }
 0x2a3   :  { %v4834_v19 = vpop.eup %4404  ;;  %1561 = vmatpush2.bf16.msra.mxu0 %v4072_v55  ;;  %v4102_v55 = vld [vmem:[#allocation6 + $0x360] ss:$16 sps:$4 sm:$0xff]  }
 0x2a4   :  { %v701_v20 = vmul.f32 1.442695, %v700_v17  ;;  %v500_v21 = vsel %vm390_vm2, %v4834_v19, 0.0  ;;  %1562 = vmatprep.subr.bf16.mxu0 %v4080_v56  ;;  %v4108_v56 = vld [vmem:[#allocation6 + $0x340] ss:$16 sps:$4 sm:$0xff]  }
 0x2a5   :  { %501 = vadd.xlane.f32.xlu1 %v500_v21 }
 0x2a6   :  { %4408 = vpow2.f32 %v701_v20  ;;  %v4035_v20 = vld [vmem:[#allocation6 + $0x2e4] ss:$16 sps:$4 sm:$0xff]  }
 0x2a7   :  { %1563 = vmatpush2.bf16.msra.mxu0 %v4078_v57  ;;  %v4110_v57 = vld [vmem:[#allocation6 + $0x344] ss:$16 sps:$4 sm:$0xff]  }
 0x2a8   :  { %1564 = vmatprep.subr.bf16.mxu0 %v4086_v58  ;;  %v4114_v58 = vld [vmem:[#allocation6 + $0x320] ss:$16 sps:$4 sm:$0xff]  }
 0x2ab   :  { %v4838_v22 = vpop.eup %4406  ;;  %1565 = vmatpush2.bf16.msra.mxu0 %v4084_v59  ;;  %v4116_v59 = vld [vmem:[#allocation6 + $0x324] ss:$16 sps:$4 sm:$0xff]  }
 0x2ac   :  { %v601_v23 = vsel %vm390_vm2, %v4838_v22, 0.0  ;;  %1566 = vmatprep.subr.bf16.mxu0 %v4092_v45  ;;  %v4141_v45 = vld [vmem:[#allocation6 + $0x2a8] ss:$16 sps:$4 sm:$0xff]  }
 0x2ad   :  { %602 = vadd.xlane.f32.xlu0 %v601_v23 }
 0x2af   :  { %1567 = vmatpush2.bf16.msra.mxu0 %v4090_v47  ;;  %v4149_v47 = vld [vmem:[#allocation6 + $0x28c] ss:$16 sps:$4 sm:$0xff]  }
 0x2b0   :  { %1568 = vmatprep.subr.bf16.mxu0 %v4098_v49  ;;  %v4147_v49 = vld [vmem:[#allocation6 + $0x288] ss:$16 sps:$4 sm:$0xff]  }
 0x2b3   :  { %v4847_v27 = vpop.eup %4408  ;;  %1569 = vmatpush2.bf16.msra.mxu0 %v4096_v51  ;;  %v4155_v51 = vld [vmem:[#allocation6 + $0x26c] ss:$16 sps:$4 sm:$0xff]  }
 0x2b4   :  { %v703_v28 = vsel %vm390_vm2, %v4847_v27, 0.0  ;;  %1620 = vmatprep.subr.bf16.mxu0 %v4107_v54  ;;  %v4158_v54 = vld [vmem:[#allocation6 + $0x1cc] ss:$16 sps:$4 sm:$0xff]  }
 0x2b5   :  { %704 = vadd.xlane.f32.xlu1 %v703_v28  ;;  %v4041_v28 = vld [vmem:[#allocation6 + $0x2c4] ss:$16 sps:$4 sm:$0xff]  }
 0x326   :  { %v399_v60 = vpop.xlane.xlu0 %398 }
 0x327   :  { %4410 = vrcp.f32 %v399_v60  ;;  %v4120_v60 = vld [vmem:[#allocation6 + $0x300] ss:$16 sps:$4 sm:$0xff]  }
 0x32e   :  { %v502_v61 = vpop.xlane.xlu1 %501 }
 0x32f   :  { %4412 = vrcp.f32 %v502_v61  ;;  %v4122_v61 = vld [vmem:[#allocation6 + $0x304] ss:$16 sps:$4 sm:$0xff]  }
 0x334   :  { %v4411_v62 = vpop.eup %4410 }
 0x335   :  { %v401_v63 = vmul.f32 %v4411_v62, %v4830_v9  ;;  %v611_v9 = vsel %vm406_vm3, %v189_v5, 0  ;;  %v4131_v62 = vld [vmem:[#allocation6 + $0x2ec] ss:$16 sps:$4 sm:$0xff]  }
 0x336   :  { %v603_v2 = vpop.xlane.xlu0 %602 }
 0x337   :  { %4414 = vrcp.f32 %v603_v2  ;;  %v402_v3 = vpack.c.bf16 %v401_v63, %v401_v63 }
 0x339   :  { %3854 = vmatmul.mubr.msk.bf16.vlgmr.msra.gmra.mxu1 %vm390_vm2, %v402_v3 }
 0x33a   :  { %3864 = vmatpush3.bf16.msra.mxu1 %v4852_v30  ;;  %3865 = vmatprep.mubr.msk.bf16.mxu1 %vm4608_vm1, %v4607_v1  ;;  %v4045_v30 = vld [vmem:[#allocation6 + $0x2a0] ss:$16 sps:$4 sm:$0xff]  }
 0x33b   :  { %3875 = vmatprep.subr.bf16.mxu1 %v4607_v1 }
 0x33c   :  { %v4413_v4 = vpop.eup %4412 }
 0x33d   :  { %v504_v6 = vmul.f32 %v4413_v4, %v4834_v19  ;;  %v716_v19 = vsel %vm406_vm3, %v3426_v11, 0  ;;  %v4113_v11 = vld [vmem:[#allocation6 + $0xcc] ss:$16 sps:$4 sm:$0xff]  }
 0x33e   :  { %v705_v7 = vpop.xlane.xlu1 %704 }
 0x33f   :  { %4416 = vrcp.f32 %v705_v7  ;;  %v505_v8 = vpack.c.bf16 %v504_v6, %v504_v6  ;;  %v4105_v7 = vld [vmem:[#allocation6 + $0xe8] ss:$16 sps:$4 sm:$0xff]  }
 0x341   :  { %3866 = vmatmul.mubr.msk.bf16.vlgmr.msra.gmra.mxu1 %vm390_vm2, %v505_v8 }
 0x342   :  { %3876 = vmatpush3.bf16.msra.mxu1 %v611_v9  ;;  %3877 = vmatprep.mubr.msk.bf16.mxu1 %vm4608_vm1, %v4607_v1 }
 0x343   :  { %3887 = vmatprep.subr.bf16.mxu1 %v4607_v1 }
 0x344   :  { %v4415_v12 = vpop.eup %4414 }
 0x345   :  { %v605_v16 = vmul.f32 %v4415_v12, %v4838_v22  ;;  %v4039_v22 = vld [vmem:[#allocation6 + $0x2c0] ss:$16 sps:$4 sm:$0xff]  }
 0x347   :  { %v606_v17 = vpack.c.bf16 %v605_v16, %v605_v16  ;;  %v4111_v16 = vld [vmem:[#allocation6 + $0xc8] ss:$16 sps:$4 sm:$0xff]  }
 0x349   :  { %3878 = vmatmul.mubr.msk.bf16.vlgmr.msra.gmra.mxu1 %vm390_vm2, %v606_v17 }
 0x34a   :  { %3888 = vmatpush3.bf16.msra.mxu1 %v716_v19  ;;  %3889 = vmatprep.mubr.msk.bf16.mxu1 %vm4608_vm1, %v4607_v1  ;;  %v4119_v19 = vld [vmem:[#allocation6 + $0xac] ss:$16 sps:$4 sm:$0xff]  }
 0x34b   :  { %1579 = vmatprep.subr.bf16.mxu1 %v4035_v20 }
 0x34c   :  { %v4417_v21 = vpop.eup %4416 }
 0x34d   :  { %v707_v23 = vmul.f32 %v4417_v21, %v4847_v27  ;;  %v4065_v27 = vld [vmem:[#allocation6 + $0x244] ss:$16 sps:$4 sm:$0xff]   ;;  %v4117_v21 = vld [vmem:[#allocation6 + $0xa8] ss:$16 sps:$4 sm:$0xff]  }
 0x34f   :  { %v708_v25 = vpack.c.bf16 %v707_v23, %v707_v23 }
 0x351   :  { %3890 = vmatmul.mubr.msk.bf16.vlgmr.msra.gmra.mxu1 %vm390_vm2, %v708_v25 }
 0x352   :  { %1580 = vmatpush1.bf16.msra.mxu1 %v4033_v24  ;;  %v4125_v24 = vld [vmem:[#allocation6 + $0x8c] ss:$16 sps:$4 sm:$0xff]  }
 0x353   :  { %1581 = vmatprep.subr.bf16.mxu1 %v4041_v28  ;;  %v4123_v28 = vld [vmem:[#allocation6 + $0x88] ss:$16 sps:$4 sm:$0xff]  }
 0x356   :  { %1582 = vmatpush1.bf16.msra.mxu1 %v4039_v22 }
 0x357   :  { %1583 = vmatprep.subr.bf16.mxu1 %v4047_v29  ;;  %v4128_v29 = vld [vmem:[#allocation6 + $0x6c] ss:$16 sps:$4 sm:$0xff]  }
 0x35a   :  { %1584 = vmatpush1.bf16.msra.mxu1 %v4045_v30 }
 0x35b   :  { %1585 = vmatprep.subr.bf16.mxu1 %v4053_v31 }
 0x35e   :  { %1586 = vmatpush1.bf16.msra.mxu1 %v4051_v32  ;;  %v4126_v32 = vld [vmem:[#allocation6 + $0x68] ss:$16 sps:$4 sm:$0xff]  }
 0x35f   :  { %1587 = vmatprep.subr.bf16.mxu1 %v4059_v33  ;;  %v4129_v33 = vld [vmem:[#allocation6 + $0x2e8] ss:$16 sps:$4 sm:$0xff]  }
 0x362   :  { %1588 = vmatpush1.bf16.msra.mxu1 %v4057_v34 }
 0x363   :  { %1589 = vmatprep.subr.bf16.mxu1 %v4065_v27 }
 0x366   :  { %1590 = vmatpush1.bf16.msra.mxu1 %v4063_v35  ;;  %v4134_v35 = vld [vmem:[#allocation6 + $0x4c] ss:$16 sps:$4 sm:$0xff]  }
 0x367   :  { %1591 = vmatprep.subr.bf16.mxu1 %v4071_v36  ;;  %v4137_v36 = vld [vmem:[#allocation6 + $0x2cc] ss:$16 sps:$4 sm:$0xff]  }
 0x36a   :  { %1592 = vmatpush1.bf16.msra.mxu1 %v4069_v38 }
 0x36b   :  { %1593 = vmatprep.subr.bf16.mxu1 %v4077_v39  ;;  %v4132_v39 = vld [vmem:[#allocation6 + $0x48] ss:$16 sps:$4 sm:$0xff]  }
 0x36e   :  { %1594 = vmatpush1.bf16.msra.mxu1 %v4075_v40  ;;  %v4135_v40 = vld [vmem:[#allocation6 + $0x2c8] ss:$16 sps:$4 sm:$0xff]  }
 0x36f   :  { %1595 = vmatprep.subr.bf16.mxu1 %v4083_v41 }
 0x372   :  { %1596 = vmatpush2.bf16.msra.mxu1 %v4081_v42  ;;  %v4140_v42 = vld [vmem:[#allocation6 + $0x2c] ss:$16 sps:$4 sm:$0xff]  }
 0x373   :  { %1597 = vmatprep.subr.bf16.mxu1 %v4089_v43  ;;  %v4143_v43 = vld [vmem:[#allocation6 + $0x2ac] ss:$16 sps:$4 sm:$0xff]  }
 0x376   :  { %1598 = vmatpush2.bf16.msra.mxu1 %v4087_v44  ;;  %v4138_v44 = vld [vmem:[#allocation6 + $0x28] ss:$16 sps:$4 sm:$0xff]  }
 0x377   :  { %1599 = vmatprep.subr.bf16.mxu1 %v4095_v46  ;;  %v4146_v46 = vld [vmem:[#allocation6 + $0xc] ss:$16 sps:$4 sm:$0xff]  }
 0x37a   :  { %1600 = vmatpush2.bf16.msra.mxu1 %v4093_v48  ;;  %v4144_v48 = vld [vmem:[#allocation6 + $0x8] ss:$16 sps:$4 sm:$0xff]  }
 0x37b   :  { %1601 = vmatprep.subr.bf16.mxu1 %v4101_v50  ;;  %v4152_v50 = vld [vmem:[#allocation6 + $0x1ec] ss:$16 sps:$4 sm:$0xff]  }
 0x37e   :  { %1602 = vmatpush2.bf16.msra.mxu1 %v4099_v52  ;;  %v4150_v52 = vld [vmem:[#allocation6 + $0x1e8] ss:$16 sps:$4 sm:$0xff]  }
 0x37f   :  { %1603 = vmatprep.subr.bf16.mxu1 %v4104_v53  ;;  %v4153_v53 = vld [vmem:[#allocation6 + $0x268] ss:$16 sps:$4 sm:$0xff]  }
 0x382   :  { %1604 = vmatpush2.bf16.msra.mxu1 %v4102_v55  ;;  %v4161_v55 = vld [vmem:[#allocation6 + $0x24c] ss:$16 sps:$4 sm:$0xff]  }
 0x383   :  { %1605 = vmatprep.subr.bf16.mxu1 %v4110_v57  ;;  %v4159_v57 = vld [vmem:[#allocation6 + $0x248] ss:$16 sps:$4 sm:$0xff]  }
 0x386   :  { %1606 = vmatpush2.bf16.msra.mxu1 %v4108_v56  ;;  %v4156_v56 = vld [vmem:[#allocation6 + $0x1c8] ss:$16 sps:$4 sm:$0xff]  }
 0x387   :  { %1607 = vmatprep.subr.bf16.mxu1 %v4116_v59  ;;  %v4167_v59 = vld [vmem:[#allocation6 + $0x22c] ss:$16 sps:$4 sm:$0xff]  }
 0x38a   :  { %1608 = vmatpush2.bf16.msra.mxu1 %v4114_v58  ;;  %v4164_v58 = vld [vmem:[#allocation6 + $0x1ac] ss:$16 sps:$4 sm:$0xff]  }
 0x38b   :  { %1609 = vmatprep.subr.bf16.mxu1 %v4122_v61  ;;  %v4165_v61 = vld [vmem:[#allocation6 + $0x228] ss:$16 sps:$4 sm:$0xff]  }
 0x38e   :  { %1610 = vmatpush2.bf16.msra.mxu1 %v4120_v60  ;;  %v4162_v60 = vld [vmem:[#allocation6 + $0x1a8] ss:$16 sps:$4 sm:$0xff]  }
 0x38f   :  { %1661 = vmatprep.subr.bf16.mxu1 %v4131_v62  ;;  %v4170_v62 = vld [vmem:[#allocation6 + $0x18c] ss:$16 sps:$4 sm:$0xff]  }
 0x3f9   :  { %v444_v63 = vpop.f32.mrf.mxu1 }
 0x3fa   :  { %v4876_v8 = vpack.c.bf16 %v444_v63, %v444_v63  ;;  %v4173_v63 = vld [vmem:[#allocation6 + $0x20c] ss:$16 sps:$4 sm:$0xff]  }
 0x3fb   :  { %v3855_v2 = vpop.f32.mrf.mxu1 }
 0x3fc   :  { %v4168_v2 = vld [vmem:[#allocation6 + $0x188] ss:$16 sps:$4 sm:$0xff]  }
 0x3fd   :  { %v447_v3 = vpop.f32.mrf.mxu1 }
 0x3fe   :  { %v4171_v3 = vld [vmem:[#allocation6 + $0x208] ss:$16 sps:$4 sm:$0xff]  }
 0x3ff   :  { %v3856_v4 = vpop.f32.mrf.mxu1 }
 0x400   :  { %v4176_v4 = vld [vmem:[#allocation6 + $0x16c] ss:$16 sps:$4 sm:$0xff]  }
 0x401   :  { %v549_v5 = vpop.f32.mrf.mxu1 }
 0x402   :  { %v759_v6 = vpack.c.bf16 %v549_v5, %v549_v5  ;;  %v4179_v5 = vld [vmem:[#allocation6 + $0x3ec] ss:$16 sps:$4 sm:$0xff]  }
 0x403   :  { %v3867_v9 = vpop.f32.mrf.mxu1 }
 0x404   :  { %1570 = vmatprep.mubr.bf16.mxu0 %v759_v6  ;;  %v4182_v9 = vld [vmem:[#allocation6 + $0x14c] ss:$16 sps:$4 sm:$0xff]  }
 0x405   :  { %v552_v12 = vpop.f32.mrf.mxu1  ;;  %1571 = vmatmul.mubr.bf16.vlgmr.msra.gmra.mxu0 %v4876_v8 }
 0x406   :  { %1621 = vmatpush1.bf16.msra.mxu0 %v4105_v7  ;;  %1652 = vmatprep.mubr.bf16.mxu0 %v759_v6  ;;  %v4174_v6 = vld [vmem:[#allocation6 + $0x168] ss:$16 sps:$4 sm:$0xff]  }
 0x407   :  { %v3868_v17 = vpop.f32.mrf.mxu1  ;;  %1622 = vmatprep.subr.bf16.mxu0 %v4113_v11  ;;  %v4177_v7 = vld [vmem:[#allocation6 + $0x3e8] ss:$16 sps:$4 sm:$0xff]   ;;  %v4185_v11 = vld [vmem:[#allocation6 + $0x3cc] ss:$16 sps:$4 sm:$0xff]  }
 0x408   :  { %v4180_v12 = vld [vmem:[#allocation6 + $0x148] ss:$16 sps:$4 sm:$0xff]   ;;  %v4188_v17 = vld [vmem:[#allocation6 + $0x12c] ss:$16 sps:$4 sm:$0xff]  }
 0x409   :  { %v647_v20 = vpop.f32.mrf.mxu1 }
 0x40a   :  { %1623 = vmatpush1.bf16.msra.mxu0 %v4111_v16  ;;  %v4879_v34 = vpack.c.bf16 %v647_v20, %v647_v20  ;;  %v4183_v16 = vld [vmem:[#allocation6 + $0x3c8] ss:$16 sps:$4 sm:$0xff]  }
 0x40b   :  { %v3879_v23 = vpop.f32.mrf.mxu1  ;;  %1624 = vmatprep.subr.bf16.mxu0 %v4119_v19  ;;  %v4191_v19 = vld [vmem:[#allocation6 + $0x3ac] ss:$16 sps:$4 sm:$0xff]   ;;  %v4186_v20 = vld [vmem:[#allocation6 + $0x128] ss:$16 sps:$4 sm:$0xff]  }
 0x40c   :  { %v4194_v23 = vld [vmem:[#allocation6 + $0x10c] ss:$16 sps:$4 sm:$0xff]  }
 0x40d   :  { %v650_v25 = vpop.f32.mrf.mxu1 }
 0x40e   :  { %1625 = vmatpush1.bf16.msra.mxu0 %v4117_v21  ;;  %v4189_v21 = vld [vmem:[#allocation6 + $0x3a8] ss:$16 sps:$4 sm:$0xff]  }
 0x40f   :  { %v3880_v22 = vpop.f32.mrf.mxu1  ;;  %1626 = vmatprep.subr.bf16.mxu0 %v4125_v24  ;;  %v4197_v24 = vld [vmem:[#allocation6 + $0x38c] ss:$16 sps:$4 sm:$0xff]   ;;  %v4192_v25 = vld [vmem:[#allocation6 + $0x108] ss:$16 sps:$4 sm:$0xff]  }
 0x410   :  { %v4200_v22 = vld [vmem:[#allocation6 + $0x36c] ss:$16 sps:$4 sm:$0xff]  }
 0x411   :  { %v752_v30 = vpop.f32.mrf.mxu1 }
 0x412   :  { %v761_v31 = vpack.c.bf16 %v752_v30, %v752_v30  ;;  %1627 = vmatpush1.bf16.msra.mxu0 %v4123_v28  ;;  %v4195_v28 = vld [vmem:[#allocation6 + $0x388] ss:$16 sps:$4 sm:$0xff]  }
 0x413   :  { %v3891_v27 = vpop.f32.mrf.mxu1  ;;  %1628 = vmatprep.subr.bf16.mxu0 %v4128_v29  ;;  %v4203_v29 = vld [vmem:[#allocation4 + $0x24] ss:$16 sps:$4 sm:$0xff]   ;;  %v4198_v30 = vld [vmem:[#allocation6 + $0x368] ss:$16 sps:$4 sm:$0xff]  }
 0x414   :  { %1611 = vmatprep.mubr.bf16.mxu1 %v761_v31  ;;  %v4204_v27 = vld [vmem:[#allocation6 + $0x348] ss:$16 sps:$4 sm:$0xff]  }
 0x415   :  { %v755_v38 = vpop.f32.mrf.mxu1  ;;  %1612 = vmatmul.mubr.bf16.vlgmr.msra.gmra.mxu1 %v4879_v34 }
 0x416   :  { %1629 = vmatpush1.bf16.msra.mxu0 %v4126_v32  ;;  %1662 = vmatpush1.bf16.msra.mxu1 %v4129_v33  ;;  %v4206_v32 = vld [vmem:[#allocation6 + $0x34c] ss:$16 sps:$4 sm:$0xff]   ;;  %v4209_v33 = vld [vmem:[#allocation4 + $0x4] ss:$16 sps:$4 sm:$0xff]   ;;  %v4210_v38 = vld [vmem:[#allocation6 + $0x328] ss:$16 sps:$4 sm:$0xff]  }
 0x417   :  { %1693 = vmatprep.mubr.bf16.mxu1 %v761_v31  ;;  %v3892_v41 = vpop.f32.mrf.mxu1  ;;  %1630 = vmatprep.subr.bf16.mxu0 %v4134_v35  ;;  %v4201_v31 = vld [vmem:[#allocation4 + $0x20] ss:$16 sps:$4 sm:$0xff]  }
 0x418   :  { %1663 = vmatprep.subr.bf16.mxu1 %v4137_v36  ;;  %v4207_v35 = vld [vmem:[#allocation4] ss:$16 sps:$4 sm:$0xff]   ;;  %v4212_v36 = vld [vmem:[#allocation6 + $0x32c] ss:$16 sps:$4 sm:$0xff]   ;;  %v4216_v41 = vld [vmem:[#allocation4 + $0x28] ss:$16 sps:$4 sm:$0xff]  }
 0x41a   :  { %1631 = vmatpush1.bf16.msra.mxu0 %v4132_v39  ;;  %1664 = vmatpush1.bf16.msra.mxu1 %v4135_v40  ;;  %v4215_v39 = vld [vmem:[#allocation6 + $0x30c] ss:$16 sps:$4 sm:$0xff]   ;;  %v4213_v40 = vld [vmem:[#allocation6 + $0x308] ss:$16 sps:$4 sm:$0xff]  }
 0x41b   :  { %1632 = vmatprep.subr.bf16.mxu0 %v4140_v42  ;;  %1665 = vmatprep.subr.bf16.mxu1 %v4143_v43  ;;  %v4221_v42 = vld [vmem:[#allocation4 + $0xc] ss:$16 sps:$4 sm:$0xff]   ;;  %v4219_v43 = vld [vmem:[#allocation4 + $0x8] ss:$16 sps:$4 sm:$0xff]  }
 0x41e   :  { %1633 = vmatpush1.bf16.msra.mxu0 %v4138_v44  ;;  %1666 = vmatpush1.bf16.msra.mxu1 %v4141_v45  ;;  %v4224_v44 = vld [vmem:[#allocation7 + $0x74] ss:$8 sps:$4 sm:$0xff]   ;;  %v4222_v45 = vld [vmem:[#allocation7 + $0x70] ss:$8 sps:$4 sm:$0xff]  }
 0x41f   :  { %1634 = vmatprep.subr.bf16.mxu0 %v4146_v46  ;;  %1667 = vmatprep.subr.bf16.mxu1 %v4149_v47  ;;  %v4225_v46 = vld [vmem:[#allocation7 + $0x60] ss:$8 sps:$4 sm:$0xff]   ;;  %v4227_v47 = vld [vmem:[#allocation7 + $0x64] ss:$8 sps:$4 sm:$0xff]  }
 0x422   :  { %1635 = vmatpush1.bf16.msra.mxu0 %v4144_v48  ;;  %1668 = vmatpush1.bf16.msra.mxu1 %v4147_v49  ;;  %v4230_v48 = vld [vmem:[#allocation7 + $0x54] ss:$8 sps:$4 sm:$0xff]   ;;  %v4237_v49 = vld [vmem:[#allocation7 + $0x170] ss:$8 sps:$4 sm:$0xff]  }
 0x423   :  { %1636 = vmatprep.subr.bf16.mxu0 %v4152_v50  ;;  %1669 = vmatprep.subr.bf16.mxu1 %v4155_v51  ;;  %v4239_v50 = vld [vmem:[#allocation7 + $0x174] ss:$8 sps:$4 sm:$0xff]   ;;  %v4233_v51 = vld [vmem:[#allocation7 + $0x44] ss:$8 sps:$4 sm:$0xff]  }
 0x426   :  { %1637 = vmatpush2.bf16.msra.mxu0 %v4150_v52  ;;  %1670 = vmatpush1.bf16.msra.mxu1 %v4153_v53  ;;  %v4243_v52 = vld [vmem:[#allocation7 + $0x160] ss:$8 sps:$4 sm:$0xff]  }
 0x427   :  { %1638 = vmatprep.subr.bf16.mxu0 %v4158_v54  ;;  %1671 = vmatprep.subr.bf16.mxu1 %v4161_v55  ;;  %v4231_v53 = vld [vmem:[#allocation7 + $0x40] ss:$8 sps:$4 sm:$0xff]   ;;  %v4251_v54 = vld [vmem:[#allocation7 + $0x154] ss:$8 sps:$4 sm:$0xff]  }
 0x428   :  { %v4236_v55 = vld [vmem:[#allocation7 + $0x34] ss:$8 sps:$4 sm:$0xff]  }
 0x42a   :  { %1639 = vmatpush2.bf16.msra.mxu0 %v4156_v56  ;;  %1672 = vmatpush1.bf16.msra.mxu1 %v4159_v57  ;;  %v4249_v56 = vld [vmem:[#allocation7 + $0x150] ss:$8 sps:$4 sm:$0xff]   ;;  %v4257_v57 = vld [vmem:[#allocation7 + $0x144] ss:$8 sps:$4 sm:$0xff]  }
 0x42b   :  { %1640 = vmatprep.subr.bf16.mxu0 %v4164_v58  ;;  %1673 = vmatprep.subr.bf16.mxu1 %v4167_v59  ;;  %v4242_v58 = vld [vmem:[#allocation7 + $0x24] ss:$8 sps:$4 sm:$0xff]   ;;  %v4255_v59 = vld [vmem:[#allocation7 + $0x140] ss:$8 sps:$4 sm:$0xff]  }
 0x42e   :  { %1641 = vmatpush2.bf16.msra.mxu0 %v4162_v60  ;;  %1674 = vmatpush1.bf16.msra.mxu1 %v4165_v61  ;;  %v4240_v60 = vld [vmem:[#allocation7 + $0x20] ss:$8 sps:$4 sm:$0xff]   ;;  %v4263_v61 = vld [vmem:[#allocation7 + $0x134] ss:$8 sps:$4 sm:$0xff]  }
 0x42f   :  { %1642 = vmatprep.subr.bf16.mxu0 %v4170_v62  ;;  %1675 = vmatprep.subr.bf16.mxu1 %v4173_v63  ;;  %v4248_v62 = vld [vmem:[#allocation7 + $0x14] ss:$8 sps:$4 sm:$0xff]   ;;  %v4261_v63 = vld [vmem:[#allocation7 + $0x130] ss:$8 sps:$4 sm:$0xff]  }
 0x432   :  { %1643 = vmatpush2.bf16.msra.mxu0 %v4168_v2  ;;  %1676 = vmatpush1.bf16.msra.mxu1 %v4171_v3  ;;  %v4246_v2 = vld [vmem:[#allocation7 + $0x10] ss:$8 sps:$4 sm:$0xff]   ;;  %v4269_v3 = vld [vmem:[#allocation7 + $0x124] ss:$8 sps:$4 sm:$0xff]  }
 0x433   :  { %1644 = vmatprep.subr.bf16.mxu0 %v4176_v4  ;;  %1677 = vmatprep.subr.bf16.mxu1 %v4179_v5  ;;  %v4254_v4 = vld [vmem:[#allocation7 + $0x4] ss:$8 sps:$4 sm:$0xff]   ;;  %v4267_v5 = vld [vmem:[#allocation7 + $0x120] ss:$8 sps:$4 sm:$0xff]  }
 0x436   :  { %1645 = vmatpush2.bf16.msra.mxu0 %v4174_v6  ;;  %1678 = vmatpush2.bf16.msra.mxu1 %v4177_v7  ;;  %v4252_v6 = vld [vmem:[#allocation7] ss:$8 sps:$4 sm:$0xff]   ;;  %v4275_v7 = vld [vmem:[#allocation7 + $0x114] ss:$8 sps:$4 sm:$0xff]  }
 0x437   :  { %1646 = vmatprep.subr.bf16.mxu0 %v4182_v9  ;;  %1679 = vmatprep.subr.bf16.mxu1 %v4185_v11  ;;  %v4260_v9 = vld [vmem:[#allocation7 + $0xf4] ss:$8 sps:$4 sm:$0xff]   ;;  %v4273_v11 = vld [vmem:[#allocation7 + $0x110] ss:$8 sps:$4 sm:$0xff]  }
 0x43a   :  { %1647 = vmatpush2.bf16.msra.mxu0 %v4180_v12  ;;  %1680 = vmatpush2.bf16.msra.mxu1 %v4183_v16  ;;  %v4258_v12 = vld [vmem:[#allocation7 + $0xf0] ss:$8 sps:$4 sm:$0xff]   ;;  %v4266_v16 = vld [vmem:[#allocation7 + $0xe4] ss:$8 sps:$4 sm:$0xff]  }
 0x43b   :  { %1648 = vmatprep.subr.bf16.mxu0 %v4188_v17  ;;  %1681 = vmatprep.subr.bf16.mxu1 %v4191_v19  ;;  %v4264_v17 = vld [vmem:[#allocation7 + $0xe0] ss:$8 sps:$4 sm:$0xff]   ;;  %v4272_v19 = vld [vmem:[#allocation7 + $0xd4] ss:$8 sps:$4 sm:$0xff]  }
 0x43e   :  { %1649 = vmatpush2.bf16.msra.mxu0 %v4186_v20  ;;  %1682 = vmatpush2.bf16.msra.mxu1 %v4189_v21  ;;  %v4270_v20 = vld [vmem:[#allocation7 + $0xd0] ss:$8 sps:$4 sm:$0xff]   ;;  %v4278_v21 = vld [vmem:[#allocation7 + $0xc4] ss:$8 sps:$4 sm:$0xff]  }
 0x43f   :  { %1650 = vmatprep.subr.bf16.mxu0 %v4194_v23  ;;  %1683 = vmatprep.subr.bf16.mxu1 %v4197_v24  ;;  %v4281_v23 = vld [vmem:[#allocation7 + $0x104] ss:$8 sps:$4 sm:$0xff]   ;;  %v4276_v24 = vld [vmem:[#allocation7 + $0xc0] ss:$8 sps:$4 sm:$0xff]  }
 0x442   :  { %1651 = vmatpush2.bf16.msra.mxu0 %v4192_v25  ;;  %1684 = vmatpush2.bf16.msra.mxu1 %v4195_v28  ;;  %v4279_v25 = vld [vmem:[#allocation7 + $0x100] ss:$8 sps:$4 sm:$0xff]   ;;  %v4284_v28 = vld [vmem:[#allocation7 + $0xb4] ss:$8 sps:$4 sm:$0xff]  }
 0x443   :  { %1685 = vmatprep.subr.bf16.mxu1 %v4200_v22  ;;  %1754 = vmatprep.subr.bf16.mxu0 %v4203_v29  ;;  %v4287_v22 = vld [vmem:[#allocation7 + $0x1f4] ss:$8 sps:$4 sm:$0xff]   ;;  %v4282_v29 = vld [vmem:[#allocation7 + $0xb0] ss:$8 sps:$4 sm:$0xff]  }
 0x445   :  { %1653 = vmatmul.mubr.bf16.vlgmr.msra.gmra.mxu0 %v4876_v8  ;;  %v4218_v8 = vld [vmem:[#allocation4 + $0x2c] ss:$16 sps:$4 sm:$0xff]  }
 0x446   :  { %1686 = vmatpush2.bf16.msra.mxu1 %v4198_v30  ;;  %1755 = vmatpush1.bf16.msra.mxu0 %v4201_v31  ;;  %v4285_v30 = vld [vmem:[#allocation7 + $0x1f0] ss:$8 sps:$4 sm:$0xff]   ;;  %v4290_v31 = vld [vmem:[#allocation7 + $0xa4] ss:$8 sps:$4 sm:$0xff]  }
 0x447   :  { %1687 = vmatprep.subr.bf16.mxu1 %v4206_v32  ;;  %1756 = vmatprep.subr.bf16.mxu0 %v4209_v33  ;;  %v4293_v32 = vld [vmem:[#allocation7 + $0x1e4] ss:$8 sps:$4 sm:$0xff]   ;;  %v4288_v33 = vld [vmem:[#allocation7 + $0xa0] ss:$8 sps:$4 sm:$0xff]  }
 0x448   :  { %1774 = vmatprep.mubr.bf16.mxu0 %v4606_v0 }
 0x44a   :  { %1688 = vmatpush2.bf16.msra.mxu1 %v4204_v27  ;;  %1757 = vmatpush1.bf16.msra.mxu0 %v4207_v35  ;;  %v4291_v27 = vld [vmem:[#allocation7 + $0x1e0] ss:$8 sps:$4 sm:$0xff]   ;;  %v4296_v35 = vld [vmem:[#allocation7 + $0x94] ss:$8 sps:$4 sm:$0xff]  }
 0x44b   :  { %1689 = vmatprep.subr.bf16.mxu1 %v4212_v36  ;;  %2254 = vmatprep.subr.bf16.mxu0 %v4224_v44  ;;  %v4299_v36 = vld [vmem:[#allocation7 + $0x1d4] ss:$8 sps:$4 sm:$0xff]   ;;  %v4306_v44 = vld [vmem:[#allocation7 + $0x1b0] ss:$8 sps:$4 sm:$0xff]  }
 0x44d   :  { %3564 = vmatmul.mubr.msk.bf16.vlgmr.msra.gmra.mxu0 %vm260_vm0, %v4782_v10 }
 0x44e   :  { %1690 = vmatpush2.bf16.msra.mxu1 %v4210_v38  ;;  %2255 = vmatpush1.bf16.msra.mxu0 %v4222_v45  ;;  %v4294_v38 = vld [vmem:[#allocation7 + $0x90] ss:$8 sps:$4 sm:$0xff]   ;;  %v4311_v45 = vld [vmem:[#allocation7 + $0x1a4] ss:$8 sps:$4 sm:$0xff]  }
 0x44f   :  { %1691 = vmatprep.subr.bf16.mxu1 %v4215_v39  ;;  %2256 = vmatprep.subr.bf16.mxu0 %v4227_v47  ;;  %v4297_v39 = vld [vmem:[#allocation7 + $0x1d0] ss:$8 sps:$4 sm:$0xff]   ;;  %v4314_v47 = vld [vmem:[#allocation7 + $0x194] ss:$8 sps:$4 sm:$0xff]  }
 0x452   :  { %1692 = vmatpush2.bf16.msra.mxu1 %v4213_v40  ;;  %2257 = vmatpush1.bf16.msra.mxu0 %v4225_v46  ;;  %v4302_v40 = vld [vmem:[#allocation7 + $0x84] ss:$8 sps:$4 sm:$0xff]   ;;  %v4309_v46 = vld [vmem:[#allocation7 + $0x1a0] ss:$8 sps:$4 sm:$0xff]  }
 0x453   :  { %1795 = vmatprep.subr.bf16.mxu1 %v4218_v8  ;;  %2258 = vmatprep.subr.bf16.mxu0 %v4230_v48  ;;  %v4305_v8 = vld [vmem:[#allocation7 + $0x1c4] ss:$8 sps:$4 sm:$0xff]   ;;  %v4312_v48 = vld [vmem:[#allocation7 + $0x190] ss:$8 sps:$4 sm:$0xff]  }
 0x455   :  { %1694 = vmatmul.mubr.bf16.vlgmr.msra.gmra.mxu1 %v4879_v34  ;;  %v4228_v34 = vld [vmem:[#allocation7 + $0x50] ss:$8 sps:$4 sm:$0xff]  }
 0x456   :  { %1796 = vmatpush1.bf16.msra.mxu1 %v4216_v41  ;;  %1815 = vmatprep.mubr.bf16.mxu1 %v4606_v0  ;;  %v4245_v0 = vld [vmem:[#allocation7 + $0x164] ss:$8 sps:$4 sm:$0xff]   ;;  %v4300_v41 = vld [vmem:[#allocation7 + $0x80] ss:$8 sps:$4 sm:$0xff]  }
 0x457   :  { %1797 = vmatprep.subr.bf16.mxu1 %v4221_v42  ;;  %2259 = vmatpush1.bf16.msra.mxu0 %v4228_v34  ;;  %v4303_v42 = vld [vmem:[#allocation7 + $0x1c0] ss:$8 sps:$4 sm:$0xff]  }
 0x458   :  { %2260 = vmatprep.subr.bf16.mxu0 %v4233_v51  ;;  %v4315_v34 = vld [vmem:[#allocation7 + $0x180] ss:$8 sps:$4 sm:$0xff]   ;;  %v4319_v51 = vld [vmem:[%s5152_s9 + $0x78] sm:$0xff]  }
 0x45a   :  { %1798 = vmatpush1.bf16.msra.mxu1 %v4219_v43  ;;  %v4308_v43 = vld [vmem:[#allocation7 + $0x1b4] ss:$8 sps:$4 sm:$0xff]  }
 0x45b   :  { %2295 = vmatprep.subr.bf16.mxu1 %v4239_v50  ;;  %2261 = vmatpush1.bf16.msra.mxu0 %v4231_v53  ;;  %v4318_v50 = vld [vmem:[%s5154_s11 + $0x78] sm:$0xff]  }
 0x45c   :  { %2262 = vmatprep.subr.bf16.mxu0 %v4236_v55 }
 0x45d   :  { %3565 = vmatmul.mubr.msk.bf16.vlgmr.msra.gmra.mxu1 %vm260_vm0, %v4782_v10  ;;  %v4234_v10 = vld [vmem:[#allocation7 + $0x30] ss:$8 sps:$4 sm:$0xff]  }
 0x45e   :  { %2296 = vmatpush1.bf16.msra.mxu1 %v4237_v49  ;;  %v4317_v49 = vld [vmem:[#allocation7 + $0x184] ss:$8 sps:$4 sm:$0xff]  }
 0x45f   :  { %2297 = vmatprep.subr.bf16.mxu1 %v4245_v0  ;;  %2263 = vmatpush1.bf16.msra.mxu0 %v4234_v10 }
 0x460   :  { %2264 = vmatprep.subr.bf16.mxu0 %v4242_v58 }
 0x462   :  { %2298 = vmatpush1.bf16.msra.mxu1 %v4243_v52 }
 0x463   :  { %2299 = vmatprep.subr.bf16.mxu1 %v4251_v54  ;;  %2265 = vmatpush1.bf16.msra.mxu0 %v4240_v60 }
 0x464   :  { %2266 = vmatprep.subr.bf16.mxu0 %v4248_v62 }
 0x466   :  { %2300 = vmatpush1.bf16.msra.mxu1 %v4249_v56 }
 0x467   :  { %2301 = vmatprep.subr.bf16.mxu1 %v4257_v57  ;;  %2267 = vmatpush1.bf16.msra.mxu0 %v4246_v2 }
 0x468   :  { %2268 = vmatprep.subr.bf16.mxu0 %v4254_v4 }
 0x46a   :  { %2302 = vmatpush1.bf16.msra.mxu1 %v4255_v59 }
 0x46b   :  { %2303 = vmatprep.subr.bf16.mxu1 %v4263_v61  ;;  %2269 = vmatpush1.bf16.msra.mxu0 %v4252_v6  ;;  %v1824_v61 = vld [vmem:[%s5185_s20] sm:$0xf] }
 0x46c   :  { %2270 = vmatprep.subr.bf16.mxu0 %v4260_v9  ;;  %v1829_v2 = vrot.slane %v1824_v61, %v4799_v15  ;;  %v1833_v6 = vrot.slane %v1824_v61, %v4806_v18 }
 0x46e   :  { %2304 = vmatpush1.bf16.msra.mxu1 %v4261_v63 }
 0x46f   :  { %2305 = vmatprep.subr.bf16.mxu1 %v4269_v3  ;;  %2271 = vmatpush2.bf16.msra.mxu0 %v4258_v12 }
 0x470   :  { %2272 = vmatprep.subr.bf16.mxu0 %v4266_v16 }
 0x472   :  { %2306 = vmatpush1.bf16.msra.mxu1 %v4267_v5 }
 0x473   :  { %2307 = vmatprep.subr.bf16.mxu1 %v4275_v7  ;;  %2273 = vmatpush2.bf16.msra.mxu0 %v4264_v17 }
 0x474   :  { %2274 = vmatprep.subr.bf16.mxu0 %v4272_v19 }
 0x476   :  { %2308 = vmatpush1.bf16.msra.mxu1 %v4273_v11 }
 0x477   :  { %2275 = vmatpush2.bf16.msra.mxu0 %v4270_v20  ;;  %2309 = vmatprep.subr.bf16.mxu1 %v4281_v23 }
 0x478   :  { %2276 = vmatprep.subr.bf16.mxu0 %v4278_v21 }
 0x47a   :  { %2310 = vmatpush1.bf16.msra.mxu1 %v4279_v25 }
 0x47b   :  { %2277 = vmatpush2.bf16.msra.mxu0 %v4276_v24  ;;  %2311 = vmatprep.subr.bf16.mxu1 %v4287_v22  ;;  %v4321_v24 = vld [vmem:[%s5152_s9 + $0x38] sm:$0xff]   ;;  %v4323_v22 = vld [vmem:[%s5152_s9 + $0x70] sm:$0xff]  }
 0x47c   :  { %2278 = vmatprep.subr.bf16.mxu0 %v4284_v28 }
 0x47e   :  { %2312 = vmatpush2.bf16.msra.mxu1 %v4285_v30  ;;  %v4325_v30 = vld [vmem:[%s5152_s9 + $0x30] sm:$0xff]  }
 0x47f   :  { %2279 = vmatpush2.bf16.msra.mxu0 %v4282_v29  ;;  %2313 = vmatprep.subr.bf16.mxu1 %v4293_v32 }
 0x480   :  { %2280 = vmatprep.subr.bf16.mxu0 %v4290_v31 }
 0x482   :  { %2314 = vmatpush2.bf16.msra.mxu1 %v4291_v27 }
 0x483   :  { %2281 = vmatpush2.bf16.msra.mxu0 %v4288_v33  ;;  %2315 = vmatprep.subr.bf16.mxu1 %v4299_v36  ;;  %v1837_v33 = vrot.slane %v1824_v61, %v210_v26  ;;  %v4320_v26 = vld [vmem:[%s5154_s11 + $0x38] sm:$0xff]  }
 0x484   :  { %2282 = vmatprep.subr.bf16.mxu0 %v4296_v35 }
 0x486   :  { %2316 = vmatpush2.bf16.msra.mxu1 %v4297_v39 }
 0x487   :  { %2283 = vmatpush2.bf16.msra.mxu0 %v4294_v38  ;;  %2317 = vmatprep.subr.bf16.mxu1 %v4305_v8  ;;  %v1841_v38 = vrot.slane %v1824_v61, %v214_v37  ;;  %v4324_v37 = vld [vmem:[%s5154_s11 + $0x30] sm:$0xff]   ;;  %v4342_v61 = vld [vmem:[%s5154_s11 + $0x48] sm:$0xff]  }
 0x488   :  { %2284 = vmatprep.subr.bf16.mxu0 %v4302_v40 }
 0x48a   :  { %2318 = vmatpush2.bf16.msra.mxu1 %v4303_v42 }
 0x48b   :  { %2285 = vmatpush2.bf16.msra.mxu0 %v4300_v41  ;;  %2319 = vmatprep.subr.bf16.mxu1 %v4308_v43 }
 0x48c   :  { %3738 = vmatprep.subr.bf16.mxu0 %v4319_v51  ;;  %v4330_v51 = vld [vmem:[%s5154_s11 + $0x60] sm:$0xff]  }
 0x48e   :  { %2320 = vmatpush2.bf16.msra.mxu1 %v4306_v44 }
 0x48f   :  { %2321 = vmatprep.subr.bf16.mxu1 %v4311_v45 }
 0x492   :  { %2322 = vmatpush2.bf16.msra.mxu1 %v4309_v46 }
 0x493   :  { %2323 = vmatprep.subr.bf16.mxu1 %v4314_v47 }
 0x496   :  { %2324 = vmatpush2.bf16.msra.mxu1 %v4312_v48  ;;  %v4326_v48 = vld [vmem:[%s5154_s11 + $0x68] sm:$0xff]  }
 0x497   :  { %2325 = vmatprep.subr.bf16.mxu1 %v4317_v49  ;;  %v4327_v49 = vld [vmem:[%s5152_s9 + $0x68] sm:$0xff]  }
 0x49a   :  { %2326 = vmatpush2.bf16.msra.mxu1 %v4315_v34  ;;  %v4328_v34 = vld [vmem:[%s5154_s11 + $0x28] sm:$0xff]  }
 0x49b   :  { %3760 = vmatprep.subr.bf16.mxu1 %v4318_v50  ;;  %v4329_v50 = vld [vmem:[%s5152_s9 + $0x28] sm:$0xff]  }
 0x4c5   :  { %v1572_v0 = vpop.f32.mrf.mxu0 }
 0x4c7   :  { %v1574_v52 = vpop.f32.mrf.mxu0 }
 0x4c9   :  { %v1576_v53 = vpop.f32.mrf.mxu0 }
 0x4ca   :  { %v4333_v53 = vld [vmem:[%s5152_s9 + $0x20] sm:$0xff]  }
 0x4cb   :  { %v1577_v54 = vpop.f32.mrf.mxu0 }
 0x4cc   :  { %v4334_v54 = vld [vmem:[%s5154_s11 + $0x58] sm:$0xff]  }
 0x4d5   :  { %v1613_v55 = vpop.f32.mrf.mxu1 }
 0x4d6   :  { %v1614_v63 = vadd.f32 %v1613_v55, %v1572_v0  ;;  %v4331_v0 = vld [vmem:[%s5152_s9 + $0x60] sm:$0xff]   ;;  %v4335_v55 = vld [vmem:[%s5152_s9 + $0x58] sm:$0xff]  }
 0x4d7   :  { %v1615_v56 = vpop.f32.mrf.mxu1 }
 0x4d8   :  { %v1616_v4 = vadd.f32 %v1615_v56, %v1574_v52  ;;  %v4332_v52 = vld [vmem:[%s5154_s11 + $0x20] sm:$0xff]   ;;  %v4336_v56 = vld [vmem:[%s5154_s11 + $0x18] sm:$0xff]  }
 0x4d9   :  { %v1617_v10 = vpop.f32.mrf.mxu1 }
 0x4da   :  { %v4337_v10 = vld [vmem:[%s5152_s9 + $0x18] sm:$0xff]  }
 0x4db   :  { %v1618_v57 = vpop.f32.mrf.mxu1 }
 0x4dc   :  { %v4338_v57 = vld [vmem:[%s5154_s11 + $0x50] sm:$0xff]  }
 0x505   :  { %v1654_v58 = vpop.f32.mrf.mxu0 }
 0x507   :  { %v1656_v59 = vpop.f32.mrf.mxu0 }
 0x509   :  { %v1658_v60 = vpop.f32.mrf.mxu0 }
 0x50a   :  { %v4341_v60 = vld [vmem:[%s5152_s9 + $0x10] sm:$0xff]  }
 0x50b   :  { %v1659_v62 = vpop.f32.mrf.mxu0 }
 0x50c   :  { %v4343_v62 = vld [vmem:[%s5152_s9 + $0x48] sm:$0xff]  }
 0x50d   :  { %v1776_v3 = vpop.f32.mrf.mxu0 }
 0x50e   :  { %v1777_v5 = vadd.f32 %v1776_v3, %v1614_v63  ;;  %v4344_v63 = vld [vmem:[%s5154_s11 + $0x8] sm:$0xff]   ;;  %v4346_v3 = vld [vmem:[%s5154_s11 + $0x40] sm:$0xff]  }
 0x50f   :  { %v1778_v7 = vpop.f32.mrf.mxu0 }
 0x510   :  { %v1846_v9 = vadd.f32 %v1829_v2, %v1777_v5  ;;  %v1779_v11 = vadd.f32 %v1778_v7, %v1616_v4  ;;  %v4345_v2 = vld [vmem:[%s5152_s9 + $0x8] sm:$0xff]   ;;  %v4347_v4 = vld [vmem:[%s5152_s9 + $0x40] sm:$0xff]   ;;  %v4350_v7 = vld [vmem:[%s5158_s15 + $0x78] sm:$0xff]  }
 0x511   :  { %v1780_v12 = vpop.f32.mrf.mxu0  ;;  %v4348_v5 = vld [vmem:[%s5154_s11] sm:$0xff]  }
 0x512   :  { %v1847_v16 = vadd.f32 %v1833_v6, %v1779_v11  ;;  %v1850_v17 = vmax.f32 %v1846_v9, 0.0  ;;  %v4349_v6 = vld [vmem:[%s5152_s9] sm:$0xff]  }
 0x513   :  { %v1781_v19 = vpop.f32.mrf.mxu0 }
 0x514   :  { %v1851_v20 = vmax.f32 %v1847_v16, 0.0  ;;  %v1854_v25 = vpack.c.bf16 %v1850_v17, %v1850_v17  ;;  %v1922_v17 = vld [vmem:[%s5151_s8] sm:$0x3] }
 0x515   :  { %v1695_v21 = vpop.f32.mrf.mxu1  ;;  %v1927_v19 = vrot.slane %v1922_v17, %v4799_v15  ;;  %v4352_v15 = vld [vmem:[%s5158_s15 + $0x70] sm:$0xff]  }
 0x516   :  { %v1855_v23 = vpack.c.bf16 %v1851_v20, %v1851_v20  ;;  %v1696_v32 = vadd.f32 %v1695_v21, %v1654_v58  ;;  %v4339_v58 = vld [vmem:[%s5152_s9 + $0x50] sm:$0xff]   ;;  %v1931_v20 = vrot.slane %v1922_v17, %v4806_v18  ;;  %v4366_v18 = vld [vmem:[#allocation9 + $0x38] sm:$0xff]  }
 0x517   :  { %v1697_v28 = vpop.f32.mrf.mxu1  ;;  %v4378_v17 = vld [vmem:[%s5160_s17 + $0x18] sm:$0xff]  }
 0x518   :  { %2286 = vmatprep.mubr.bf16.mxu0 %v1855_v23  ;;  %v1698_v35 = vadd.f32 %v1697_v28, %v1656_v59  ;;  %v4340_v59 = vld [vmem:[%s5154_s11 + $0x10] sm:$0xff]  }
 0x519   :  { %v1699_v29 = vpop.f32.mrf.mxu1  ;;  %2287 = vmatmul.mubr.bf16.vlgmr.msra.gmra.mxu0 %v1854_v25 }
 0x51a   :  { %3739 = vmatpush3.bf16.msra.mxu0 %v4321_v24 }
 0x51b   :  { %v1700_v31 = vpop.f32.mrf.mxu1  ;;  %3740 = vmatprep.subr.bf16.mxu0 %v4323_v22 }
 0x51d   :  { %v1817_v27 = vpop.f32.mrf.mxu1 }
 0x51e   :  { %v1818_v36 = vadd.f32 %v1817_v27, %v1696_v32  ;;  %3741 = vmatpush3.bf16.msra.mxu0 %v4325_v30  ;;  %v4351_v27 = vld [vmem:[%s5158_s15 + $0x38] sm:$0xff]  }
 0x51f   :  { %v1819_v39 = vpop.f32.mrf.mxu1  ;;  %3742 = vmatprep.subr.bf16.mxu0 %v4327_v49  ;;  %v4364_v49 = vld [vmem:[%s5158_s15 + $0x40] sm:$0xff]  }
 0x520   :  { %v1848_v40 = vadd.f32 %v1837_v33, %v1818_v36  ;;  %v1820_v8 = vadd.f32 %v1819_v39, %v1698_v35  ;;  %v4353_v36 = vld [vmem:[%s5158_s15 + $0x30] sm:$0xff]  }
 0x521   :  { %v1821_v41 = vpop.f32.mrf.mxu1  ;;  %v4367_v39 = vld [vmem:[#allocation9 + $0x30] sm:$0xff]  }
 0x522   :  { %v1849_v42 = vadd.f32 %v1841_v38, %v1820_v8  ;;  %v1852_v43 = vmax.f32 %v1848_v40, 0.0  ;;  %3743 = vmatpush3.bf16.msra.mxu0 %v4329_v50  ;;  %v4354_v38 = vld [vmem:[%s5158_s15 + $0x68] sm:$0xff]   ;;  %v4356_v8 = vld [vmem:[%s5158_s15 + $0x60] sm:$0xff]  }
 0x523   :  { %v1822_v44 = vpop.f32.mrf.mxu1  ;;  %3744 = vmatprep.subr.bf16.mxu0 %v4331_v0  ;;  %v4355_v40 = vld [vmem:[%s5158_s15 + $0x28] sm:$0xff]   ;;  %v4390_v0 = vld [vmem:[#allocation12 + $0x38] sm:$0xff]  }
 0x524   :  { %v1853_v45 = vmax.f32 %v1849_v42, 0.0  ;;  %v1856_v47 = vpack.c.bf16 %v1852_v43, %v1852_v43  ;;  %v4368_v41 = vld [vmem:[#allocation9 + $0x28] sm:$0xff]   ;;  %v4357_v42 = vld [vmem:[%s5158_s15 + $0x20] sm:$0xff]   ;;  %v4358_v43 = vld [vmem:[%s5158_s15 + $0x58] sm:$0xff]  }
 0x525   :  { %v4369_v44 = vld [vmem:[#allocation9 + $0x20] sm:$0xff]   ;;  %v4372_v50 = vld [vmem:[#allocation9 + $0x8] sm:$0xff]  }
 0x526   :  { %v1857_v46 = vpack.c.bf16 %v1853_v45, %v1853_v45  ;;  %3745 = vmatpush3.bf16.msra.mxu0 %v4333_v53  ;;  %v4359_v45 = vld [vmem:[%s5158_s15 + $0x18] sm:$0xff]   ;;  %v4392_v53 = vld [vmem:[#allocation12 + $0x28] sm:$0xff]  }
 0x527   :  { %3746 = vmatprep.subr.bf16.mxu0 %v4335_v55  ;;  %v4394_v55 = vld [vmem:[#allocation12 + $0x18] sm:$0xff]  }
 0x528   :  { %2327 = vmatprep.mubr.bf16.mxu1 %v1857_v46  ;;  %v4360_v46 = vld [vmem:[%s5158_s15 + $0x50] sm:$0xff]  }
 0x529   :  { %2328 = vmatmul.mubr.bf16.vlgmr.msra.gmra.mxu1 %v1856_v47  ;;  %v4361_v47 = vld [vmem:[%s5158_s15 + $0x10] sm:$0xff]  }
 0x52a   :  { %3761 = vmatpush3.bf16.msra.mxu1 %v4320_v26  ;;  %3747 = vmatpush3.bf16.msra.mxu0 %v4337_v10  ;;  %v4370_v26 = vld [vmem:[#allocation9 + $0x18] sm:$0xff]  }
 0x52b   :  { %3762 = vmatprep.subr.bf16.mxu1 %v4322_v14  ;;  %3748 = vmatprep.subr.bf16.mxu0 %v4339_v58  ;;  %v4362_v14 = vld [vmem:[%s5158_s15 + $0x48] sm:$0xff]  }
 0x52e   :  { %3763 = vmatpush3.bf16.msra.mxu1 %v4324_v37  ;;  %3749 = vmatpush3.bf16.msra.mxu0 %v4341_v60  ;;  %v4371_v37 = vld [vmem:[#allocation9 + $0x10] sm:$0xff]  }
 0x52f   :  { %3764 = vmatprep.subr.bf16.mxu1 %v4326_v48  ;;  %3750 = vmatprep.subr.bf16.mxu0 %v4343_v62  ;;  %v4363_v48 = vld [vmem:[%s5158_s15 + $0x8] sm:$0xff]  }
 0x532   :  { %3765 = vmatpush3.bf16.msra.mxu1 %v4328_v34  ;;  %3751 = vmatpush3.bf16.msra.mxu0 %v4345_v2  ;;  %v4365_v34 = vld [vmem:[%s5158_s15] sm:$0xff]   ;;  %s5187_s15 = sld [smem:[#allocation29_spill]] }
 0x533   :  { %3766 = vmatprep.subr.bf16.mxu1 %v4330_v51  ;;  %3752 = vmatprep.subr.bf16.mxu0 %v4347_v4  ;;  %v4373_v51 = vld [vmem:[#allocation9] sm:$0xff]  }
 0x536   :  { %3767 = vmatpush3.bf16.msra.mxu1 %v4332_v52  ;;  %3753 = vmatpush3.bf16.msra.mxu0 %v4349_v6  ;;  %v4391_v52 = vld [vmem:[#allocation12 + $0x30] sm:$0xff]  }
 0x537   :  { %3768 = vmatprep.subr.bf16.mxu1 %v4334_v54  ;;  %3893 = vmatprep.subr.bf16.mxu0 %v4607_v1  ;;  %v4393_v54 = vld [vmem:[#allocation12 + $0x20] sm:$0xff]  }
 0x53a   :  { %3769 = vmatpush3.bf16.msra.mxu1 %v4336_v56  ;;  %v4395_v56 = vld [vmem:[#allocation12 + $0x10] sm:$0xff]  }
 0x53b   :  { %3770 = vmatprep.subr.bf16.mxu1 %v4338_v57 }
 0x53e   :  { %3771 = vmatpush3.bf16.msra.mxu1 %v4340_v59  ;;  %v3647_v59 = vld [vmem:[%s5155_s12] ss:$0 sm:$0xff] }
 0x53f   :  { %3772 = vmatprep.subr.bf16.mxu1 %v4342_v61 }
 0x542   :  { %3773 = vmatpush3.bf16.msra.mxu1 %v4344_v63 }
 0x543   :  { %3774 = vmatprep.subr.bf16.mxu1 %v4346_v3 }
 0x546   :  { %3775 = vmatpush3.bf16.msra.mxu1 %v4348_v5 }
 0x547   :  { %3791 = vmatprep.subr.bf16.mxu1 %v4350_v7  ;;  %v4374_v7 = vld [vmem:[%s5160_s17 + $0x38] sm:$0xff]  }
 0x5d9   :  { %v2288_v9 = vpop.f32.mrf.mxu0 }
 0x5da   :  { %v2289_v21 = vadd.f32 %v2288_v9, %v1927_v19  ;;  %v4379_v19 = vld [vmem:[%s5160_s17 + $0x10] sm:$0xff]  }
 0x5db   :  { %v2290_v11 = vpop.f32.mrf.mxu0 }
 0x5dc   :  { %v2291_v24 = vadd.f32 %v2290_v11, %v1931_v20  ;;  %v4375_v11 = vld [vmem:[%s5160_s17 + $0x30] sm:$0xff]  }
 0x5dd   :  { %v2292_v12 = vpop.f32.mrf.mxu0 }
 0x5de   :  { %v4376_v12 = vld [vmem:[%s5160_s17 + $0x28] sm:$0xff]  }
 0x5df   :  { %v2293_v16 = vpop.f32.mrf.mxu0 }
 0x5e0   :  { %v4377_v16 = vld [vmem:[%s5160_s17 + $0x20] sm:$0xff]  }
 0x5e9   :  { %v2329_v23 = vpop.f32.mrf.mxu1 }
 0x5ea   :  { %v2330_v25 = vadd.f32 %v2329_v23, %v2289_v21  ;;  %v4380_v21 = vld [vmem:[%s5160_s17 + $0x8] sm:$0xff]   ;;  %v3673_v23 = vld [vmem:[%s5159_s16] ss:$0 sm:$0xff] }
 0x5eb   :  { %v2331_v28 = vpop.f32.mrf.mxu1 }
 0x5ec   :  { %v2332_v22 = vadd.f32 %v2331_v28, %v2291_v24  ;;  %v2336_v29 = vmax.f32 %v2330_v25, 0.0 }
 0x5ed   :  { %v2333_v30 = vpop.f32.mrf.mxu1 }
 0x5ee   :  { %v2337_v31 = vmax.f32 %v2332_v22, 0.0  ;;  %v2338_v35 = vpack.c.bf16 %v2336_v29, %v2336_v29  ;;  %v4381_v22 = vld [vmem:[%s5160_s17] sm:$0xff]  }
 0x5ef   :  { %v2334_v32 = vpop.f32.mrf.mxu1 }
 0x5f0   :  { %v2339_v33 = vpack.c.bf16 %v2337_v31, %v2337_v31  ;;  %v4382_v32 = vld [vmem:[#allocation10 + $0x38] sm:$0xff]  }
 0x5f2   :  { %2507 = vmatprep.mubr.bf16.mxu0 %v2339_v33  ;;  %2684 = vmatprep.mubr.bf16.mxu1 %v2339_v33 }
 0x5f3   :  { %2508 = vmatmul.mubr.bf16.vlgmr.msra.gmra.mxu0 %v2338_v35  ;;  %2685 = vmatmul.mubr.bf16.vlgmr.msra.gmra.mxu1 %v2338_v35 }
 0x5f4   :  { %3792 = vmatpush3.bf16.msra.mxu1 %v4351_v27  ;;  %2974 = vmatprep.mubr.bf16.mxu1 %v2339_v33  ;;  %v4383_v27 = vld [vmem:[#allocation10 + $0x30] sm:$0xff]  }
 0x5f5   :  { %3793 = vmatprep.subr.bf16.mxu1 %v4352_v15  ;;  %3894 = vmatpush3.bf16.msra.mxu0 %v4366_v18  ;;  %v4385_v15 = vld [vmem:[#allocation10 + $0x20] sm:$0xff]   ;;  %v4386_v18 = vld [vmem:[#allocation10 + $0x18] sm:$0xff]  }
 0x5f6   :  { %3895 = vmatprep.subr.bf16.mxu0 %v4607_v1  ;;  %3909 = vmatprep.mubr.msk.bf16.mxu0 %vm4608_vm1, %v4607_v1 }
 0x5f8   :  { %3794 = vmatpush3.bf16.msra.mxu1 %v4353_v36  ;;  %v4387_v36 = vld [vmem:[#allocation10 + $0x10] sm:$0xff]  }
 0x5f9   :  { %3795 = vmatprep.subr.bf16.mxu1 %v4354_v38  ;;  %3896 = vmatpush3.bf16.msra.mxu0 %v4367_v39  ;;  %v3630_v38 = vld [vmem:[%s5153_s10] ss:$0 sm:$0xff]  ;;  %v4388_v39 = vld [vmem:[#allocation10 + $0x8] sm:$0xff]  }
 0x5fa   :  { %3897 = vmatprep.subr.bf16.mxu0 %v4607_v1 }
 0x5fc   :  { %3796 = vmatpush3.bf16.msra.mxu1 %v4355_v40 }
 0x5fd   :  { %3797 = vmatprep.subr.bf16.mxu1 %v4356_v8  ;;  %3898 = vmatpush3.bf16.msra.mxu0 %v4368_v41  ;;  %v4389_v8 = vld [vmem:[#allocation10] sm:$0xff]  }
 0x5fe   :  { %3899 = vmatprep.subr.bf16.mxu0 %v4607_v1 }
 0x600   :  { %3798 = vmatpush3.bf16.msra.mxu1 %v4357_v42 }
 0x601   :  { %3799 = vmatprep.subr.bf16.mxu1 %v4358_v43  ;;  %3900 = vmatpush3.bf16.msra.mxu0 %v4369_v44  ;;  %v4396_v43 = vld [vmem:[#allocation12 + $0x8] sm:$0xff]   ;;  %v4397_v44 = vld [vmem:[#allocation12] sm:$0xff]  }
 0x602   :  { %3901 = vmatprep.subr.bf16.mxu0 %v4607_v1 }
 0x604   :  { %3800 = vmatpush3.bf16.msra.mxu1 %v4359_v45  ;;  %v3664_v45 = vld [vmem:[%s5157_s14] ss:$0 sm:$0xff] }
 0x605   :  { %3801 = vmatprep.subr.bf16.mxu1 %v4360_v46  ;;  %3902 = vmatpush3.bf16.msra.mxu0 %v4370_v26 }
 0x606   :  { %3903 = vmatprep.subr.bf16.mxu0 %v4607_v1 }
 0x608   :  { %3802 = vmatpush3.bf16.msra.mxu1 %v4361_v47 }
 0x609   :  { %3803 = vmatprep.subr.bf16.mxu1 %v4362_v14  ;;  %3904 = vmatpush3.bf16.msra.mxu0 %v4371_v37 }
 0x60a   :  { %3905 = vmatprep.subr.bf16.mxu0 %v4607_v1 }
 0x60c   :  { %3804 = vmatpush3.bf16.msra.mxu1 %v4363_v48  ;;  %v4398_v48 = vld [vmem:[#allocation13 + $0x18] sm:$0xff]  }
 0x60d   :  { %3805 = vmatprep.subr.bf16.mxu1 %v4364_v49  ;;  %3906 = vmatpush3.bf16.msra.mxu0 %v4372_v50  ;;  %v4399_v50 = vld [vmem:[#allocation13 + $0x10] sm:$0xff]  }
 0x60e   :  { %3907 = vmatprep.subr.bf16.mxu0 %v4607_v1 }
 0x610   :  { %3806 = vmatpush3.bf16.msra.mxu1 %v4365_v34 }
 0x611   :  { %3933 = vmatprep.subr.bf16.mxu1 %v4607_v1  ;;  %3908 = vmatpush3.bf16.msra.mxu0 %v4373_v51  ;;  %v4400_v51 = vld [vmem:[#allocation13 + $0x8] sm:$0xff]  }
 0x612   :  { %3913 = vmatprep.subr.bf16.mxu0 %v4607_v1 }
 0x613   :  { %2975 = vmatmul.mubr.bf16.vlgmr.msra.gmra.mxu1 %v2338_v35  ;;  %v4384_v35 = vld [vmem:[#allocation10 + $0x28] sm:$0xff]  }
 0x614   :  { %3949 = vmatprep.mubr.msk.bf16.mxu1 %vm4608_vm1, %v4607_v1  ;;  %3934 = vmatpush3.bf16.msra.mxu1 %v4390_v0  ;;  %v4401_v0 = vld [vmem:[#allocation13] sm:$0xff]  }
 0x615   :  { %3935 = vmatprep.subr.bf16.mxu1 %v4607_v1 }
 0x618   :  { %3936 = vmatpush3.bf16.msra.mxu1 %v4391_v52  ;;  %v3690_v52 = vld [vmem:[%s5161_s18] ss:$0 sm:$0xff] }
 0x619   :  { %3937 = vmatprep.subr.bf16.mxu1 %v4607_v1 }
 0x61c   :  { %3938 = vmatpush3.bf16.msra.mxu1 %v4392_v53 }
 0x61d   :  { %3939 = vmatprep.subr.bf16.mxu1 %v4607_v1 }
 0x620   :  { %3940 = vmatpush3.bf16.msra.mxu1 %v4393_v54 }
 0x621   :  { %3941 = vmatprep.subr.bf16.mxu1 %v4607_v1 }
 0x624   :  { %3942 = vmatpush3.bf16.msra.mxu1 %v4394_v55 }
 0x625   :  { %3943 = vmatprep.subr.bf16.mxu1 %v4607_v1 }
 0x628   :  { %3944 = vmatpush3.bf16.msra.mxu1 %v4395_v56 }
 0x629   :  { %3945 = vmatprep.subr.bf16.mxu1 %v4607_v1 }
 0x62c   :  { %3946 = vmatpush3.bf16.msra.mxu1 %v4396_v43 }
 0x62d   :  { %3947 = vmatprep.subr.bf16.mxu1 %v4607_v1 }
 0x630   :  { %3948 = vmatpush3.bf16.msra.mxu1 %v4397_v44 }
 0x631   :  { %3973 = vmatprep.subr.bf16.mxu1 %v4607_v1 }
 0x6b3   :  { %v3754_v10 = vpop.f32.mrf.mxu0  ;;  %v3776_v57 = vpop.f32.mrf.mxu1 }
 0x6b5   :  { %v3755_v58 = vpop.f32.mrf.mxu0  ;;  %v3777_v60 = vpop.f32.mrf.mxu1 }
 0x6b6   :  { %v5071_v61 = vadd.f32 %v3755_v58, %v3754_v10  ;;  %v3778_v62 = vadd.f32 %v3777_v60, %v3776_v57 }
 0x6b7   :  { %v3757_v63 = vpop.f32.mrf.mxu0  ;;  %v3779_v2 = vpop.f32.mrf.mxu1 }
 0x6b8   :  { %v2687_v3 = vadd.f32 %v3778_v62, %v3647_v59  ;;  %v2510_v40 = vadd.f32 %v5071_v61, %v3630_v38 }
 0x6b9   :  { %v3758_v4 = vpop.f32.mrf.mxu0  ;;  %v3780_v5 = vpop.f32.mrf.mxu1 }
 0x6ba   :  { %v2692_v6 = vmax.f32 %v2687_v3, 0.0  ;;  %v2515_v41 = vmax.f32 %v2510_v40, 0.0 }
 0x6bc   :  { %v2693_v9 = vpack.c.bf16 %v2692_v6, %v2692_v6  ;;  %v2516_v42 = vpack.c.bf16 %v2515_v41, %v2515_v41  ;;  %v3720_v6 = vld [vmem:[%s5186_s2] ss:$0 sm:$0xff] }
 0x6be   :  { %3910 = vmatmul.mubr.bf16.vlgmr.msra.gmra.mxu0 %v2693_v9 }
 0x6bf   :  { %3914 = vmatpush3.bf16.msra.mxu0 %v4374_v7  ;;  %3929 = vmatprep.mubr.msk.bf16.mxu0 %vm4608_vm1, %v4607_v1 }
 0x6c0   :  { %3915 = vmatprep.subr.bf16.mxu0 %v4607_v1 }
 0x6c3   :  { %3916 = vmatpush3.bf16.msra.mxu0 %v4375_v11 }
 0x6c4   :  { %3917 = vmatprep.subr.bf16.mxu0 %v4607_v1 }
 0x6c7   :  { %3918 = vmatpush3.bf16.msra.mxu0 %v4376_v12 }
 0x6c8   :  { %3919 = vmatprep.subr.bf16.mxu0 %v4607_v1 }
 0x6cb   :  { %3920 = vmatpush3.bf16.msra.mxu0 %v4377_v16 }
 0x6cc   :  { %3921 = vmatprep.subr.bf16.mxu0 %v4607_v1 }
 0x6cf   :  { %3922 = vmatpush3.bf16.msra.mxu0 %v4378_v17 }
 0x6d0   :  { %3923 = vmatprep.subr.bf16.mxu0 %v4607_v1 }
 0x6d3   :  { %v3807_v20 = vpop.f32.mrf.mxu1  ;;  %3924 = vmatpush3.bf16.msra.mxu0 %v4379_v19 }
 0x6d4   :  { %3925 = vmatprep.subr.bf16.mxu0 %v4607_v1 }
 0x6d5   :  { %v3808_v24 = vpop.f32.mrf.mxu1 }
 0x6d6   :  { %v3809_v25 = vadd.f32 %v3808_v24, %v3807_v20 }
 0x6d7   :  { %v3810_v28 = vpop.f32.mrf.mxu1  ;;  %3926 = vmatpush3.bf16.msra.mxu0 %v4380_v21  ;;  %v3391_v21 = vand.u32 127, %v200_v13 }
 0x6d8   :  { %v2977_v29 = vadd.f32 %v3809_v25, %v3673_v23  ;;  %3927 = vmatprep.subr.bf16.mxu0 %v4607_v1 }
 0x6d9   :  { %v3811_v30 = vpop.f32.mrf.mxu1  ;;  %vm3392_vm5 = vcmp.eq.s32.totalorder %v3391_v21, 8 }
 0x6da   :  { %v2982_v31 = vmax.f32 %v2977_v29, 0.0 }
 0x6db   :  { %3928 = vmatpush3.bf16.msra.mxu0 %v4381_v22 }
 0x6dc   :  { %v2983_v33 = vpack.c.bf16 %v2982_v31, %v2982_v31  ;;  %3953 = vmatprep.subr.bf16.mxu0 %v4607_v1 }
 0x6de   :  { %3930 = vmatmul.mubr.bf16.vlgmr.msra.gmra.mxu0 %v2983_v33 }
 0x6df   :  { %3954 = vmatpush3.bf16.msra.mxu0 %v4382_v32  ;;  %3969 = vmatprep.mubr.msk.bf16.mxu0 %vm4608_vm1, %v4607_v1 }
 0x6e0   :  { %3955 = vmatprep.subr.bf16.mxu0 %v4607_v1 }
 0x6e3   :  { %3956 = vmatpush3.bf16.msra.mxu0 %v4383_v27 }
 0x6e4   :  { %3957 = vmatprep.subr.bf16.mxu0 %v4607_v1 }
 0x6e7   :  { %3958 = vmatpush3.bf16.msra.mxu0 %v4384_v35 }
 0x6e8   :  { %3959 = vmatprep.subr.bf16.mxu0 %v4607_v1 }
 0x6eb   :  { %3960 = vmatpush3.bf16.msra.mxu0 %v4385_v15 }
 0x6ec   :  { %3961 = vmatprep.subr.bf16.mxu0 %v4607_v1 }
 0x6ef   :  { %3962 = vmatpush3.bf16.msra.mxu0 %v4386_v18 }
 0x6f0   :  { %3963 = vmatprep.subr.bf16.mxu0 %v4607_v1 }
 0x6f3   :  { %3964 = vmatpush3.bf16.msra.mxu0 %v4387_v36 }
 0x6f4   :  { %3965 = vmatprep.subr.bf16.mxu0 %v4607_v1 }
 0x6f7   :  { %3966 = vmatpush3.bf16.msra.mxu0 %v4388_v39 }
 0x6f8   :  { %3967 = vmatprep.subr.bf16.mxu0 %v4607_v1 }
 0x6fb   :  { %3968 = vmatpush3.bf16.msra.mxu0 %v4389_v8 }
 0x6fe   :  { %3970 = vmatmul.mubr.bf16.vlgmr.msra.gmra.mxu0 %v2516_v42 }
 0x77e   :  { %v2799_v46 = vpop.f32.mrf.mxu0 }
 0x77f   :  { %v2800_v26 = vadd.f32 %v3664_v45, %v2799_v46 }
 0x780   :  { %v3911_v47 = vpop.f32.mrf.mxu0 }
 0x781   :  { %v2805_v14 = vmax.f32 %v2800_v26, 0.0 }
 0x782   :  { %v2802_v37 = vpop.f32.mrf.mxu0 }
 0x783   :  { %v2806_v49 = vpack.c.bf16 %v2805_v14, %v2805_v14 }
 0x784   :  { %v3912_v34 = vpop.f32.mrf.mxu0 }
 0x785   :  { %3950 = vmatmul.mubr.bf16.vlgmr.msra.gmra.mxu1 %v2806_v49 }
 0x786   :  { %3974 = vmatpush3.bf16.msra.mxu1 %v4398_v48  ;;  %3981 = vmatprep.mubr.msk.bf16.mxu1 %vm4608_vm1, %v4607_v1 }
 0x787   :  { %3975 = vmatprep.subr.bf16.mxu1 %v4607_v1 }
 0x78a   :  { %3976 = vmatpush3.bf16.msra.mxu1 %v4399_v50 }
 0x78b   :  { %3977 = vmatprep.subr.bf16.mxu1 %v4607_v1 }
 0x78e   :  { %3978 = vmatpush3.bf16.msra.mxu1 %v4400_v51 }
 0x78f   :  { %3979 = vmatprep.subr.bf16.mxu1 %v4607_v1 }
 0x792   :  { %3980 = vmatpush3.bf16.msra.mxu1 %v4401_v0 }
 0x79e   :  { %v3089_v53 = vpop.f32.mrf.mxu0 }
 0x79f   :  { %v3090_v54 = vadd.f32 %v3690_v52, %v3089_v53 }
 0x7a0   :  { %v3931_v55 = vpop.f32.mrf.mxu0 }
 0x7a1   :  { %v3095_v56 = vmax.f32 %v3090_v54, 0.0 }
 0x7a2   :  { %v3092_v10 = vpop.f32.mrf.mxu0 }
 0x7a3   :  { %v3096_v57 = vpack.c.bf16 %v3095_v56, %v3095_v56 }
 0x7a4   :  { %v3932_v58 = vpop.f32.mrf.mxu0 }
 0x7a5   :  { %3982 = vmatmul.mubr.msk.bf16.vlgmr.msra.gmra.mxu1 %vm3337_vm4, %v3096_v57 }
 0x7be   :  { %v3299_v59 = vpop.f32.mrf.mxu0 }
 0x7c0   :  { %v3971_v60 = vpop.f32.mrf.mxu0 }
 0x7c2   :  { %v3302_v61 = vpop.f32.mrf.mxu0 }
 0x7c4   :  { %v3972_v62 = vpop.f32.mrf.mxu0 }
 0x845   :  { %v3211_v63 = vpop.f32.mrf.mxu1 }
 0x846   :  { %v3300_v4 = vadd.f32 %v3299_v59, %v3211_v63 }
 0x847   :  { %v3951_v1 = vpop.f32.mrf.mxu1 }
 0x849   :  { %v3214_v2 = vpop.f32.mrf.mxu1 }
 0x84b   :  { %v3952_v3 = vpop.f32.mrf.mxu1 }
 0x865   :  { %v3375_v5 = vpop.f32.mrf.mxu1 }
 0x866   :  { %v3381_v7 = vadd.f32 %v3375_v5, %v3300_v4 }
 0x867   :  { %v3983_v9 = vpop.f32.mrf.mxu1 }
 0x868   :  { %v3389_v11 = vadd.f32 %v3720_v6, %v3381_v7 }
 0x869   :  { %v3378_v12 = vpop.f32.mrf.mxu1 }
 0x86a   :  { %v3721_v16 = vmul.f32 -1.442695, %v3389_v11 }
 0x86b   :  { %v3984_v17 = vpop.f32.mrf.mxu1 }
 0x86c   :  { %4418 = vpow2.f32 %v3721_v16 }
 0x879   :  { %v4419_v19 = vpop.eup %4418 }
 0x87a   :  { %v3396_v20 = vadd.f32 1.0, %v4419_v19 }
 0x87c   :  { %4420 = vrcp.f32 %v3396_v20 }
 0x889   :  { %v4421_v23 = vpop.eup %4420 }
 0x88a   :  { %v3399_v24 = vsel %vm3392_vm5, %v4421_v23, %v3389_v11 }
 0x88b   :  { %3400 = vst [vmem:[%s5187_s15] sm:$0xff] %v3399_v24 }
 0x88c   :  { %3405 = vsyncpa [#allocation3], 1 }
 0x88d   :  { %3406 = vsyncpa [#allocation5], 1 }
 0x88e   :  { %3407 = vsyncpa [#allocation8], 1 }
 0x88f   :  { %3408 = vsyncpa [#allocation11], 1 }
 0x890   :  { %3409 = vsyncpa [#allocation14], 1 }

// kernel: multitask_forward.1
= control target key start
LH: loop header
LB: loop body
LE: loop exit
PB: predicated region body
PF: predicated region fallthrough
CT: control target
= control target key end

     0   :  { %s5143_s0 = inlined_call_operand.vmem [shape: f32[8,32], index: 0, kind: input, shape index: {}]   ;;  %s5144_s1 = inlined_call_operand.vmem [shape: bf16[8,1024], index: 1, kind: input, shape index: {}]   ;;  %s5145_s2 = inlined_call_operand.hbm [shape: bf16[32,512], index: 2, kind: input, shape index: {}]   ;;  %s5146_s3 = inlined_call_operand.vmem [shape: f32[1,512], index: 3, kind: input, shape index: {}]   ;;  %s5147_s4 = inlined_call_operand.hbm [shape: bf16[32,512], index: 4, kind: input, shape index: {}]   ;;  %s5148_s5 = inlined_call_operand.hbm [shape: bf16[512,512], index: 5, kind: input, shape index: {}]   ;;  %s5149_s6 = inlined_call_operand.vmem [shape: f32[1,512], index: 6, kind: input, shape index: {}]   ;;  %s5150_s7 = inlined_call_operand.hbm [shape: bf16[512,256], index: 7, kind: input, shape index: {}]   ;;  %s5151_s8 = inlined_call_operand.vmem [shape: f32[1,256], index: 8, kind: input, shape index: {}]   ;;  %s5152_s9 = inlined_call_operand.vmem [shape: bf16[256,128], index: 9, kind: input, shape index: {}]   ;;  %s5153_s10 = inlined_call_operand.vmem [shape: f32[1,128], index: 10, kind: input, shape index: {}]   ;;  %s5154_s11 = inlined_call_operand.vmem [shape: bf16[256,128], index: 11, kind: input, shape index: {}]   ;;  %s5155_s12 = inlined_call_operand.vmem [shape: f32[1,128], index: 12, kind: input, shape index: {}]   ;;  %s5156_s13 = inlined_call_operand.hbm [shape: bf16[128,128], index: 13, kind: input, shape index: {}]   ;;  %s5157_s14 = inlined_call_operand.vmem [shape: f32[1,128], index: 14, kind: input, shape index: {}]   ;;  %s5158_s15 = inlined_call_operand.vmem [shape: bf16[256,128], index: 15, kind: input, shape index: {}]   ;;  %s5159_s16 = inlined_call_operand.vmem [shape: f32[1,128], index: 16, kind: input, shape index: {}]   ;;  %s5160_s17 = inlined_call_operand.vmem [shape: bf16[128,64], index: 17, kind: input, shape index: {}]   ;;  %s5161_s18 = inlined_call_operand.vmem [shape: f32[1,64], index: 18, kind: input, shape index: {}]   ;;  %s5162_s19 = inlined_call_operand.hbm [shape: bf16[128,128], index: 19, kind: input, shape index: {}]   ;;  %s5163_s20 = inlined_call_operand.hbm [shape: bf16[128,128], index: 20, kind: input, shape index: {}]   ;;  %s5164_s21 = inlined_call_operand.hbm [shape: bf16[64,128], index: 21, kind: input, shape index: {}]   ;;  %s5165_s22 = inlined_call_operand.vmem [shape: f32[1,128], index: 22, kind: input, shape index: {}]   ;;  %s5166_s23 = inlined_call_operand.vmem [shape: f32[8,128], index: 23, kind: output, shape index: {}]  }
   0x1   :  { %5168 = sst [smem:[#allocation20_spill]] %s5143_s0 }
   0x2   :  { %5169 = sst [smem:[#allocation21_spill]] %s5144_s1 }
   0x3   :  { %5170 = sst [smem:[#allocation22_spill]] %s5145_s2 }
   0x4   :  { %5171 = sst [smem:[#allocation23_spill]] %s5146_s3 }
   0x5   :  { %5172 = sst [smem:[#allocation24_spill]] %s5147_s4 }
   0x6   :  { %5173 = sst [smem:[#allocation25_spill]] %s5148_s5 }
   0x7   :  { %5174 = sst [smem:[#allocation26_spill]] %s5149_s6 }
   0x8   :  { %5175 = sst [smem:[#allocation27_spill]] %s5150_s7 }
   0x9   :  { %5176 = sst [smem:[#allocation28_spill]] %s5165_s22 }
   0xa   :  { %5177 = sst [smem:[#allocation29_spill]] %s5166_s23 }
   0xb   :  { %28 = vsyncpa [#allocation3], 0 }
   0xc   :  { %29 = vsyncpa [#allocation5], 0 }
   0xd   :  { %30 = vsyncpa [#allocation8], 0 }
   0xe   :  { %31 = vsyncpa [#allocation11], 0 }
   0xf   :  { %32 = vsyncpa [#allocation14], 0  ;;  %s4592_s4 = smov [#allocation4]   ;;  %s4593_s24 = smov [#allocation7]  }
  0x10   :  { %s56_s30 = sshll.u32 %s4592_s4, 4  ;;  %s82_s25 = sshll.u32 %s4593_s24, 4  ;;  %s57_s30 = int_to_ptr.vmem [resolvable:$true] %s56_s30  ;;  %s83_s25 = int_to_ptr.vmem [resolvable:$true] %s82_s25 }
  0x11   :  { %s4430_s5 = scalar_lea.vmem %s57_s30, 1024  ;;  %p4435_p1 = scmp.lt.s32.totalorder %s57_s30, %s57_s30 }
  0x12   :  { %p4431_p0 = scmp.ne.s32.totalorder %s57_s30, %s4430_s5  ;;  %p4436_p2 = scmp.lt.s32.totalorder %s4430_s5, %s4430_s5 }
  0x14   :  { %p4437_p3 = por %p4436_p2, %p4435_p1 }
  0x16   :  { %p4438_p4 = pnand %p4437_p3, %p4431_p0 }
  0x18   :  { %4441 = shalt.err (!%p4438_p4)
}
  0x19   :  { %s4594_s1 = smov 256   ;;  %s4595_s26 = smov 16  }
  0x1a   :  { %s5178_s27 = sld [smem:[#allocation24_spill]]  ;;  %s4450_s7 = scalar_lea.vmem %s83_s25, 8192 }
  0x1b   :  { %p4451_p5 = scmp.ne.s32.totalorder %s83_s25, %s4450_s7  ;;  %p4455_p6 = scmp.lt.s32.totalorder %s83_s25, %s83_s25 }
  0x1c   :  { %p4456_p7 = scmp.lt.s32.totalorder %s4450_s7, %s4450_s7 }
  0x1e   :  { %p4457_p8 = por %p4456_p7, %p4455_p6 }
  0x20   :  { %62 = dma.hbm_to_vmem [thread:$0]  %s5178_s27, 1024, %s57_s30, [#allocation5], %s4594_s1, %s4594_s1, %s4595_s26  }
  0x21   :  { %p4458_p9 = pnand %p4457_p8, %p4451_p5 }
  0x23   :  { %4461 = shalt.err (!%p4458_p9)
}
  0x24   :  { %s4596_s28 = smov 128   ;;  %s4597_s29 = smov 8  }
  0x25   :  { %s5179_s4 = sld [smem:[#allocation27_spill]]  ;;  %s4598_s24 = smov [#allocation10]  }
  0x26   :  { %s126_s5 = sshll.u32 %s4598_s24, 4  ;;  %s4599_s23 = smov [#allocation2]   ;;  %s127_s5 = int_to_ptr.vmem [resolvable:$true] %s126_s5 }
  0x27   :  { %s42_s22 = sshll.u32 %s4599_s23, 4  ;;  %s4470_s30 = scalar_lea.vmem %s127_s5, 1024  ;;  %s43_s22 = int_to_ptr.vmem [resolvable:$true] %s42_s22 }
  0x28   :  { %p4471_p10 = scmp.ne.s32.totalorder %s127_s5, %s4470_s30  ;;  %p4475_p11 = scmp.lt.s32.totalorder %s127_s5, %s127_s5 }
  0x29   :  { %p4476_p12 = scmp.lt.s32.totalorder %s4470_s30, %s4470_s30 }
  0x2b   :  { %88 = dma.hbm_to_vmem [thread:$0]  %s5179_s4, 8192, %s83_s25, [#allocation8], %s4596_s28, %s4596_s28, %s4597_s29  }
  0x2c   :  { %p4477_p13 = por %p4476_p12, %p4475_p11 }
  0x2e   :  { %p4478_p0 = pnand %p4477_p13, %p4471_p10 }
  0x30   :  { %4481 = shalt.err (!%p4478_p0)
}
  0x31   :  { %s4600_s2 = smov 64   ;;  %s4601_s6 = smov 4  }
  0x32   :  { %132 = dma.hbm_to_vmem [thread:$0]  %s5162_s19, 1024, %s127_s5, [#allocation11], %s4600_s2, %s4600_s2, %s4601_s6  }
  0x33   :  { %s4490_s7 = scalar_lea.vmem %s43_s22, 1024  ;;  %p4495_p2 = scmp.lt.s32.totalorder %s43_s22, %s43_s22 }
  0x34   :  { %p4491_p1 = scmp.ne.s32.totalorder %s43_s22, %s4490_s7  ;;  %p4496_p3 = scmp.lt.s32.totalorder %s4490_s7, %s4490_s7 }
  0x36   :  { %p4497_p4 = por %p4496_p3, %p4495_p2 }
  0x38   :  { %p4498_p5 = pnand %p4497_p4, %p4491_p1 }
  0x3a   :  { %4501 = shalt.err (!%p4498_p5)
}
  0x3b   :  { %s5180_s29 = sld [smem:[#allocation22_spill]]  ;;  %s4602_s3 = smov [#allocation6]  }
  0x3c   :  { %s68_s0 = sshll.u32 %s4602_s3, 4  ;;  %s4603_s4 = smov [#allocation9]   ;;  %s69_s0 = int_to_ptr.vmem [resolvable:$true] %s68_s0 }
  0x3d   :  { %s104_s24 = sshll.u32 %s4603_s4, 4  ;;  %s4510_s19 = scalar_lea.vmem %s69_s0, 16384  ;;  %s105_s24 = int_to_ptr.vmem [resolvable:$true] %s104_s24 }
  0x3e   :  { %p4511_p6 = scmp.ne.s32.totalorder %s69_s0, %s4510_s19  ;;  %p4515_p7 = scmp.lt.s32.totalorder %s69_s0, %s69_s0 }
  0x3f   :  { %p4516_p8 = scmp.lt.s32.totalorder %s4510_s19, %s4510_s19 }
  0x41   :  { %48 = dma.hbm_to_vmem [thread:$0]  %s5180_s29, 1024, %s43_s22, [#allocation3], %s4594_s1, %s4594_s1, %s4595_s26  }
  0x42   :  { %p4517_p9 = por %p4516_p8, %p4515_p7 }
  0x44   :  { %p4518_p10 = pnand %p4517_p9, %p4511_p6 }
  0x46   :  { %4521 = shalt.err (!%p4518_p10)
}
  0x47   :  { %s5181_s27 = sld [smem:[#allocation25_spill]]  ;;  %s4530_s22 = scalar_lea.vmem %s105_s24, 1024 }
  0x48   :  { %p4531_p11 = scmp.ne.s32.totalorder %s105_s24, %s4530_s22  ;;  %p4535_p12 = scmp.lt.s32.totalorder %s105_s24, %s105_s24 }
  0x49   :  { %p4536_p13 = scmp.lt.s32.totalorder %s4530_s22, %s4530_s22 }
  0x4b   :  { %p4537_p0 = por %p4536_p13, %p4535_p12 }
  0x4d   :  { %74 = dma.hbm_to_vmem [thread:$0]  %s5181_s27, 16384, %s69_s0, [#allocation5], %s4594_s1, %s4594_s1, %s4595_s26  }
  0x4e   :  { %p4538_p1 = pnand %p4537_p0, %p4531_p11 }
  0x50   :  { %4541 = shalt.err (!%p4538_p1)
}
  0x51   :  { %110 = dma.hbm_to_vmem [thread:$0]  %s5156_s13, 1024, %s105_s24, [#allocation8], %s4600_s2, %s4600_s2, %s4601_s6  }
  0x52   :  { %s4604_s23 = smov [#allocation12]   ;;  %s4605_s29 = smov [#allocation13]  }
  0x53   :  { %s138_s28 = sshll.u32 %s4604_s23, 4  ;;  %s150_s3 = sshll.u32 %s4605_s29, 4  ;;  %s139_s28 = int_to_ptr.vmem [resolvable:$true] %s138_s28  ;;  %s151_s3 = int_to_ptr.vmem [resolvable:$true] %s150_s3 }
  0x54   :  { %s4550_s1 = scalar_lea.vmem %s139_s28, 1024  ;;  %p4555_p3 = scmp.lt.s32.totalorder %s139_s28, %s139_s28 }
  0x55   :  { %p4551_p2 = scmp.ne.s32.totalorder %s139_s28, %s4550_s1  ;;  %p4556_p4 = scmp.lt.s32.totalorder %s4550_s1, %s4550_s1 }
  0x57   :  { %p4557_p5 = por %p4556_p4, %p4555_p3 }
  0x59   :  { %p4558_p6 = pnand %p4557_p5, %p4551_p2 }
  0x5b   :  { %4561 = shalt.err (!%p4558_p6)
}
  0x5c   :  { %144 = dma.hbm_to_vmem [thread:$0]  %s5163_s20, 1024, %s139_s28, [#allocation11], %s4600_s2, %s4600_s2, %s4601_s6  }
  0x5d   :  { %s4570_s13 = scalar_lea.vmem %s151_s3, 512  ;;  %p4575_p8 = scmp.lt.s32.totalorder %s151_s3, %s151_s3 }
  0x5e   :  { %p4571_p7 = scmp.ne.s32.totalorder %s151_s3, %s4570_s13  ;;  %p4576_p9 = scmp.lt.s32.totalorder %s4570_s13, %s4570_s13 }
  0x60   :  { %p4577_p10 = por %p4576_p9, %p4575_p8 }
  0x62   :  { %p4578_p11 = pnand %p4577_p10, %p4571_p7 }
  0x64   :  { %4581 = shalt.err (!%p4578_p11)
}
  0x65   :  { %156 = dma.hbm_to_vmem [thread:$0]  %s5164_s21, 512, %s151_s3, [#allocation14], %s4600_s2, %s4600_s2, %s4601_s6  }
  0x66   :  { %4582 = dma.done.wait [#allocation3], 1024  }
  0x67   :  { %4583 = vsyncadd [#allocation3], 4294966272 }
  0x68   :  { %4584 = dma.done.wait [#allocation5], 17408  }
  0x69   :  { %4585 = vsyncadd [#allocation5], 4294949888 }
  0x6a   :  { %4586 = dma.done.wait [#allocation8], 9216  }
  0x6b   :  { %4587 = vsyncadd [#allocation8], 4294958080 }
  0x6c   :  { %4588 = dma.done.wait [#allocation11], 2048  }
  0x6d   :  { %4589 = vsyncadd [#allocation11], 4294965248 }
  0x6e   :  { %4590 = dma.done.wait [#allocation14], 512  }
  0x6f   :  { %4591 = vsyncadd [#allocation14], 4294966784  ;;  %v4606_v0 = vmov 0   ;;  %v4607_v1 = vmov 0.0   ;;  %v4002_v2 = vld [vmem:[#allocation2 + $0x24] ss:$16 sps:$4 sm:$0xff]   ;;  %v200_v13 = vlaneseq }
  0x70   :  { %296 = vmatprep.mubr.bf16.mxu1 %v4606_v0  ;;  %3845 = vmatprep.subr.bf16.mxu0 %v4607_v1  ;;  %v4004_v3 = vld [vmem:[#allocation2 + $0x20] ss:$16 sps:$4 sm:$0xff]   ;;  %v4005_v4 = vld [vmem:[#allocation2 + $0x4] ss:$16 sps:$4 sm:$0xff]   ;;  %s5182_s2 = sld [smem:[#allocation20_spill]]  ;;  %vm260_vm0 = vcmask 261120  }
  0x71   :  { %276 = vmatprep.subr.bf16.mxu1 %v4002_v2  ;;  %v4007_v5 = vld [vmem:[#allocation2] ss:$16 sps:$4 sm:$0xff]   ;;  %v4010_v7 = vld [vmem:[#allocation2 + $0x2c] ss:$16 sps:$4 sm:$0xff]   ;;  %v4008_v8 = vld [vmem:[#allocation2 + $0x28] ss:$16 sps:$4 sm:$0xff]  }
  0x72   :  { %277 = vmatpush1.bf16.msra.mxu1 %v4004_v3  ;;  %s5183_s5 = sld [smem:[#allocation21_spill]]  ;;  %v4013_v11 = vld [vmem:[#allocation2 + $0xc] ss:$16 sps:$4 sm:$0xff]   ;;  %v4011_v12 = vld [vmem:[#allocation2 + $0x8] ss:$16 sps:$4 sm:$0xff]   ;;  %vm4608_vm1 = vmmov 0  }
  0x73   :  { %278 = vmatprep.subr.bf16.mxu1 %v4005_v4  ;;  %3847 = vmatprep.mubr.msk.bf16.mxu0 %vm4608_vm1, %v4607_v1  ;;  %v4796_v14 = vshrl.u32 %v200_v13, 7  ;;  %s5184_s22 = sld [smem:[#allocation23_spill]]  ;;  %vm390_vm2 = vcmask 64512   ;;  %vm406_vm3 = vcmask 1043456   ;;  %vm3337_vm4 = vcmask 523264  }
  0x74   :  { %s5185_s20 = sld [smem:[#allocation26_spill]] }
  0x75   :  { %v4799_v15 = vsub.s32 0, %v4796_v14  ;;  %v4806_v18 = vsub.s32 1, %v4796_v14  ;;  %v210_v26 = vsub.s32 2, %v4796_v14  ;;  %v214_v37 = vsub.s32 3, %v4796_v14  ;;  %v4322_v14 = vld [vmem:[%s5154_s11 + $0x70] sm:$0xff]  }
  0x76   :  { %v184_v6 = vld [vmem:[%s5182_s2] sm:$0xff]  ;;  %279 = vmatpush1.bf16.msra.mxu1 %v4007_v5  ;;  %s5186_s2 = sld [smem:[#allocation28_spill]] }
  0x77   :  { %v4782_v10 = vpack.c.bf16 %v184_v6, %v184_v6  ;;  %317 = vmatprep.subr.bf16.mxu1 %v4010_v7 }
  0x78   :  { %v186_v9 = vld [vmem:[%s5183_s5] sm:$0xff]  ;;  %v187_v33 = vld [vmem:[%s5183_s5 + $0x8] sm:$0xff] }
  0x79   :  { %3846 = vmatpush3.bf16.xpose.msra.mxu0 %v186_v9  ;;  %3418 = vmatmul.mubr.msk.bf16.vlgmr.msra.gmra.mxu1 %vm260_vm0, %v4782_v10  ;;  %v198_v16 = vld [vmem:[%s5184_s22] sm:$0xf]  ;;  %v3421_v21 = vcombine.high %v186_v9, %v186_v9  ;;  %v3425_v39 = vcombine.high %v187_v33, %v187_v33 }
  0x7a   :  { %3857 = vmatprep.subr.bf16.mxu0 %v4607_v1  ;;  %318 = vmatpush1.bf16.msra.mxu1 %v4008_v8  ;;  %v203_v17 = vrot.slane %v198_v16, %v4799_v15  ;;  %v207_v24 = vrot.slane %v198_v16, %v4806_v18  ;;  %v211_v30 = vrot.slane %v198_v16, %v210_v26 }
  0x7b   :  { %337 = vmatprep.mubr.bf16.mxu1 %v4606_v0  ;;  %319 = vmatprep.subr.bf16.mxu1 %v4013_v11  ;;  %v215_v40 = vrot.slane %v198_v16, %v214_v37 }
  0x7e   :  { %320 = vmatpush1.bf16.msra.mxu1 %v4011_v12 }
  0x7f   :  { %3851 = vmatprep.subr.bf16.mxu1 %v4607_v1 }
  0x81   :  { %3419 = vmatmul.mubr.msk.bf16.vlgmr.msra.gmra.mxu1 %vm260_vm0, %v4782_v10 }
  0x82   :  { %3853 = vmatprep.mubr.msk.bf16.mxu1 %vm4608_vm1, %v4607_v1 }
 0x139   :  { %v298_v19 = vpop.f32.mrf.mxu1 }
 0x13a   :  { %v299_v20 = vadd.f32 %v298_v19, %v203_v17 }
 0x13b   :  { %v300_v22 = vpop.f32.mrf.mxu1 }
 0x13c   :  { %v346_v23 = vpack.c.bf16 %v299_v20, %v299_v20  ;;  %v301_v28 = vadd.f32 %v300_v22, %v207_v24  ;;  %v188_v24 = vld [vmem:[%s5183_s5 + $0x10] sm:$0xff] }
 0x13d   :  { %v302_v25 = vpop.f32.mrf.mxu1 }
 0x13e   :  { %3848 = vmatmul.mubr.bf16.vlgmr.msra.gmra.mxu0 %v346_v23  ;;  %v347_v32 = vpack.c.bf16 %v301_v28, %v301_v28  ;;  %v408_v25 = vsel %vm406_vm3, %v188_v24, 0 }
 0x13f   :  { %v303_v27 = vpop.f32.mrf.mxu1  ;;  %3858 = vmatpush3.bf16.xpose.msra.mxu0 %v3421_v21  ;;  %3859 = vmatprep.mubr.msk.bf16.mxu0 %vm4608_vm1, %v4607_v1 }
 0x140   :  { %3869 = vmatprep.subr.bf16.mxu0 %v4607_v1  ;;  %3852 = vmatpush3.bf16.msra.mxu1 %v408_v25 }
 0x141   :  { %v339_v29 = vpop.f32.mrf.mxu1  ;;  %3863 = vmatprep.subr.bf16.mxu1 %v4607_v1 }
 0x142   :  { %v340_v35 = vadd.f32 %v339_v29, %v211_v30  ;;  %v3422_v29 = vcombine.high %v188_v24, %v188_v24  ;;  %v4033_v24 = vld [vmem:[#allocation6 + $0x2e0] ss:$16 sps:$4 sm:$0xff]  }
 0x143   :  { %v341_v31 = vpop.f32.mrf.mxu1 }
 0x144   :  { %v348_v38 = vpack.c.bf16 %v340_v35, %v340_v35  ;;  %v342_v41 = vadd.f32 %v341_v31, %v215_v40  ;;  %v4852_v30 = vsel %vm406_vm3, %v3422_v29, 0  ;;  %v4018_v31 = vld [vmem:[#allocation6 + $0xe0] ss:$16 sps:$4 sm:$0xff]   ;;  %v4026_v35 = vld [vmem:[#allocation6 + $0xa4] ss:$16 sps:$4 sm:$0xff]  }
 0x145   :  { %v343_v34 = vpop.f32.mrf.mxu1  ;;  %v4032_v40 = vld [vmem:[#allocation6 + $0x64] ss:$16 sps:$4 sm:$0xff]  }
 0x146   :  { %3860 = vmatmul.mubr.bf16.vlgmr.msra.gmra.mxu0 %v347_v32  ;;  %v349_v42 = vpack.c.bf16 %v342_v41, %v342_v41  ;;  %v4020_v32 = vld [vmem:[#allocation6 + $0xe4] ss:$16 sps:$4 sm:$0xff]   ;;  %v4021_v34 = vld [vmem:[#allocation6 + $0xc0] ss:$16 sps:$4 sm:$0xff]  }
 0x147   :  { %3870 = vmatpush3.bf16.xpose.msra.mxu0 %v187_v33  ;;  %v344_v36 = vpop.f32.mrf.mxu1  ;;  %3871 = vmatprep.mubr.msk.bf16.mxu0 %vm4608_vm1, %v4607_v1  ;;  %v4023_v33 = vld [vmem:[#allocation6 + $0xc4] ss:$16 sps:$4 sm:$0xff]   ;;  %v4030_v41 = vld [vmem:[#allocation6 + $0x60] ss:$16 sps:$4 sm:$0xff]  }
 0x148   :  { %3881 = vmatprep.subr.bf16.mxu0 %v4607_v1  ;;  %v4024_v36 = vld [vmem:[#allocation6 + $0xa0] ss:$16 sps:$4 sm:$0xff]   ;;  %v4047_v29 = vld [vmem:[#allocation6 + $0x2a4] ss:$16 sps:$4 sm:$0xff]  }
 0x14e   :  { %3872 = vmatmul.mubr.bf16.vlgmr.msra.gmra.mxu0 %v348_v38  ;;  %v4029_v38 = vld [vmem:[#allocation6 + $0x84] ss:$16 sps:$4 sm:$0xff]  }
 0x14f   :  { %3882 = vmatpush3.bf16.xpose.msra.mxu0 %v3425_v39  ;;  %3883 = vmatprep.mubr.msk.bf16.mxu0 %vm4608_vm1, %v4607_v1  ;;  %v4027_v39 = vld [vmem:[#allocation6 + $0x80] ss:$16 sps:$4 sm:$0xff]  }
 0x150   :  { %1538 = vmatprep.subr.bf16.mxu0 %v4020_v32  ;;  %v4051_v32 = vld [vmem:[#allocation6 + $0x280] ss:$16 sps:$4 sm:$0xff]  }
 0x156   :  { %3884 = vmatmul.mubr.bf16.vlgmr.msra.gmra.mxu0 %v349_v42  ;;  %v4038_v42 = vld [vmem:[#allocation6 + $0x44] ss:$16 sps:$4 sm:$0xff]  }
 0x157   :  { %1539 = vmatpush1.bf16.msra.mxu0 %v4018_v31  ;;  %v4053_v31 = vld [vmem:[#allocation6 + $0x284] ss:$16 sps:$4 sm:$0xff]  }
 0x158   :  { %1540 = vmatprep.subr.bf16.mxu0 %v4023_v33  ;;  %v4059_v33 = vld [vmem:[#allocation6 + $0x264] ss:$16 sps:$4 sm:$0xff]  }
 0x15b   :  { %1541 = vmatpush1.bf16.msra.mxu0 %v4021_v34  ;;  %v4057_v34 = vld [vmem:[#allocation6 + $0x260] ss:$16 sps:$4 sm:$0xff]  }
 0x15c   :  { %1542 = vmatprep.subr.bf16.mxu0 %v4026_v35  ;;  %v4063_v35 = vld [vmem:[#allocation6 + $0x240] ss:$16 sps:$4 sm:$0xff]  }
 0x15f   :  { %1543 = vmatpush1.bf16.msra.mxu0 %v4024_v36  ;;  %v4071_v36 = vld [vmem:[#allocation6 + $0x224] ss:$16 sps:$4 sm:$0xff]  }
 0x160   :  { %1544 = vmatprep.subr.bf16.mxu0 %v4029_v38  ;;  %v4069_v38 = vld [vmem:[#allocation6 + $0x220] ss:$16 sps:$4 sm:$0xff]  }
 0x163   :  { %1545 = vmatpush1.bf16.msra.mxu0 %v4027_v39  ;;  %v4077_v39 = vld [vmem:[#allocation6 + $0x204] ss:$16 sps:$4 sm:$0xff]  }
 0x164   :  { %1546 = vmatprep.subr.bf16.mxu0 %v4032_v40  ;;  %v4075_v40 = vld [vmem:[#allocation6 + $0x200] ss:$16 sps:$4 sm:$0xff]  }
 0x167   :  { %1547 = vmatpush1.bf16.msra.mxu0 %v4030_v41  ;;  %v4083_v41 = vld [vmem:[#allocation6 + $0x3e4] ss:$16 sps:$4 sm:$0xff]  }
 0x168   :  { %1548 = vmatprep.subr.bf16.mxu0 %v4038_v42  ;;  %v4081_v42 = vld [vmem:[#allocation6 + $0x3e0] ss:$16 sps:$4 sm:$0xff]  }
 0x1fe   :  { %v384_v43 = vpop.f32.mrf.mxu0 }
 0x1ff   :  { %v391_v44 = vsel %vm390_vm2, %v384_v43, -inf }
 0x200   :  { %392 = vmax.xlane.f32.xlu0 %v391_v44  ;;  %v3849_v45 = vpop.f32.mrf.mxu0  ;;  %v4044_v44 = vld [vmem:[#allocation6 + $0x24] ss:$16 sps:$4 sm:$0xff]  }
 0x201   :  { %v4042_v45 = vld [vmem:[#allocation6 + $0x20] ss:$16 sps:$4 sm:$0xff]  }
 0x202   :  { %v387_v46 = vpop.f32.mrf.mxu0 }
 0x203   :  { %v4050_v46 = vld [vmem:[#allocation6 + $0x4] ss:$16 sps:$4 sm:$0xff]  }
 0x204   :  { %v3850_v47 = vpop.f32.mrf.mxu0 }
 0x205   :  { %v4048_v47 = vld [vmem:[#allocation6] ss:$16 sps:$4 sm:$0xff]  }
 0x206   :  { %v488_v48 = vpop.f32.mrf.mxu0 }
 0x207   :  { %v494_v49 = vsel %vm390_vm2, %v488_v48, -inf }
 0x208   :  { %495 = vmax.xlane.f32.xlu0 %v494_v49  ;;  %v3861_v50 = vpop.f32.mrf.mxu0  ;;  %v4054_v49 = vld [vmem:[#allocation6 + $0x1e0] ss:$16 sps:$4 sm:$0xff]  }
 0x209   :  { %v4062_v50 = vld [vmem:[#allocation6 + $0x1c4] ss:$16 sps:$4 sm:$0xff]  }
 0x20a   :  { %v491_v51 = vpop.f32.mrf.mxu0 }
 0x20b   :  { %v4060_v51 = vld [vmem:[#allocation6 + $0x1c0] ss:$16 sps:$4 sm:$0xff]  }
 0x20c   :  { %v3862_v52 = vpop.f32.mrf.mxu0 }
 0x20d   :  { %v4068_v52 = vld [vmem:[#allocation6 + $0x1a4] ss:$16 sps:$4 sm:$0xff]  }
 0x20e   :  { %v589_v53 = vpop.f32.mrf.mxu0 }
 0x20f   :  { %v595_v54 = vsel %vm390_vm2, %v589_v53, -inf }
 0x210   :  { %596 = vmax.xlane.f32.xlu1 %v595_v54  ;;  %v3873_v55 = vpop.f32.mrf.mxu0  ;;  %v4074_v54 = vld [vmem:[#allocation6 + $0x184] ss:$16 sps:$4 sm:$0xff]  }
 0x211   :  { %v4072_v55 = vld [vmem:[#allocation6 + $0x180] ss:$16 sps:$4 sm:$0xff]  }
 0x212   :  { %v592_v56 = vpop.f32.mrf.mxu0 }
 0x213   :  { %v4080_v56 = vld [vmem:[#allocation6 + $0x164] ss:$16 sps:$4 sm:$0xff]  }
 0x214   :  { %v3874_v57 = vpop.f32.mrf.mxu0 }
 0x215   :  { %v4078_v57 = vld [vmem:[#allocation6 + $0x160] ss:$16 sps:$4 sm:$0xff]  }
 0x216   :  { %v691_v58 = vpop.f32.mrf.mxu0 }
 0x217   :  { %v697_v59 = vsel %vm390_vm2, %v691_v58, -inf }
 0x218   :  { %698 = vmax.xlane.f32.xlu1 %v697_v59  ;;  %v3885_v60 = vpop.f32.mrf.mxu0  ;;  %v4084_v59 = vld [vmem:[#allocation6 + $0x140] ss:$16 sps:$4 sm:$0xff]  }
 0x21a   :  { %v694_v61 = vpop.f32.mrf.mxu0 }
 0x21c   :  { %v3886_v62 = vpop.f32.mrf.mxu0 }
 0x289   :  { %v393_v63 = vpop.xlane.xlu0 %392 }
 0x28a   :  { %v394_v2 = vsub.f32 %v384_v43, %v393_v63  ;;  %v4036_v43 = vld [vmem:[#allocation6 + $0x40] ss:$16 sps:$4 sm:$0xff]  }
 0x28b   :  { %1549 = vmatpush1.bf16.msra.mxu0 %v4036_v43  ;;  %v4089_v43 = vld [vmem:[#allocation6 + $0x3c4] ss:$16 sps:$4 sm:$0xff]  }
 0x28c   :  { %v395_v3 = vmul.f32 1.442695, %v394_v2  ;;  %1550 = vmatprep.subr.bf16.mxu0 %v4044_v44  ;;  %v4087_v44 = vld [vmem:[#allocation6 + $0x3c0] ss:$16 sps:$4 sm:$0xff]  }
 0x28e   :  { %4402 = vpow2.f32 %v395_v3 }
 0x28f   :  { %1551 = vmatpush1.bf16.msra.mxu0 %v4042_v45  ;;  %v4092_v45 = vld [vmem:[#allocation6 + $0x124] ss:$16 sps:$4 sm:$0xff]  }
 0x290   :  { %1552 = vmatprep.subr.bf16.mxu0 %v4050_v46  ;;  %v4095_v46 = vld [vmem:[#allocation6 + $0x3a4] ss:$16 sps:$4 sm:$0xff]  }
 0x291   :  { %v496_v4 = vpop.xlane.xlu0 %495 }
 0x292   :  { %v497_v5 = vsub.f32 %v488_v48, %v496_v4  ;;  %v4056_v48 = vld [vmem:[#allocation6 + $0x1e4] ss:$16 sps:$4 sm:$0xff]  }
 0x293   :  { %1553 = vmatpush1.bf16.msra.mxu0 %v4048_v47  ;;  %v4090_v47 = vld [vmem:[#allocation6 + $0x120] ss:$16 sps:$4 sm:$0xff]  }
 0x294   :  { %v498_v6 = vmul.f32 1.442695, %v497_v5  ;;  %1554 = vmatprep.subr.bf16.mxu0 %v4056_v48  ;;  %v189_v5 = vld [vmem:[%s5183_s5 + $0x18] sm:$0xff]  ;;  %v4093_v48 = vld [vmem:[#allocation6 + $0x3a0] ss:$16 sps:$4 sm:$0xff]  }
 0x296   :  { %4404 = vpow2.f32 %v498_v6 }
 0x297   :  { %1555 = vmatpush2.bf16.msra.mxu0 %v4054_v49  ;;  %v4098_v49 = vld [vmem:[#allocation6 + $0x104] ss:$16 sps:$4 sm:$0xff]  }
 0x298   :  { %1556 = vmatprep.subr.bf16.mxu0 %v4062_v50  ;;  %v4101_v50 = vld [vmem:[#allocation6 + $0x384] ss:$16 sps:$4 sm:$0xff]  }
 0x299   :  { %v597_v7 = vpop.xlane.xlu1 %596 }
 0x29a   :  { %v598_v8 = vsub.f32 %v589_v53, %v597_v7  ;;  %v4066_v53 = vld [vmem:[#allocation6 + $0x1a0] ss:$16 sps:$4 sm:$0xff]  }
 0x29b   :  { %v4830_v9 = vpop.eup %4402  ;;  %1557 = vmatpush2.bf16.msra.mxu0 %v4060_v51  ;;  %v4096_v51 = vld [vmem:[#allocation6 + $0x100] ss:$16 sps:$4 sm:$0xff]  }
 0x29c   :  { %v599_v11 = vmul.f32 1.442695, %v598_v8  ;;  %v397_v12 = vsel %vm390_vm2, %v4830_v9, 0.0  ;;  %1558 = vmatprep.subr.bf16.mxu0 %v4068_v52  ;;  %v4099_v52 = vld [vmem:[#allocation6 + $0x380] ss:$16 sps:$4 sm:$0xff]  }
 0x29d   :  { %398 = vadd.xlane.f32.xlu0 %v397_v12 }
 0x29e   :  { %4406 = vpow2.f32 %v599_v11  ;;  %v3426_v11 = vcombine.high %v189_v5, %v189_v5 }
 0x29f   :  { %1559 = vmatpush2.bf16.msra.mxu0 %v4066_v53  ;;  %v4104_v53 = vld [vmem:[#allocation6 + $0x364] ss:$16 sps:$4 sm:$0xff]  }
 0x2a0   :  { %1560 = vmatprep.subr.bf16.mxu0 %v4074_v54  ;;  %v4107_v54 = vld [vmem:[#allocation6 + $0xec] ss:$16 sps:$4 sm:$0xff]  }
 0x2a1   :  { %v699_v16 = vpop.xlane.xlu1 %698 }
 0x2a2   :  { %v700_v17 = vsub.f32 %v691_v58, %v699_v16  ;;  %v4086_v58 = vld [vmem:[#allocation6 + $0x144] ss:$16 sps:$4 sm:$0xff]  }
 0x2a3   :  { %v4834_v19 = vpop.eup %4404  ;;  %1561 = vmatpush2.bf16.msra.mxu0 %v4072_v55  ;;  %v4102_v55 = vld [vmem:[#allocation6 + $0x360] ss:$16 sps:$4 sm:$0xff]  }
 0x2a4   :  { %v701_v20 = vmul.f32 1.442695, %v700_v17  ;;  %v500_v21 = vsel %vm390_vm2, %v4834_v19, 0.0  ;;  %1562 = vmatprep.subr.bf16.mxu0 %v4080_v56  ;;  %v4108_v56 = vld [vmem:[#allocation6 + $0x340] ss:$16 sps:$4 sm:$0xff]  }
 0x2a5   :  { %501 = vadd.xlane.f32.xlu1 %v500_v21 }
 0x2a6   :  { %4408 = vpow2.f32 %v701_v20  ;;  %v4035_v20 = vld [vmem:[#allocation6 + $0x2e4] ss:$16 sps:$4 sm:$0xff]  }
 0x2a7   :  { %1563 = vmatpush2.bf16.msra.mxu0 %v4078_v57  ;;  %v4110_v57 = vld [vmem:[#allocation6 + $0x344] ss:$16 sps:$4 sm:$0xff]  }
 0x2a8   :  { %1564 = vmatprep.subr.bf16.mxu0 %v4086_v58  ;;  %v4114_v58 = vld [vmem:[#allocation6 + $0x320] ss:$16 sps:$4 sm:$0xff]  }
 0x2ab   :  { %v4838_v22 = vpop.eup %4406  ;;  %1565 = vmatpush2.bf16.msra.mxu0 %v4084_v59  ;;  %v4116_v59 = vld [vmem:[#allocation6 + $0x324] ss:$16 sps:$4 sm:$0xff]  }
 0x2ac   :  { %v601_v23 = vsel %vm390_vm2, %v4838_v22, 0.0  ;;  %1566 = vmatprep.subr.bf16.mxu0 %v4092_v45  ;;  %v4141_v45 = vld [vmem:[#allocation6 + $0x2a8] ss:$16 sps:$4 sm:$0xff]  }
 0x2ad   :  { %602 = vadd.xlane.f32.xlu0 %v601_v23 }
 0x2af   :  { %1567 = vmatpush2.bf16.msra.mxu0 %v4090_v47  ;;  %v4149_v47 = vld [vmem:[#allocation6 + $0x28c] ss:$16 sps:$4 sm:$0xff]  }
 0x2b0   :  { %1568 = vmatprep.subr.bf16.mxu0 %v4098_v49  ;;  %v4147_v49 = vld [vmem:[#allocation6 + $0x288] ss:$16 sps:$4 sm:$0xff]  }
 0x2b3   :  { %v4847_v27 = vpop.eup %4408  ;;  %1569 = vmatpush2.bf16.msra.mxu0 %v4096_v51  ;;  %v4155_v51 = vld [vmem:[#allocation6 + $0x26c] ss:$16 sps:$4 sm:$0xff]  }
 0x2b4   :  { %v703_v28 = vsel %vm390_vm2, %v4847_v27, 0.0  ;;  %1620 = vmatprep.subr.bf16.mxu0 %v4107_v54  ;;  %v4158_v54 = vld [vmem:[#allocation6 + $0x1cc] ss:$16 sps:$4 sm:$0xff]  }
 0x2b5   :  { %704 = vadd.xlane.f32.xlu1 %v703_v28  ;;  %v4041_v28 = vld [vmem:[#allocation6 + $0x2c4] ss:$16 sps:$4 sm:$0xff]  }
 0x326   :  { %v399_v60 = vpop.xlane.xlu0 %398 }
 0x327   :  { %4410 = vrcp.f32 %v399_v60  ;;  %v4120_v60 = vld [vmem:[#allocation6 + $0x300] ss:$16 sps:$4 sm:$0xff]  }
 0x32e   :  { %v502_v61 = vpop.xlane.xlu1 %501 }
 0x32f   :  { %4412 = vrcp.f32 %v502_v61  ;;  %v4122_v61 = vld [vmem:[#allocation6 + $0x304] ss:$16 sps:$4 sm:$0xff]  }
 0x334   :  { %v4411_v62 = vpop.eup %4410 }
 0x335   :  { %v401_v63 = vmul.f32 %v4411_v62, %v4830_v9  ;;  %v611_v9 = vsel %vm406_vm3, %v189_v5, 0  ;;  %v4131_v62 = vld [vmem:[#allocation6 + $0x2ec] ss:$16 sps:$4 sm:$0xff]  }
 0x336   :  { %v603_v2 = vpop.xlane.xlu0 %602 }
 0x337   :  { %4414 = vrcp.f32 %v603_v2  ;;  %v402_v3 = vpack.c.bf16 %v401_v63, %v401_v63 }
 0x339   :  { %3854 = vmatmul.mubr.msk.bf16.vlgmr.msra.gmra.mxu1 %vm390_vm2, %v402_v3 }
 0x33a   :  { %3864 = vmatpush3.bf16.msra.mxu1 %v4852_v30  ;;  %3865 = vmatprep.mubr.msk.bf16.mxu1 %vm4608_vm1, %v4607_v1  ;;  %v4045_v30 = vld [vmem:[#allocation6 + $0x2a0] ss:$16 sps:$4 sm:$0xff]  }
 0x33b   :  { %3875 = vmatprep.subr.bf16.mxu1 %v4607_v1 }
 0x33c   :  { %v4413_v4 = vpop.eup %4412 }
 0x33d   :  { %v504_v6 = vmul.f32 %v4413_v4, %v4834_v19  ;;  %v716_v19 = vsel %vm406_vm3, %v3426_v11, 0  ;;  %v4113_v11 = vld [vmem:[#allocation6 + $0xcc] ss:$16 sps:$4 sm:$0xff]  }
 0x33e   :  { %v705_v7 = vpop.xlane.xlu1 %704 }
 0x33f   :  { %4416 = vrcp.f32 %v705_v7  ;;  %v505_v8 = vpack.c.bf16 %v504_v6, %v504_v6  ;;  %v4105_v7 = vld [vmem:[#allocation6 + $0xe8] ss:$16 sps:$4 sm:$0xff]  }
 0x341   :  { %3866 = vmatmul.mubr.msk.bf16.vlgmr.msra.gmra.mxu1 %vm390_vm2, %v505_v8 }
 0x342   :  { %3876 = vmatpush3.bf16.msra.mxu1 %v611_v9  ;;  %3877 = vmatprep.mubr.msk.bf16.mxu1 %vm4608_vm1, %v4607_v1 }
 0x343   :  { %3887 = vmatprep.subr.bf16.mxu1 %v4607_v1 }
 0x344   :  { %v4415_v12 = vpop.eup %4414 }
 0x345   :  { %v605_v16 = vmul.f32 %v4415_v12, %v4838_v22  ;;  %v4039_v22 = vld [vmem:[#allocation6 + $0x2c0] ss:$16 sps:$4 sm:$0xff]  }
 0x347   :  { %v606_v17 = vpack.c.bf16 %v605_v16, %v605_v16  ;;  %v4111_v16 = vld [vmem:[#allocation6 + $0xc8] ss:$16 sps:$4 sm:$0xff]  }
 0x349   :  { %3878 = vmatmul.mubr.msk.bf16.vlgmr.msra.gmra.mxu1 %vm390_vm2, %v606_v17 }
 0x34a   :  { %3888 = vmatpush3.bf16.msra.mxu1 %v716_v19  ;;  %3889 = vmatprep.mubr.msk.bf16.mxu1 %vm4608_vm1, %v4607_v1  ;;  %v4119_v19 = vld [vmem:[#allocation6 + $0xac] ss:$16 sps:$4 sm:$0xff]  }
 0x34b   :  { %1579 = vmatprep.subr.bf16.mxu1 %v4035_v20 }
 0x34c   :  { %v4417_v21 = vpop.eup %4416 }
 0x34d   :  { %v707_v23 = vmul.f32 %v4417_v21, %v4847_v27  ;;  %v4065_v27 = vld [vmem:[#allocation6 + $0x244] ss:$16 sps:$4 sm:$0xff]   ;;  %v4117_v21 = vld [vmem:[#allocation6 + $0xa8] ss:$16 sps:$4 sm:$0xff]  }
 0x34f   :  { %v708_v25 = vpack.c.bf16 %v707_v23, %v707_v23 }
 0x351   :  { %3890 = vmatmul.mubr.msk.bf16.vlgmr.msra.gmra.mxu1 %vm390_vm2, %v708_v25 }
 0x352   :  { %1580 = vmatpush1.bf16.msra.mxu1 %v4033_v24  ;;  %v4125_v24 = vld [vmem:[#allocation6 + $0x8c] ss:$16 sps:$4 sm:$0xff]  }
 0x353   :  { %1581 = vmatprep.subr.bf16.mxu1 %v4041_v28  ;;  %v4123_v28 = vld [vmem:[#allocation6 + $0x88] ss:$16 sps:$4 sm:$0xff]  }
 0x356   :  { %1582 = vmatpush1.bf16.msra.mxu1 %v4039_v22 }
 0x357   :  { %1583 = vmatprep.subr.bf16.mxu1 %v4047_v29  ;;  %v4128_v29 = vld [vmem:[#allocation6 + $0x6c] ss:$16 sps:$4 sm:$0xff]  }
 0x35a   :  { %1584 = vmatpush1.bf16.msra.mxu1 %v4045_v30 }
 0x35b   :  { %1585 = vmatprep.subr.bf16.mxu1 %v4053_v31 }
 0x35e   :  { %1586 = vmatpush1.bf16.msra.mxu1 %v4051_v32  ;;  %v4126_v32 = vld [vmem:[#allocation6 + $0x68] ss:$16 sps:$4 sm:$0xff]  }
 0x35f   :  { %1587 = vmatprep.subr.bf16.mxu1 %v4059_v33  ;;  %v4129_v33 = vld [vmem:[#allocation6 + $0x2e8] ss:$16 sps:$4 sm:$0xff]  }
 0x362   :  { %1588 = vmatpush1.bf16.msra.mxu1 %v4057_v34 }
 0x363   :  { %1589 = vmatprep.subr.bf16.mxu1 %v4065_v27 }
 0x366   :  { %1590 = vmatpush1.bf16.msra.mxu1 %v4063_v35  ;;  %v4134_v35 = vld [vmem:[#allocation6 + $0x4c] ss:$16 sps:$4 sm:$0xff]  }
 0x367   :  { %1591 = vmatprep.subr.bf16.mxu1 %v4071_v36  ;;  %v4137_v36 = vld [vmem:[#allocation6 + $0x2cc] ss:$16 sps:$4 sm:$0xff]  }
 0x36a   :  { %1592 = vmatpush1.bf16.msra.mxu1 %v4069_v38 }
 0x36b   :  { %1593 = vmatprep.subr.bf16.mxu1 %v4077_v39  ;;  %v4132_v39 = vld [vmem:[#allocation6 + $0x48] ss:$16 sps:$4 sm:$0xff]  }
 0x36e   :  { %1594 = vmatpush1.bf16.msra.mxu1 %v4075_v40  ;;  %v4135_v40 = vld [vmem:[#allocation6 + $0x2c8] ss:$16 sps:$4 sm:$0xff]  }
 0x36f   :  { %1595 = vmatprep.subr.bf16.mxu1 %v4083_v41 }
 0x372   :  { %1596 = vmatpush2.bf16.msra.mxu1 %v4081_v42  ;;  %v4140_v42 = vld [vmem:[#allocation6 + $0x2c] ss:$16 sps:$4 sm:$0xff]  }
 0x373   :  { %1597 = vmatprep.subr.bf16.mxu1 %v4089_v43  ;;  %v4143_v43 = vld [vmem:[#allocation6 + $0x2ac] ss:$16 sps:$4 sm:$0xff]  }
 0x376   :  { %1598 = vmatpush2.bf16.msra.mxu1 %v4087_v44  ;;  %v4138_v44 = vld [vmem:[#allocation6 + $0x28] ss:$16 sps:$4 sm:$0xff]  }
 0x377   :  { %1599 = vmatprep.subr.bf16.mxu1 %v4095_v46  ;;  %v4146_v46 = vld [vmem:[#allocation6 + $0xc] ss:$16 sps:$4 sm:$0xff]  }
 0x37a   :  { %1600 = vmatpush2.bf16.msra.mxu1 %v4093_v48  ;;  %v4144_v48 = vld [vmem:[#allocation6 + $0x8] ss:$16 sps:$4 sm:$0xff]  }
 0x37b   :  { %1601 = vmatprep.subr.bf16.mxu1 %v4101_v50  ;;  %v4152_v50 = vld [vmem:[#allocation6 + $0x1ec] ss:$16 sps:$4 sm:$0xff]  }
 0x37e   :  { %1602 = vmatpush2.bf16.msra.mxu1 %v4099_v52  ;;  %v4150_v52 = vld [vmem:[#allocation6 + $0x1e8] ss:$16 sps:$4 sm:$0xff]  }
 0x37f   :  { %1603 = vmatprep.subr.bf16.mxu1 %v4104_v53  ;;  %v4153_v53 = vld [vmem:[#allocation6 + $0x268] ss:$16 sps:$4 sm:$0xff]  }
 0x382   :  { %1604 = vmatpush2.bf16.msra.mxu1 %v4102_v55  ;;  %v4161_v55 = vld [vmem:[#allocation6 + $0x24c] ss:$16 sps:$4 sm:$0xff]  }
 0x383   :  { %1605 = vmatprep.subr.bf16.mxu1 %v4110_v57  ;;  %v4159_v57 = vld [vmem:[#allocation6 + $0x248] ss:$16 sps:$4 sm:$0xff]  }
 0x386   :  { %1606 = vmatpush2.bf16.msra.mxu1 %v4108_v56  ;;  %v4156_v56 = vld [vmem:[#allocation6 + $0x1c8] ss:$16 sps:$4 sm:$0xff]  }
 0x387   :  { %1607 = vmatprep.subr.bf16.mxu1 %v4116_v59  ;;  %v4167_v59 = vld [vmem:[#allocation6 + $0x22c] ss:$16 sps:$4 sm:$0xff]  }
 0x38a   :  { %1608 = vmatpush2.bf16.msra.mxu1 %v4114_v58  ;;  %v4164_v58 = vld [vmem:[#allocation6 + $0x1ac] ss:$16 sps:$4 sm:$0xff]  }
 0x38b   :  { %1609 = vmatprep.subr.bf16.mxu1 %v4122_v61  ;;  %v4165_v61 = vld [vmem:[#allocation6 + $0x228] ss:$16 sps:$4 sm:$0xff]  }
 0x38e   :  { %1610 = vmatpush2.bf16.msra.mxu1 %v4120_v60  ;;  %v4162_v60 = vld [vmem:[#allocation6 + $0x1a8] ss:$16 sps:$4 sm:$0xff]  }
 0x38f   :  { %1661 = vmatprep.subr.bf16.mxu1 %v4131_v62  ;;  %v4170_v62 = vld [vmem:[#allocation6 + $0x18c] ss:$16 sps:$4 sm:$0xff]  }
 0x3f9   :  { %v444_v63 = vpop.f32.mrf.mxu1 }
 0x3fa   :  { %v4876_v8 = vpack.c.bf16 %v444_v63, %v444_v63  ;;  %v4173_v63 = vld [vmem:[#allocation6 + $0x20c] ss:$16 sps:$4 sm:$0xff]  }
 0x3fb   :  { %v3855_v2 = vpop.f32.mrf.mxu1 }
 0x3fc   :  { %v4168_v2 = vld [vmem:[#allocation6 + $0x188] ss:$16 sps:$4 sm:$0xff]  }
 0x3fd   :  { %v447_v3 = vpop.f32.mrf.mxu1 }
 0x3fe   :  { %v4171_v3 = vld [vmem:[#allocation6 + $0x208] ss:$16 sps:$4 sm:$0xff]  }
 0x3ff   :  { %v3856_v4 = vpop.f32.mrf.mxu1 }
 0x400   :  { %v4176_v4 = vld [vmem:[#allocation6 + $0x16c] ss:$16 sps:$4 sm:$0xff]  }
 0x401   :  { %v549_v5 = vpop.f32.mrf.mxu1 }
 0x402   :  { %v759_v6 = vpack.c.bf16 %v549_v5, %v549_v5  ;;  %v4179_v5 = vld [vmem:[#allocation6 + $0x3ec] ss:$16 sps:$4 sm:$0xff]  }
 0x403   :  { %v3867_v9 = vpop.f32.mrf.mxu1 }
 0x404   :  { %1570 = vmatprep.mubr.bf16.mxu0 %v759_v6  ;;  %v4182_v9 = vld [vmem:[#allocation6 + $0x14c] ss:$16 sps:$4 sm:$0xff]  }
 0x405   :  { %v552_v12 = vpop.f32.mrf.mxu1  ;;  %1571 = vmatmul.mubr.bf16.vlgmr.msra.gmra.mxu0 %v4876_v8 }
 0x406   :  { %1621 = vmatpush1.bf16.msra.mxu0 %v4105_v7  ;;  %1652 = vmatprep.mubr.bf16.mxu0 %v759_v6  ;;  %v4174_v6 = vld [vmem:[#allocation6 + $0x168] ss:$16 sps:$4 sm:$0xff]  }
 0x407   :  { %v3868_v17 = vpop.f32.mrf.mxu1  ;;  %1622 = vmatprep.subr.bf16.mxu0 %v4113_v11  ;;  %v4177_v7 = vld [vmem:[#allocation6 + $0x3e8] ss:$16 sps:$4 sm:$0xff]   ;;  %v4185_v11 = vld [vmem:[#allocation6 + $0x3cc] ss:$16 sps:$4 sm:$0xff]  }
 0x408   :  { %v4180_v12 = vld [vmem:[#allocation6 + $0x148] ss:$16 sps:$4 sm:$0xff]   ;;  %v4188_v17 = vld [vmem:[#allocation6 + $0x12c] ss:$16 sps:$4 sm:$0xff]  }
 0x409   :  { %v647_v20 = vpop.f32.mrf.mxu1 }
 0x40a   :  { %1623 = vmatpush1.bf16.msra.mxu0 %v4111_v16  ;;  %v4879_v34 = vpack.c.bf16 %v647_v20, %v647_v20  ;;  %v4183_v16 = vld [vmem:[#allocation6 + $0x3c8] ss:$16 sps:$4 sm:$0xff]  }
 0x40b   :  { %v3879_v23 = vpop.f32.mrf.mxu1  ;;  %1624 = vmatprep.subr.bf16.mxu0 %v4119_v19  ;;  %v4191_v19 = vld [vmem:[#allocation6 + $0x3ac] ss:$16 sps:$4 sm:$0xff]   ;;  %v4186_v20 = vld [vmem:[#allocation6 + $0x128] ss:$16 sps:$4 sm:$0xff]  }
 0x40c   :  { %v4194_v23 = vld [vmem:[#allocation6 + $0x10c] ss:$16 sps:$4 sm:$0xff]  }
 0x40d   :  { %v650_v25 = vpop.f32.mrf.mxu1 }
 0x40e   :  { %1625 = vmatpush1.bf16.msra.mxu0 %v4117_v21  ;;  %v4189_v21 = vld [vmem:[#allocation6 + $0x3a8] ss:$16 sps:$4 sm:$0xff]  }
 0x40f   :  { %v3880_v22 = vpop.f32.mrf.mxu1  ;;  %1626 = vmatprep.subr.bf16.mxu0 %v4125_v24  ;;  %v4197_v24 = vld [vmem:[#allocation6 + $0x38c] ss:$16 sps:$4 sm:$0xff]   ;;  %v4192_v25 = vld [vmem:[#allocation6 + $0x108] ss:$16 sps:$4 sm:$0xff]  }
 0x410   :  { %v4200_v22 = vld [vmem:[#allocation6 + $0x36c] ss:$16 sps:$4 sm:$0xff]  }
 0x411   :  { %v752_v30 = vpop.f32.mrf.mxu1 }
 0x412   :  { %v761_v31 = vpack.c.bf16 %v752_v30, %v752_v30  ;;  %1627 = vmatpush1.bf16.msra.mxu0 %v4123_v28  ;;  %v4195_v28 = vld [vmem:[#allocation6 + $0x388] ss:$16 sps:$4 sm:$0xff]  }
 0x413   :  { %v3891_v27 = vpop.f32.mrf.mxu1  ;;  %1628 = vmatprep.subr.bf16.mxu0 %v4128_v29  ;;  %v4203_v29 = vld [vmem:[#allocation4 + $0x24] ss:$16 sps:$4 sm:$0xff]   ;;  %v4198_v30 = vld [vmem:[#allocation6 + $0x368] ss:$16 sps:$4 sm:$0xff]  }
 0x414   :  { %1611 = vmatprep.mubr.bf16.mxu1 %v761_v31  ;;  %v4204_v27 = vld [vmem:[#allocation6 + $0x348] ss:$16 sps:$4 sm:$0xff]  }
 0x415   :  { %v755_v38 = vpop.f32.mrf.mxu1  ;;  %1612 = vmatmul.mubr.bf16.vlgmr.msra.gmra.mxu1 %v4879_v34 }
 0x416   :  { %1629 = vmatpush1.bf16.msra.mxu0 %v4126_v32  ;;  %1662 = vmatpush1.bf16.msra.mxu1 %v4129_v33  ;;  %v4206_v32 = vld [vmem:[#allocation6 + $0x34c] ss:$16 sps:$4 sm:$0xff]   ;;  %v4209_v33 = vld [vmem:[#allocation4 + $0x4] ss:$16 sps:$4 sm:$0xff]   ;;  %v4210_v38 = vld [vmem:[#allocation6 + $0x328] ss:$16 sps:$4 sm:$0xff]  }
 0x417   :  { %1693 = vmatprep.mubr.bf16.mxu1 %v761_v31  ;;  %v3892_v41 = vpop.f32.mrf.mxu1  ;;  %1630 = vmatprep.subr.bf16.mxu0 %v4134_v35  ;;  %v4201_v31 = vld [vmem:[#allocation4 + $0x20] ss:$16 sps:$4 sm:$0xff]  }
 0x418   :  { %1663 = vmatprep.subr.bf16.mxu1 %v4137_v36  ;;  %v4207_v35 = vld [vmem:[#allocation4] ss:$16 sps:$4 sm:$0xff]   ;;  %v4212_v36 = vld [vmem:[#allocation6 + $0x32c] ss:$16 sps:$4 sm:$0xff]   ;;  %v4216_v41 = vld [vmem:[#allocation4 + $0x28] ss:$16 sps:$4 sm:$0xff]  }
 0x41a   :  { %1631 = vmatpush1.bf16.msra.mxu0 %v4132_v39  ;;  %1664 = vmatpush1.bf16.msra.mxu1 %v4135_v40  ;;  %v4215_v39 = vld [vmem:[#allocation6 + $0x30c] ss:$16 sps:$4 sm:$0xff]   ;;  %v4213_v40 = vld [vmem:[#allocation6 + $0x308] ss:$16 sps:$4 sm:$0xff]  }
 0x41b   :  { %1632 = vmatprep.subr.bf16.mxu0 %v4140_v42  ;;  %1665 = vmatprep.subr.bf16.mxu1 %v4143_v43  ;;  %v4221_v42 = vld [vmem:[#allocation4 + $0xc] ss:$16 sps:$4 sm:$0xff]   ;;  %v4219_v43 = vld [vmem:[#allocation4 + $0x8] ss:$16 sps:$4 sm:$0xff]  }
 0x41e   :  { %1633 = vmatpush1.bf16.msra.mxu0 %v4138_v44  ;;  %1666 = vmatpush1.bf16.msra.mxu1 %v4141_v45  ;;  %v4224_v44 = vld [vmem:[#allocation7 + $0x74] ss:$8 sps:$4 sm:$0xff]   ;;  %v4222_v45 = vld [vmem:[#allocation7 + $0x70] ss:$8 sps:$4 sm:$0xff]  }
 0x41f   :  { %1634 = vmatprep.subr.bf16.mxu0 %v4146_v46  ;;  %1667 = vmatprep.subr.bf16.mxu1 %v4149_v47  ;;  %v4225_v46 = vld [vmem:[#allocation7 + $0x60] ss:$8 sps:$4 sm:$0xff]   ;;  %v4227_v47 = vld [vmem:[#allocation7 + $0x64] ss:$8 sps:$4 sm:$0xff]  }
 0x422   :  { %1635 = vmatpush1.bf16.msra.mxu0 %v4144_v48  ;;  %1668 = vmatpush1.bf16.msra.mxu1 %v4147_v49  ;;  %v4230_v48 = vld [vmem:[#allocation7 + $0x54] ss:$8 sps:$4 sm:$0xff]   ;;  %v4237_v49 = vld [vmem:[#allocation7 + $0x170] ss:$8 sps:$4 sm:$0xff]  }
 0x423   :  { %1636 = vmatprep.subr.bf16.mxu0 %v4152_v50  ;;  %1669 = vmatprep.subr.bf16.mxu1 %v4155_v51  ;;  %v4239_v50 = vld [vmem:[#allocation7 + $0x174] ss:$8 sps:$4 sm:$0xff]   ;;  %v4233_v51 = vld [vmem:[#allocation7 + $0x44] ss:$8 sps:$4 sm:$0xff]  }
 0x426   :  { %1637 = vmatpush2.bf16.msra.mxu0 %v4150_v52  ;;  %1670 = vmatpush1.bf16.msra.mxu1 %v4153_v53  ;;  %v4243_v52 = vld [vmem:[#allocation7 + $0x160] ss:$8 sps:$4 sm:$0xff]  }
 0x427   :  { %1638 = vmatprep.subr.bf16.mxu0 %v4158_v54  ;;  %1671 = vmatprep.subr.bf16.mxu1 %v4161_v55  ;;  %v4231_v53 = vld [vmem:[#allocation7 + $0x40] ss:$8 sps:$4 sm:$0xff]   ;;  %v4251_v54 = vld [vmem:[#allocation7 + $0x154] ss:$8 sps:$4 sm:$0xff]  }
 0x428   :  { %v4236_v55 = vld [vmem:[#allocation7 + $0x34] ss:$8 sps:$4 sm:$0xff]  }
 0x42a   :  { %1639 = vmatpush2.bf16.msra.mxu0 %v4156_v56  ;;  %1672 = vmatpush1.bf16.msra.mxu1 %v4159_v57  ;;  %v4249_v56 = vld [vmem:[#allocation7 + $0x150] ss:$8 sps:$4 sm:$0xff]   ;;  %v4257_v57 = vld [vmem:[#allocation7 + $0x144] ss:$8 sps:$4 sm:$0xff]  }
 0x42b   :  { %1640 = vmatprep.subr.bf16.mxu0 %v4164_v58  ;;  %1673 = vmatprep.subr.bf16.mxu1 %v4167_v59  ;;  %v4242_v58 = vld [vmem:[#allocation7 + $0x24] ss:$8 sps:$4 sm:$0xff]   ;;  %v4255_v59 = vld [vmem:[#allocation7 + $0x140] ss:$8 sps:$4 sm:$0xff]  }
 0x42e   :  { %1641 = vmatpush2.bf16.msra.mxu0 %v4162_v60  ;;  %1674 = vmatpush1.bf16.msra.mxu1 %v4165_v61  ;;  %v4240_v60 = vld [vmem:[#allocation7 + $0x20] ss:$8 sps:$4 sm:$0xff]   ;;  %v4263_v61 = vld [vmem:[#allocation7 + $0x134] ss:$8 sps:$4 sm:$0xff]  }
 0x42f   :  { %1642 = vmatprep.subr.bf16.mxu0 %v4170_v62  ;;  %1675 = vmatprep.subr.bf16.mxu1 %v4173_v63  ;;  %v4248_v62 = vld [vmem:[#allocation7 + $0x14] ss:$8 sps:$4 sm:$0xff]   ;;  %v4261_v63 = vld [vmem:[#allocation7 + $0x130] ss:$8 sps:$4 sm:$0xff]  }
 0x432   :  { %1643 = vmatpush2.bf16.msra.mxu0 %v4168_v2  ;;  %1676 = vmatpush1.bf16.msra.mxu1 %v4171_v3  ;;  %v4246_v2 = vld [vmem:[#allocation7 + $0x10] ss:$8 sps:$4 sm:$0xff]   ;;  %v4269_v3 = vld [vmem:[#allocation7 + $0x124] ss:$8 sps:$4 sm:$0xff]  }
 0x433   :  { %1644 = vmatprep.subr.bf16.mxu0 %v4176_v4  ;;  %1677 = vmatprep.subr.bf16.mxu1 %v4179_v5  ;;  %v4254_v4 = vld [vmem:[#allocation7 + $0x4] ss:$8 sps:$4 sm:$0xff]   ;;  %v4267_v5 = vld [vmem:[#allocation7 + $0x120] ss:$8 sps:$4 sm:$0xff]  }
 0x436   :  { %1645 = vmatpush2.bf16.msra.mxu0 %v4174_v6  ;;  %1678 = vmatpush2.bf16.msra.mxu1 %v4177_v7  ;;  %v4252_v6 = vld [vmem:[#allocation7] ss:$8 sps:$4 sm:$0xff]   ;;  %v4275_v7 = vld [vmem:[#allocation7 + $0x114] ss:$8 sps:$4 sm:$0xff]  }
 0x437   :  { %1646 = vmatprep.subr.bf16.mxu0 %v4182_v9  ;;  %1679 = vmatprep.subr.bf16.mxu1 %v4185_v11  ;;  %v4260_v9 = vld [vmem:[#allocation7 + $0xf4] ss:$8 sps:$4 sm:$0xff]   ;;  %v4273_v11 = vld [vmem:[#allocation7 + $0x110] ss:$8 sps:$4 sm:$0xff]  }
 0x43a   :  { %1647 = vmatpush2.bf16.msra.mxu0 %v4180_v12  ;;  %1680 = vmatpush2.bf16.msra.mxu1 %v4183_v16  ;;  %v4258_v12 = vld [vmem:[#allocation7 + $0xf0] ss:$8 sps:$4 sm:$0xff]   ;;  %v4266_v16 = vld [vmem:[#allocation7 + $0xe4] ss:$8 sps:$4 sm:$0xff]  }
 0x43b   :  { %1648 = vmatprep.subr.bf16.mxu0 %v4188_v17  ;;  %1681 = vmatprep.subr.bf16.mxu1 %v4191_v19  ;;  %v4264_v17 = vld [vmem:[#allocation7 + $0xe0] ss:$8 sps:$4 sm:$0xff]   ;;  %v4272_v19 = vld [vmem:[#allocation7 + $0xd4] ss:$8 sps:$4 sm:$0xff]  }
 0x43e   :  { %1649 = vmatpush2.bf16.msra.mxu0 %v4186_v20  ;;  %1682 = vmatpush2.bf16.msra.mxu1 %v4189_v21  ;;  %v4270_v20 = vld [vmem:[#allocation7 + $0xd0] ss:$8 sps:$4 sm:$0xff]   ;;  %v4278_v21 = vld [vmem:[#allocation7 + $0xc4] ss:$8 sps:$4 sm:$0xff]  }
 0x43f   :  { %1650 = vmatprep.subr.bf16.mxu0 %v4194_v23  ;;  %1683 = vmatprep.subr.bf16.mxu1 %v4197_v24  ;;  %v4281_v23 = vld [vmem:[#allocation7 + $0x104] ss:$8 sps:$4 sm:$0xff]   ;;  %v4276_v24 = vld [vmem:[#allocation7 + $0xc0] ss:$8 sps:$4 sm:$0xff]  }
 0x442   :  { %1651 = vmatpush2.bf16.msra.mxu0 %v4192_v25  ;;  %1684 = vmatpush2.bf16.msra.mxu1 %v4195_v28  ;;  %v4279_v25 = vld [vmem:[#allocation7 + $0x100] ss:$8 sps:$4 sm:$0xff]   ;;  %v4284_v28 = vld [vmem:[#allocation7 + $0xb4] ss:$8 sps:$4 sm:$0xff]  }
 0x443   :  { %1685 = vmatprep.subr.bf16.mxu1 %v4200_v22  ;;  %1754 = vmatprep.subr.bf16.mxu0 %v4203_v29  ;;  %v4287_v22 = vld [vmem:[#allocation7 + $0x1f4] ss:$8 sps:$4 sm:$0xff]   ;;  %v4282_v29 = vld [vmem:[#allocation7 + $0xb0] ss:$8 sps:$4 sm:$0xff]  }
 0x445   :  { %1653 = vmatmul.mubr.bf16.vlgmr.msra.gmra.mxu0 %v4876_v8  ;;  %v4218_v8 = vld [vmem:[#allocation4 + $0x2c] ss:$16 sps:$4 sm:$0xff]  }
 0x446   :  { %1686 = vmatpush2.bf16.msra.mxu1 %v4198_v30  ;;  %1755 = vmatpush1.bf16.msra.mxu0 %v4201_v31  ;;  %v4285_v30 = vld [vmem:[#allocation7 + $0x1f0] ss:$8 sps:$4 sm:$0xff]   ;;  %v4290_v31 = vld [vmem:[#allocation7 + $0xa4] ss:$8 sps:$4 sm:$0xff]  }
 0x447   :  { %1687 = vmatprep.subr.bf16.mxu1 %v4206_v32  ;;  %1756 = vmatprep.subr.bf16.mxu0 %v4209_v33  ;;  %v4293_v32 = vld [vmem:[#allocation7 + $0x1e4] ss:$8 sps:$4 sm:$0xff]   ;;  %v4288_v33 = vld [vmem:[#allocation7 + $0xa0] ss:$8 sps:$4 sm:$0xff]  }
 0x448   :  { %1774 = vmatprep.mubr.bf16.mxu0 %v4606_v0 }
 0x44a   :  { %1688 = vmatpush2.bf16.msra.mxu1 %v4204_v27  ;;  %1757 = vmatpush1.bf16.msra.mxu0 %v4207_v35  ;;  %v4291_v27 = vld [vmem:[#allocation7 + $0x1e0] ss:$8 sps:$4 sm:$0xff]   ;;  %v4296_v35 = vld [vmem:[#allocation7 + $0x94] ss:$8 sps:$4 sm:$0xff]  }
 0x44b   :  { %1689 = vmatprep.subr.bf16.mxu1 %v4212_v36  ;;  %2254 = vmatprep.subr.bf16.mxu0 %v4224_v44  ;;  %v4299_v36 = vld [vmem:[#allocation7 + $0x1d4] ss:$8 sps:$4 sm:$0xff]   ;;  %v4306_v44 = vld [vmem:[#allocation7 + $0x1b0] ss:$8 sps:$4 sm:$0xff]  }
 0x44d   :  { %3564 = vmatmul.mubr.msk.bf16.vlgmr.msra.gmra.mxu0 %vm260_vm0, %v4782_v10 }
 0x44e   :  { %1690 = vmatpush2.bf16.msra.mxu1 %v4210_v38  ;;  %2255 = vmatpush1.bf16.msra.mxu0 %v4222_v45  ;;  %v4294_v38 = vld [vmem:[#allocation7 + $0x90] ss:$8 sps:$4 sm:$0xff]   ;;  %v4311_v45 = vld [vmem:[#allocation7 + $0x1a4] ss:$8 sps:$4 sm:$0xff]  }
 0x44f   :  { %1691 = vmatprep.subr.bf16.mxu1 %v4215_v39  ;;  %2256 = vmatprep.subr.bf16.mxu0 %v4227_v47  ;;  %v4297_v39 = vld [vmem:[#allocation7 + $0x1d0] ss:$8 sps:$4 sm:$0xff]   ;;  %v4314_v47 = vld [vmem:[#allocation7 + $0x194] ss:$8 sps:$4 sm:$0xff]  }
 0x452   :  { %1692 = vmatpush2.bf16.msra.mxu1 %v4213_v40  ;;  %2257 = vmatpush1.bf16.msra.mxu0 %v4225_v46  ;;  %v4302_v40 = vld [vmem:[#allocation7 + $0x84] ss:$8 sps:$4 sm:$0xff]   ;;  %v4309_v46 = vld [vmem:[#allocation7 + $0x1a0] ss:$8 sps:$4 sm:$0xff]  }
 0x453   :  { %1795 = vmatprep.subr.bf16.mxu1 %v4218_v8  ;;  %2258 = vmatprep.subr.bf16.mxu0 %v4230_v48  ;;  %v4305_v8 = vld [vmem:[#allocation7 + $0x1c4] ss:$8 sps:$4 sm:$0xff]   ;;  %v4312_v48 = vld [vmem:[#allocation7 + $0x190] ss:$8 sps:$4 sm:$0xff]  }
 0x455   :  { %1694 = vmatmul.mubr.bf16.vlgmr.msra.gmra.mxu1 %v4879_v34  ;;  %v4228_v34 = vld [vmem:[#allocation7 + $0x50] ss:$8 sps:$4 sm:$0xff]  }
 0x456   :  { %1796 = vmatpush1.bf16.msra.mxu1 %v4216_v41  ;;  %1815 = vmatprep.mubr.bf16.mxu1 %v4606_v0  ;;  %v4245_v0 = vld [vmem:[#allocation7 + $0x164] ss:$8 sps:$4 sm:$0xff]   ;;  %v4300_v41 = vld [vmem:[#allocation7 + $0x80] ss:$8 sps:$4 sm:$0xff]  }
 0x457   :  { %1797 = vmatprep.subr.bf16.mxu1 %v4221_v42  ;;  %2259 = vmatpush1.bf16.msra.mxu0 %v4228_v34  ;;  %v4303_v42 = vld [vmem:[#allocation7 + $0x1c0] ss:$8 sps:$4 sm:$0xff]  }
 0x458   :  { %2260 = vmatprep.subr.bf16.mxu0 %v4233_v51  ;;  %v4315_v34 = vld [vmem:[#allocation7 + $0x180] ss:$8 sps:$4 sm:$0xff]   ;;  %v4319_v51 = vld [vmem:[%s5152_s9 + $0x78] sm:$0xff]  }
 0x45a   :  { %1798 = vmatpush1.bf16.msra.mxu1 %v4219_v43  ;;  %v4308_v43 = vld [vmem:[#allocation7 + $0x1b4] ss:$8 sps:$4 sm:$0xff]  }
 0x45b   :  { %2295 = vmatprep.subr.bf16.mxu1 %v4239_v50  ;;  %2261 = vmatpush1.bf16.msra.mxu0 %v4231_v53  ;;  %v4318_v50 = vld [vmem:[%s5154_s11 + $0x78] sm:$0xff]  }
 0x45c   :  { %2262 = vmatprep.subr.bf16.mxu0 %v4236_v55 }
 0x45d   :  { %3565 = vmatmul.mubr.msk.bf16.vlgmr.msra.gmra.mxu1 %vm260_vm0, %v4782_v10  ;;  %v4234_v10 = vld [vmem:[#allocation7 + $0x30] ss:$8 sps:$4 sm:$0xff]  }
 0x45e   :  { %2296 = vmatpush1.bf16.msra.mxu1 %v4237_v49  ;;  %v4317_v49 = vld [vmem:[#allocation7 + $0x184] ss:$8 sps:$4 sm:$0xff]  }
 0x45f   :  { %2297 = vmatprep.subr.bf16.mxu1 %v4245_v0  ;;  %2263 = vmatpush1.bf16.msra.mxu0 %v4234_v10 }
 0x460   :  { %2264 = vmatprep.subr.bf16.mxu0 %v4242_v58 }
 0x462   :  { %2298 = vmatpush1.bf16.msra.mxu1 %v4243_v52 }
 0x463   :  { %2299 = vmatprep.subr.bf16.mxu1 %v4251_v54  ;;  %2265 = vmatpush1.bf16.msra.mxu0 %v4240_v60 }
 0x464   :  { %2266 = vmatprep.subr.bf16.mxu0 %v4248_v62 }
 0x466   :  { %2300 = vmatpush1.bf16.msra.mxu1 %v4249_v56 }
 0x467   :  { %2301 = vmatprep.subr.bf16.mxu1 %v4257_v57  ;;  %2267 = vmatpush1.bf16.msra.mxu0 %v4246_v2 }
 0x468   :  { %2268 = vmatprep.subr.bf16.mxu0 %v4254_v4 }
 0x46a   :  { %2302 = vmatpush1.bf16.msra.mxu1 %v4255_v59 }
 0x46b   :  { %2303 = vmatprep.subr.bf16.mxu1 %v4263_v61  ;;  %2269 = vmatpush1.bf16.msra.mxu0 %v4252_v6  ;;  %v1824_v61 = vld [vmem:[%s5185_s20] sm:$0xf] }
 0x46c   :  { %2270 = vmatprep.subr.bf16.mxu0 %v4260_v9  ;;  %v1829_v2 = vrot.slane %v1824_v61, %v4799_v15  ;;  %v1833_v6 = vrot.slane %v1824_v61, %v4806_v18 }
 0x46e   :  { %2304 = vmatpush1.bf16.msra.mxu1 %v4261_v63 }
 0x46f   :  { %2305 = vmatprep.subr.bf16.mxu1 %v4269_v3  ;;  %2271 = vmatpush2.bf16.msra.mxu0 %v4258_v12 }
 0x470   :  { %2272 = vmatprep.subr.bf16.mxu0 %v4266_v16 }
 0x472   :  { %2306 = vmatpush1.bf16.msra.mxu1 %v4267_v5 }
 0x473   :  { %2307 = vmatprep.subr.bf16.mxu1 %v4275_v7  ;;  %2273 = vmatpush2.bf16.msra.mxu0 %v4264_v17 }
 0x474   :  { %2274 = vmatprep.subr.bf16.mxu0 %v4272_v19 }
 0x476   :  { %2308 = vmatpush1.bf16.msra.mxu1 %v4273_v11 }
 0x477   :  { %2275 = vmatpush2.bf16.msra.mxu0 %v4270_v20  ;;  %2309 = vmatprep.subr.bf16.mxu1 %v4281_v23 }
 0x478   :  { %2276 = vmatprep.subr.bf16.mxu0 %v4278_v21 }
 0x47a   :  { %2310 = vmatpush1.bf16.msra.mxu1 %v4279_v25 }
 0x47b   :  { %2277 = vmatpush2.bf16.msra.mxu0 %v4276_v24  ;;  %2311 = vmatprep.subr.bf16.mxu1 %v4287_v22  ;;  %v4321_v24 = vld [vmem:[%s5152_s9 + $0x38] sm:$0xff]   ;;  %v4323_v22 = vld [vmem:[%s5152_s9 + $0x70] sm:$0xff]  }
 0x47c   :  { %2278 = vmatprep.subr.bf16.mxu0 %v4284_v28 }
 0x47e   :  { %2312 = vmatpush2.bf16.msra.mxu1 %v4285_v30  ;;  %v4325_v30 = vld [vmem:[%s5152_s9 + $0x30] sm:$0xff]  }
 0x47f   :  { %2279 = vmatpush2.bf16.msra.mxu0 %v4282_v29  ;;  %2313 = vmatprep.subr.bf16.mxu1 %v4293_v32 }
 0x480   :  { %2280 = vmatprep.subr.bf16.mxu0 %v4290_v31 }
 0x482   :  { %2314 = vmatpush2.bf16.msra.mxu1 %v4291_v27 }
 0x483   :  { %2281 = vmatpush2.bf16.msra.mxu0 %v4288_v33  ;;  %2315 = vmatprep.subr.bf16.mxu1 %v4299_v36  ;;  %v1837_v33 = vrot.slane %v1824_v61, %v210_v26  ;;  %v4320_v26 = vld [vmem:[%s5154_s11 + $0x38] sm:$0xff]  }
 0x484   :  { %2282 = vmatprep.subr.bf16.mxu0 %v4296_v35 }
 0x486   :  { %2316 = vmatpush2.bf16.msra.mxu1 %v4297_v39 }
 0x487   :  { %2283 = vmatpush2.bf16.msra.mxu0 %v4294_v38  ;;  %2317 = vmatprep.subr.bf16.mxu1 %v4305_v8  ;;  %v1841_v38 = vrot.slane %v1824_v61, %v214_v37  ;;  %v4324_v37 = vld [vmem:[%s5154_s11 + $0x30] sm:$0xff]   ;;  %v4342_v61 = vld [vmem:[%s5154_s11 + $0x48] sm:$0xff]  }
 0x488   :  { %2284 = vmatprep.subr.bf16.mxu0 %v4302_v40 }
 0x48a   :  { %2318 = vmatpush2.bf16.msra.mxu1 %v4303_v42 }
 0x48b   :  { %2285 = vmatpush2.bf16.msra.mxu0 %v4300_v41  ;;  %2319 = vmatprep.subr.bf16.mxu1 %v4308_v43 }
 0x48c   :  { %3738 = vmatprep.subr.bf16.mxu0 %v4319_v51  ;;  %v4330_v51 = vld [vmem:[%s5154_s11 + $0x60] sm:$0xff]  }
 0x48e   :  { %2320 = vmatpush2.bf16.msra.mxu1 %v4306_v44 }
 0x48f   :  { %2321 = vmatprep.subr.bf16.mxu1 %v4311_v45 }
 0x492   :  { %2322 = vmatpush2.bf16.msra.mxu1 %v4309_v46 }
 0x493   :  { %2323 = vmatprep.subr.bf16.mxu1 %v4314_v47 }
 0x496   :  { %2324 = vmatpush2.bf16.msra.mxu1 %v4312_v48  ;;  %v4326_v48 = vld [vmem:[%s5154_s11 + $0x68] sm:$0xff]  }
 0x497   :  { %2325 = vmatprep.subr.bf16.mxu1 %v4317_v49  ;;  %v4327_v49 = vld [vmem:[%s5152_s9 + $0x68] sm:$0xff]  }
 0x49a   :  { %2326 = vmatpush2.bf16.msra.mxu1 %v4315_v34  ;;  %v4328_v34 = vld [vmem:[%s5154_s11 + $0x28] sm:$0xff]  }
 0x49b   :  { %3760 = vmatprep.subr.bf16.mxu1 %v4318_v50  ;;  %v4329_v50 = vld [vmem:[%s5152_s9 + $0x28] sm:$0xff]  }
 0x4c5   :  { %v1572_v0 = vpop.f32.mrf.mxu0 }
 0x4c7   :  { %v1574_v52 = vpop.f32.mrf.mxu0 }
 0x4c9   :  { %v1576_v53 = vpop.f32.mrf.mxu0 }
 0x4ca   :  { %v4333_v53 = vld [vmem:[%s5152_s9 + $0x20] sm:$0xff]  }
 0x4cb   :  { %v1577_v54 = vpop.f32.mrf.mxu0 }
 0x4cc   :  { %v4334_v54 = vld [vmem:[%s5154_s11 + $0x58] sm:$0xff]  }
 0x4d5   :  { %v1613_v55 = vpop.f32.mrf.mxu1 }
 0x4d6   :  { %v1614_v63 = vadd.f32 %v1613_v55, %v1572_v0  ;;  %v4331_v0 = vld [vmem:[%s5152_s9 + $0x60] sm:$0xff]   ;;  %v4335_v55 = vld [vmem:[%s5152_s9 + $0x58] sm:$0xff]  }
 0x4d7   :  { %v1615_v56 = vpop.f32.mrf.mxu1 }
 0x4d8   :  { %v1616_v4 = vadd.f32 %v1615_v56, %v1574_v52  ;;  %v4332_v52 = vld [vmem:[%s5154_s11 + $0x20] sm:$0xff]   ;;  %v4336_v56 = vld [vmem:[%s5154_s11 + $0x18] sm:$0xff]  }
 0x4d9   :  { %v1617_v10 = vpop.f32.mrf.mxu1 }
 0x4da   :  { %v4337_v10 = vld [vmem:[%s5152_s9 + $0x18] sm:$0xff]  }
 0x4db   :  { %v1618_v57 = vpop.f32.mrf.mxu1 }
 0x4dc   :  { %v4338_v57 = vld [vmem:[%s5154_s11 + $0x50] sm:$0xff]  }
 0x505   :  { %v1654_v58 = vpop.f32.mrf.mxu0 }
 0x507   :  { %v1656_v59 = vpop.f32.mrf.mxu0 }
 0x509   :  { %v1658_v60 = vpop.f32.mrf.mxu0 }
 0x50a   :  { %v4341_v60 = vld [vmem:[%s5152_s9 + $0x10] sm:$0xff]  }
 0x50b   :  { %v1659_v62 = vpop.f32.mrf.mxu0 }
 0x50c   :  { %v4343_v62 = vld [vmem:[%s5152_s9 + $0x48] sm:$0xff]  }
 0x50d   :  { %v1776_v3 = vpop.f32.mrf.mxu0 }
 0x50e   :  { %v1777_v5 = vadd.f32 %v1776_v3, %v1614_v63  ;;  %v4344_v63 = vld [vmem:[%s5154_s11 + $0x8] sm:$0xff]   ;;  %v4346_v3 = vld [vmem:[%s5154_s11 + $0x40] sm:$0xff]  }
 0x50f   :  { %v1778_v7 = vpop.f32.mrf.mxu0 }
 0x510   :  { %v1846_v9 = vadd.f32 %v1829_v2, %v1777_v5  ;;  %v1779_v11 = vadd.f32 %v1778_v7, %v1616_v4  ;;  %v4345_v2 = vld [vmem:[%s5152_s9 + $0x8] sm:$0xff]   ;;  %v4347_v4 = vld [vmem:[%s5152_s9 + $0x40] sm:$0xff]   ;;  %v4350_v7 = vld [vmem:[%s5158_s15 + $0x78] sm:$0xff]  }
 0x511   :  { %v1780_v12 = vpop.f32.mrf.mxu0  ;;  %v4348_v5 = vld [vmem:[%s5154_s11] sm:$0xff]  }
 0x512   :  { %v1847_v16 = vadd.f32 %v1833_v6, %v1779_v11  ;;  %v1850_v17 = vmax.f32 %v1846_v9, 0.0  ;;  %v4349_v6 = vld [vmem:[%s5152_s9] sm:$0xff]  }
 0x513   :  { %v1781_v19 = vpop.f32.mrf.mxu0 }
 0x514   :  { %v1851_v20 = vmax.f32 %v1847_v16, 0.0  ;;  %v1854_v25 = vpack.c.bf16 %v1850_v17, %v1850_v17  ;;  %v1922_v17 = vld [vmem:[%s5151_s8] sm:$0x3] }
 0x515   :  { %v1695_v21 = vpop.f32.mrf.mxu1  ;;  %v1927_v19 = vrot.slane %v1922_v17, %v4799_v15  ;;  %v4352_v15 = vld [vmem:[%s5158_s15 + $0x70] sm:$0xff]  }
 0x516   :  { %v1855_v23 = vpack.c.bf16 %v1851_v20, %v1851_v20  ;;  %v1696_v32 = vadd.f32 %v1695_v21, %v1654_v58  ;;  %v4339_v58 = vld [vmem:[%s5152_s9 + $0x50] sm:$0xff]   ;;  %v1931_v20 = vrot.slane %v1922_v17, %v4806_v18  ;;  %v4366_v18 = vld [vmem:[#allocation9 + $0x38] sm:$0xff]  }
 0x517   :  { %v1697_v28 = vpop.f32.mrf.mxu1  ;;  %v4378_v17 = vld [vmem:[%s5160_s17 + $0x18] sm:$0xff]  }
 0x518   :  { %2286 = vmatprep.mubr.bf16.mxu0 %v1855_v23  ;;  %v1698_v35 = vadd.f32 %v1697_v28, %v1656_v59  ;;  %v4340_v59 = vld [vmem:[%s5154_s11 + $0x10] sm:$0xff]  }
 0x519   :  { %v1699_v29 = vpop.f32.mrf.mxu1  ;;  %2287 = vmatmul.mubr.bf16.vlgmr.msra.gmra.mxu0 %v1854_v25 }
 0x51a   :  { %3739 = vmatpush3.bf16.msra.mxu0 %v4321_v24 }
 0x51b   :  { %v1700_v31 = vpop.f32.mrf.mxu1  ;;  %3740 = vmatprep.subr.bf16.mxu0 %v4323_v22 }
 0x51d   :  { %v1817_v27 = vpop.f32.mrf.mxu1 }
 0x51e   :  { %v1818_v36 = vadd.f32 %v1817_v27, %v1696_v32  ;;  %3741 = vmatpush3.bf16.msra.mxu0 %v4325_v30  ;;  %v4351_v27 = vld [vmem:[%s5158_s15 + $0x38] sm:$0xff]  }
 0x51f   :  { %v1819_v39 = vpop.f32.mrf.mxu1  ;;  %3742 = vmatprep.subr.bf16.mxu0 %v4327_v49  ;;  %v4364_v49 = vld [vmem:[%s5158_s15 + $0x40] sm:$0xff]  }
 0x520   :  { %v1848_v40 = vadd.f32 %v1837_v33, %v1818_v36  ;;  %v1820_v8 = vadd.f32 %v1819_v39, %v1698_v35  ;;  %v4353_v36 = vld [vmem:[%s5158_s15 + $0x30] sm:$0xff]  }
 0x521   :  { %v1821_v41 = vpop.f32.mrf.mxu1  ;;  %v4367_v39 = vld [vmem:[#allocation9 + $0x30] sm:$0xff]  }
 0x522   :  { %v1849_v42 = vadd.f32 %v1841_v38, %v1820_v8  ;;  %v1852_v43 = vmax.f32 %v1848_v40, 0.0  ;;  %3743 = vmatpush3.bf16.msra.mxu0 %v4329_v50  ;;  %v4354_v38 = vld [vmem:[%s5158_s15 + $0x68] sm:$0xff]   ;;  %v4356_v8 = vld [vmem:[%s5158_s15 + $0x60] sm:$0xff]  }
 0x523   :  { %v1822_v44 = vpop.f32.mrf.mxu1  ;;  %3744 = vmatprep.subr.bf16.mxu0 %v4331_v0  ;;  %v4355_v40 = vld [vmem:[%s5158_s15 + $0x28] sm:$0xff]   ;;  %v4390_v0 = vld [vmem:[#allocation12 + $0x38] sm:$0xff]  }
 0x524   :  { %v1853_v45 = vmax.f32 %v1849_v42, 0.0  ;;  %v1856_v47 = vpack.c.bf16 %v1852_v43, %v1852_v43  ;;  %v4368_v41 = vld [vmem:[#allocation9 + $0x28] sm:$0xff]   ;;  %v4357_v42 = vld [vmem:[%s5158_s15 + $0x20] sm:$0xff]   ;;  %v4358_v43 = vld [vmem:[%s5158_s15 + $0x58] sm:$0xff]  }
 0x525   :  { %v4369_v44 = vld [vmem:[#allocation9 + $0x20] sm:$0xff]   ;;  %v4372_v50 = vld [vmem:[#allocation9 + $0x8] sm:$0xff]  }
 0x526   :  { %v1857_v46 = vpack.c.bf16 %v1853_v45, %v1853_v45  ;;  %3745 = vmatpush3.bf16.msra.mxu0 %v4333_v53  ;;  %v4359_v45 = vld [vmem:[%s5158_s15 + $0x18] sm:$0xff]   ;;  %v4392_v53 = vld [vmem:[#allocation12 + $0x28] sm:$0xff]  }
 0x527   :  { %3746 = vmatprep.subr.bf16.mxu0 %v4335_v55  ;;  %v4394_v55 = vld [vmem:[#allocation12 + $0x18] sm:$0xff]  }
 0x528   :  { %2327 = vmatprep.mubr.bf16.mxu1 %v1857_v46  ;;  %v4360_v46 = vld [vmem:[%s5158_s15 + $0x50] sm:$0xff]  }
 0x529   :  { %2328 = vmatmul.mubr.bf16.vlgmr.msra.gmra.mxu1 %v1856_v47  ;;  %v4361_v47 = vld [vmem:[%s5158_s15 + $0x10] sm:$0xff]  }
 0x52a   :  { %3761 = vmatpush3.bf16.msra.mxu1 %v4320_v26  ;;  %3747 = vmatpush3.bf16.msra.mxu0 %v4337_v10  ;;  %v4370_v26 = vld [vmem:[#allocation9 + $0x18] sm:$0xff]  }
 0x52b   :  { %3762 = vmatprep.subr.bf16.mxu1 %v4322_v14  ;;  %3748 = vmatprep.subr.bf16.mxu0 %v4339_v58  ;;  %v4362_v14 = vld [vmem:[%s5158_s15 + $0x48] sm:$0xff]  }
 0x52e   :  { %3763 = vmatpush3.bf16.msra.mxu1 %v4324_v37  ;;  %3749 = vmatpush3.bf16.msra.mxu0 %v4341_v60  ;;  %v4371_v37 = vld [vmem:[#allocation9 + $0x10] sm:$0xff]  }
 0x52f   :  { %3764 = vmatprep.subr.bf16.mxu1 %v4326_v48  ;;  %3750 = vmatprep.subr.bf16.mxu0 %v4343_v62  ;;  %v4363_v48 = vld [vmem:[%s5158_s15 + $0x8] sm:$0xff]  }
 0x532   :  { %3765 = vmatpush3.bf16.msra.mxu1 %v4328_v34  ;;  %3751 = vmatpush3.bf16.msra.mxu0 %v4345_v2  ;;  %v4365_v34 = vld [vmem:[%s5158_s15] sm:$0xff]   ;;  %s5187_s15 = sld [smem:[#allocation29_spill]] }
 0x533   :  { %3766 = vmatprep.subr.bf16.mxu1 %v4330_v51  ;;  %3752 = vmatprep.subr.bf16.mxu0 %v4347_v4  ;;  %v4373_v51 = vld [vmem:[#allocation9] sm:$0xff]  }
 0x536   :  { %3767 = vmatpush3.bf16.msra.mxu1 %v4332_v52  ;;  %3753 = vmatpush3.bf16.msra.mxu0 %v4349_v6  ;;  %v4391_v52 = vld [vmem:[#allocation12 + $0x30] sm:$0xff]  }
 0x537   :  { %3768 = vmatprep.subr.bf16.mxu1 %v4334_v54  ;;  %3893 = vmatprep.subr.bf16.mxu0 %v4607_v1  ;;  %v4393_v54 = vld [vmem:[#allocation12 + $0x20] sm:$0xff]  }
 0x53a   :  { %3769 = vmatpush3.bf16.msra.mxu1 %v4336_v56  ;;  %v4395_v56 = vld [vmem:[#allocation12 + $0x10] sm:$0xff]  }
 0x53b   :  { %3770 = vmatprep.subr.bf16.mxu1 %v4338_v57 }
 0x53e   :  { %3771 = vmatpush3.bf16.msra.mxu1 %v4340_v59  ;;  %v3647_v59 = vld [vmem:[%s5155_s12] ss:$0 sm:$0xff] }
 0x53f   :  { %3772 = vmatprep.subr.bf16.mxu1 %v4342_v61 }
 0x542   :  { %3773 = vmatpush3.bf16.msra.mxu1 %v4344_v63 }
 0x543   :  { %3774 = vmatprep.subr.bf16.mxu1 %v4346_v3 }
 0x546   :  { %3775 = vmatpush3.bf16.msra.mxu1 %v4348_v5 }
 0x547   :  { %3791 = vmatprep.subr.bf16.mxu1 %v4350_v7  ;;  %v4374_v7 = vld [vmem:[%s5160_s17 + $0x38] sm:$0xff]  }
 0x5d9   :  { %v2288_v9 = vpop.f32.mrf.mxu0 }
 0x5da   :  { %v2289_v21 = vadd.f32 %v2288_v9, %v1927_v19  ;;  %v4379_v19 = vld [vmem:[%s5160_s17 + $0x10] sm:$0xff]  }
 0x5db   :  { %v2290_v11 = vpop.f32.mrf.mxu0 }
 0x5dc   :  { %v2291_v24 = vadd.f32 %v2290_v11, %v1931_v20  ;;  %v4375_v11 = vld [vmem:[%s5160_s17 + $0x30] sm:$0xff]  }
 0x5dd   :  { %v2292_v12 = vpop.f32.mrf.mxu0 }
 0x5de   :  { %v4376_v12 = vld [vmem:[%s5160_s17 + $0x28] sm:$0xff]  }
 0x5df   :  { %v2293_v16 = vpop.f32.mrf.mxu0 }
 0x5e0   :  { %v4377_v16 = vld [vmem:[%s5160_s17 + $0x20] sm:$0xff]  }
 0x5e9   :  { %v2329_v23 = vpop.f32.mrf.mxu1 }
 0x5ea   :  { %v2330_v25 = vadd.f32 %v2329_v23, %v2289_v21  ;;  %v4380_v21 = vld [vmem:[%s5160_s17 + $0x8] sm:$0xff]   ;;  %v3673_v23 = vld [vmem:[%s5159_s16] ss:$0 sm:$0xff] }
 0x5eb   :  { %v2331_v28 = vpop.f32.mrf.mxu1 }
 0x5ec   :  { %v2332_v22 = vadd.f32 %v2331_v28, %v2291_v24  ;;  %v2336_v29 = vmax.f32 %v2330_v25, 0.0 }
 0x5ed   :  { %v2333_v30 = vpop.f32.mrf.mxu1 }
 0x5ee   :  { %v2337_v31 = vmax.f32 %v2332_v22, 0.0  ;;  %v2338_v35 = vpack.c.bf16 %v2336_v29, %v2336_v29  ;;  %v4381_v22 = vld [vmem:[%s5160_s17] sm:$0xff]  }
 0x5ef   :  { %v2334_v32 = vpop.f32.mrf.mxu1 }
 0x5f0   :  { %v2339_v33 = vpack.c.bf16 %v2337_v31, %v2337_v31  ;;  %v4382_v32 = vld [vmem:[#allocation10 + $0x38] sm:$0xff]  }
 0x5f2   :  { %2507 = vmatprep.mubr.bf16.mxu0 %v2339_v33  ;;  %2684 = vmatprep.mubr.bf16.mxu1 %v2339_v33 }
 0x5f3   :  { %2508 = vmatmul.mubr.bf16.vlgmr.msra.gmra.mxu0 %v2338_v35  ;;  %2685 = vmatmul.mubr.bf16.vlgmr.msra.gmra.mxu1 %v2338_v35 }
 0x5f4   :  { %3792 = vmatpush3.bf16.msra.mxu1 %v4351_v27  ;;  %2974 = vmatprep.mubr.bf16.mxu1 %v2339_v33  ;;  %v4383_v27 = vld [vmem:[#allocation10 + $0x30] sm:$0xff]  }
 0x5f5   :  { %3793 = vmatprep.subr.bf16.mxu1 %v4352_v15  ;;  %3894 = vmatpush3.bf16.msra.mxu0 %v4366_v18  ;;  %v4385_v15 = vld [vmem:[#allocation10 + $0x20] sm:$0xff]   ;;  %v4386_v18 = vld [vmem:[#allocation10 + $0x18] sm:$0xff]  }
 0x5f6   :  { %3895 = vmatprep.subr.bf16.mxu0 %v4607_v1  ;;  %3909 = vmatprep.mubr.msk.bf16.mxu0 %vm4608_vm1, %v4607_v1 }
 0x5f8   :  { %3794 = vmatpush3.bf16.msra.mxu1 %v4353_v36  ;;  %v4387_v36 = vld [vmem:[#allocation10 + $0x10] sm:$0xff]  }
 0x5f9   :  { %3795 = vmatprep.subr.bf16.mxu1 %v4354_v38  ;;  %3896 = vmatpush3.bf16.msra.mxu0 %v4367_v39  ;;  %v3630_v38 = vld [vmem:[%s5153_s10] ss:$0 sm:$0xff]  ;;  %v4388_v39 = vld [vmem:[#allocation10 + $0x8] sm:$0xff]  }
 0x5fa   :  { %3897 = vmatprep.subr.bf16.mxu0 %v4607_v1 }
 0x5fc   :  { %3796 = vmatpush3.bf16.msra.mxu1 %v4355_v40 }
 0x5fd   :  { %3797 = vmatprep.subr.bf16.mxu1 %v4356_v8  ;;  %3898 = vmatpush3.bf16.msra.mxu0 %v4368_v41  ;;  %v4389_v8 = vld [vmem:[#allocation10] sm:$0xff]  }
 0x5fe   :  { %3899 = vmatprep.subr.bf16.mxu0 %v4607_v1 }
 0x600   :  { %3798 = vmatpush3.bf16.msra.mxu1 %v4357_v42 }
 0x601   :  { %3799 = vmatprep.subr.bf16.mxu1 %v4358_v43  ;;  %3900 = vmatpush3.bf16.msra.mxu0 %v4369_v44  ;;  %v4396_v43 = vld [vmem:[#allocation12 + $0x8] sm:$0xff]   ;;  %v4397_v44 = vld [vmem:[#allocation12] sm:$0xff]  }
 0x602   :  { %3901 = vmatprep.subr.bf16.mxu0 %v4607_v1 }
 0x604   :  { %3800 = vmatpush3.bf16.msra.mxu1 %v4359_v45  ;;  %v3664_v45 = vld [vmem:[%s5157_s14] ss:$0 sm:$0xff] }
 0x605   :  { %3801 = vmatprep.subr.bf16.mxu1 %v4360_v46  ;;  %3902 = vmatpush3.bf16.msra.mxu0 %v4370_v26 }
 0x606   :  { %3903 = vmatprep.subr.bf16.mxu0 %v4607_v1 }
 0x608   :  { %3802 = vmatpush3.bf16.msra.mxu1 %v4361_v47 }
 0x609   :  { %3803 = vmatprep.subr.bf16.mxu1 %v4362_v14  ;;  %3904 = vmatpush3.bf16.msra.mxu0 %v4371_v37 }
 0x60a   :  { %3905 = vmatprep.subr.bf16.mxu0 %v4607_v1 }
 0x60c   :  { %3804 = vmatpush3.bf16.msra.mxu1 %v4363_v48  ;;  %v4398_v48 = vld [vmem:[#allocation13 + $0x18] sm:$0xff]  }
 0x60d   :  { %3805 = vmatprep.subr.bf16.mxu1 %v4364_v49  ;;  %3906 = vmatpush3.bf16.msra.mxu0 %v4372_v50  ;;  %v4399_v50 = vld [vmem:[#allocation13 + $0x10] sm:$0xff]  }
 0x60e   :  { %3907 = vmatprep.subr.bf16.mxu0 %v4607_v1 }
 0x610   :  { %3806 = vmatpush3.bf16.msra.mxu1 %v4365_v34 }
 0x611   :  { %3933 = vmatprep.subr.bf16.mxu1 %v4607_v1  ;;  %3908 = vmatpush3.bf16.msra.mxu0 %v4373_v51  ;;  %v4400_v51 = vld [vmem:[#allocation13 + $0x8] sm:$0xff]  }
 0x612   :  { %3913 = vmatprep.subr.bf16.mxu0 %v4607_v1 }
 0x613   :  { %2975 = vmatmul.mubr.bf16.vlgmr.msra.gmra.mxu1 %v2338_v35  ;;  %v4384_v35 = vld [vmem:[#allocation10 + $0x28] sm:$0xff]  }
 0x614   :  { %3949 = vmatprep.mubr.msk.bf16.mxu1 %vm4608_vm1, %v4607_v1  ;;  %3934 = vmatpush3.bf16.msra.mxu1 %v4390_v0  ;;  %v4401_v0 = vld [vmem:[#allocation13] sm:$0xff]  }
 0x615   :  { %3935 = vmatprep.subr.bf16.mxu1 %v4607_v1 }
 0x618   :  { %3936 = vmatpush3.bf16.msra.mxu1 %v4391_v52  ;;  %v3690_v52 = vld [vmem:[%s5161_s18] ss:$0 sm:$0xff] }
 0x619   :  { %3937 = vmatprep.subr.bf16.mxu1 %v4607_v1 }
 0x61c   :  { %3938 = vmatpush3.bf16.msra.mxu1 %v4392_v53 }
 0x61d   :  { %3939 = vmatprep.subr.bf16.mxu1 %v4607_v1 }
 0x620   :  { %3940 = vmatpush3.bf16.msra.mxu1 %v4393_v54 }
 0x621   :  { %3941 = vmatprep.subr.bf16.mxu1 %v4607_v1 }
 0x624   :  { %3942 = vmatpush3.bf16.msra.mxu1 %v4394_v55 }
 0x625   :  { %3943 = vmatprep.subr.bf16.mxu1 %v4607_v1 }
 0x628   :  { %3944 = vmatpush3.bf16.msra.mxu1 %v4395_v56 }
 0x629   :  { %3945 = vmatprep.subr.bf16.mxu1 %v4607_v1 }
 0x62c   :  { %3946 = vmatpush3.bf16.msra.mxu1 %v4396_v43 }
 0x62d   :  { %3947 = vmatprep.subr.bf16.mxu1 %v4607_v1 }
 0x630   :  { %3948 = vmatpush3.bf16.msra.mxu1 %v4397_v44 }
 0x631   :  { %3973 = vmatprep.subr.bf16.mxu1 %v4607_v1 }
 0x6b3   :  { %v3754_v10 = vpop.f32.mrf.mxu0  ;;  %v3776_v57 = vpop.f32.mrf.mxu1 }
 0x6b5   :  { %v3755_v58 = vpop.f32.mrf.mxu0  ;;  %v3777_v60 = vpop.f32.mrf.mxu1 }
 0x6b6   :  { %v5071_v61 = vadd.f32 %v3755_v58, %v3754_v10  ;;  %v3778_v62 = vadd.f32 %v3777_v60, %v3776_v57 }
 0x6b7   :  { %v3757_v63 = vpop.f32.mrf.mxu0  ;;  %v3779_v2 = vpop.f32.mrf.mxu1 }
 0x6b8   :  { %v2687_v3 = vadd.f32 %v3778_v62, %v3647_v59  ;;  %v2510_v40 = vadd.f32 %v5071_v61, %v3630_v38 }
 0x6b9   :  { %v3758_v4 = vpop.f32.mrf.mxu0  ;;  %v3780_v5 = vpop.f32.mrf.mxu1 }
 0x6ba   :  { %v2692_v6 = vmax.f32 %v2687_v3, 0.0  ;;  %v2515_v41 = vmax.f32 %v2510_v40, 0.0 }
 0x6bc   :  { %v2693_v9 = vpack.c.bf16 %v2692_v6, %v2692_v6  ;;  %v2516_v42 = vpack.c.bf16 %v2515_v41, %v2515_v41  ;;  %v3720_v6 = vld [vmem:[%s5186_s2] ss:$0 sm:$0xff] }
 0x6be   :  { %3910 = vmatmul.mubr.bf16.vlgmr.msra.gmra.mxu0 %v2693_v9 }
 0x6bf   :  { %3914 = vmatpush3.bf16.msra.mxu0 %v4374_v7  ;;  %3929 = vmatprep.mubr.msk.bf16.mxu0 %vm4608_vm1, %v4607_v1 }
 0x6c0   :  { %3915 = vmatprep.subr.bf16.mxu0 %v4607_v1 }
 0x6c3   :  { %3916 = vmatpush3.bf16.msra.mxu0 %v4375_v11 }
 0x6c4   :  { %3917 = vmatprep.subr.bf16.mxu0 %v4607_v1 }
 0x6c7   :  { %3918 = vmatpush3.bf16.msra.mxu0 %v4376_v12 }
 0x6c8   :  { %3919 = vmatprep.subr.bf16.mxu0 %v4607_v1 }
 0x6cb   :  { %3920 = vmatpush3.bf16.msra.mxu0 %v4377_v16 }
 0x6cc   :  { %3921 = vmatprep.subr.bf16.mxu0 %v4607_v1 }
 0x6cf   :  { %3922 = vmatpush3.bf16.msra.mxu0 %v4378_v17 }
 0x6d0   :  { %3923 = vmatprep.subr.bf16.mxu0 %v4607_v1 }
 0x6d3   :  { %v3807_v20 = vpop.f32.mrf.mxu1  ;;  %3924 = vmatpush3.bf16.msra.mxu0 %v4379_v19 }
 0x6d4   :  { %3925 = vmatprep.subr.bf16.mxu0 %v4607_v1 }
 0x6d5   :  { %v3808_v24 = vpop.f32.mrf.mxu1 }
 0x6d6   :  { %v3809_v25 = vadd.f32 %v3808_v24, %v3807_v20 }
 0x6d7   :  { %v3810_v28 = vpop.f32.mrf.mxu1  ;;  %3926 = vmatpush3.bf16.msra.mxu0 %v4380_v21  ;;  %v3391_v21 = vand.u32 127, %v200_v13 }
 0x6d8   :  { %v2977_v29 = vadd.f32 %v3809_v25, %v3673_v23  ;;  %3927 = vmatprep.subr.bf16.mxu0 %v4607_v1 }
 0x6d9   :  { %v3811_v30 = vpop.f32.mrf.mxu1  ;;  %vm3392_vm5 = vcmp.eq.s32.totalorder %v3391_v21, 8 }
 0x6da   :  { %v2982_v31 = vmax.f32 %v2977_v29, 0.0 }
 0x6db   :  { %3928 = vmatpush3.bf16.msra.mxu0 %v4381_v22 }
 0x6dc   :  { %v2983_v33 = vpack.c.bf16 %v2982_v31, %v2982_v31  ;;  %3953 = vmatprep.subr.bf16.mxu0 %v4607_v1 }
 0x6de   :  { %3930 = vmatmul.mubr.bf16.vlgmr.msra.gmra.mxu0 %v2983_v33 }
 0x6df   :  { %3954 = vmatpush3.bf16.msra.mxu0 %v4382_v32  ;;  %3969 = vmatprep.mubr.msk.bf16.mxu0 %vm4608_vm1, %v4607_v1 }
 0x6e0   :  { %3955 = vmatprep.subr.bf16.mxu0 %v4607_v1 }
 0x6e3   :  { %3956 = vmatpush3.bf16.msra.mxu0 %v4383_v27 }
 0x6e4   :  { %3957 = vmatprep.subr.bf16.mxu0 %v4607_v1 }
 0x6e7   :  { %3958 = vmatpush3.bf16.msra.mxu0 %v4384_v35 }
 0x6e8   :  { %3959 = vmatprep.subr.bf16.mxu0 %v4607_v1 }
 0x6eb   :  { %3960 = vmatpush3.bf16.msra.mxu0 %v4385_v15 }
 0x6ec   :  { %3961 = vmatprep.subr.bf16.mxu0 %v4607_v1 }
 0x6ef   :  { %3962 = vmatpush3.bf16.msra.mxu0 %v4386_v18 }
 0x6f0   :  { %3963 = vmatprep.subr.bf16.mxu0 %v4607_v1 }
 0x6f3   :  { %3964 = vmatpush3.bf16.msra.mxu0 %v4387_v36 }
 0x6f4   :  { %3965 = vmatprep.subr.bf16.mxu0 %v4607_v1 }
 0x6f7   :  { %3966 = vmatpush3.bf16.msra.mxu0 %v4388_v39 }
 0x6f8   :  { %3967 = vmatprep.subr.bf16.mxu0 %v4607_v1 }
 0x6fb   :  { %3968 = vmatpush3.bf16.msra.mxu0 %v4389_v8 }
 0x6fe   :  { %3970 = vmatmul.mubr.bf16.vlgmr.msra.gmra.mxu0 %v2516_v42 }
 0x77e   :  { %v2799_v46 = vpop.f32.mrf.mxu0 }
 0x77f   :  { %v2800_v26 = vadd.f32 %v3664_v45, %v2799_v46 }
 0x780   :  { %v3911_v47 = vpop.f32.mrf.mxu0 }
 0x781   :  { %v2805_v14 = vmax.f32 %v2800_v26, 0.0 }
 0x782   :  { %v2802_v37 = vpop.f32.mrf.mxu0 }
 0x783   :  { %v2806_v49 = vpack.c.bf16 %v2805_v14, %v2805_v14 }
 0x784   :  { %v3912_v34 = vpop.f32.mrf.mxu0 }
 0x785   :  { %3950 = vmatmul.mubr.bf16.vlgmr.msra.gmra.mxu1 %v2806_v49 }
 0x786   :  { %3974 = vmatpush3.bf16.msra.mxu1 %v4398_v48  ;;  %3981 = vmatprep.mubr.msk.bf16.mxu1 %vm4608_vm1, %v4607_v1 }
 0x787   :  { %3975 = vmatprep.subr.bf16.mxu1 %v4607_v1 }
 0x78a   :  { %3976 = vmatpush3.bf16.msra.mxu1 %v4399_v50 }
 0x78b   :  { %3977 = vmatprep.subr.bf16.mxu1 %v4607_v1 }
 0x78e   :  { %3978 = vmatpush3.bf16.msra.mxu1 %v4400_v51 }
 0x78f   :  { %3979 = vmatprep.subr.bf16.mxu1 %v4607_v1 }
 0x792   :  { %3980 = vmatpush3.bf16.msra.mxu1 %v4401_v0 }
 0x79e   :  { %v3089_v53 = vpop.f32.mrf.mxu0 }
 0x79f   :  { %v3090_v54 = vadd.f32 %v3690_v52, %v3089_v53 }
 0x7a0   :  { %v3931_v55 = vpop.f32.mrf.mxu0 }
 0x7a1   :  { %v3095_v56 = vmax.f32 %v3090_v54, 0.0 }
 0x7a2   :  { %v3092_v10 = vpop.f32.mrf.mxu0 }
 0x7a3   :  { %v3096_v57 = vpack.c.bf16 %v3095_v56, %v3095_v56 }
 0x7a4   :  { %v3932_v58 = vpop.f32.mrf.mxu0 }
 0x7a5   :  { %3982 = vmatmul.mubr.msk.bf16.vlgmr.msra.gmra.mxu1 %vm3337_vm4, %v3096_v57 }
 0x7be   :  { %v3299_v59 = vpop.f32.mrf.mxu0 }
 0x7c0   :  { %v3971_v60 = vpop.f32.mrf.mxu0 }
 0x7c2   :  { %v3302_v61 = vpop.f32.mrf.mxu0 }
 0x7c4   :  { %v3972_v62 = vpop.f32.mrf.mxu0 }
 0x845   :  { %v3211_v63 = vpop.f32.mrf.mxu1 }
 0x846   :  { %v3300_v4 = vadd.f32 %v3299_v59, %v3211_v63 }
 0x847   :  { %v3951_v1 = vpop.f32.mrf.mxu1 }
 0x849   :  { %v3214_v2 = vpop.f32.mrf.mxu1 }
 0x84b   :  { %v3952_v3 = vpop.f32.mrf.mxu1 }
 0x865   :  { %v3375_v5 = vpop.f32.mrf.mxu1 }
 0x866   :  { %v3381_v7 = vadd.f32 %v3375_v5, %v3300_v4 }
 0x867   :  { %v3983_v9 = vpop.f32.mrf.mxu1 }
 0x868   :  { %v3389_v11 = vadd.f32 %v3720_v6, %v3381_v7 }
 0x869   :  { %v3378_v12 = vpop.f32.mrf.mxu1 }
 0x86a   :  { %v3721_v16 = vmul.f32 -1.442695, %v3389_v11 }
 0x86b   :  { %v3984_v17 = vpop.f32.mrf.mxu1 }
 0x86c   :  { %4418 = vpow2.f32 %v3721_v16 }
 0x879   :  { %v4419_v19 = vpop.eup %4418 }
 0x87a   :  { %v3396_v20 = vadd.f32 1.0, %v4419_v19 }
 0x87c   :  { %4420 = vrcp.f32 %v3396_v20 }
 0x889   :  { %v4421_v23 = vpop.eup %4420 }
 0x88a   :  { %v3399_v24 = vsel %vm3392_vm5, %v4421_v23, %v3389_v11 }
 0x88b   :  { %3400 = vst [vmem:[%s5187_s15] sm:$0xff] %v3399_v24 }
 0x88c   :  { %3405 = vsyncpa [#allocation3], 1 }
 0x88d   :  { %3406 = vsyncpa [#allocation5], 1 }
 0x88e   :  { %3407 = vsyncpa [#allocation8], 1 }
 0x88f   :  { %3408 = vsyncpa [#allocation11], 1 }
 0x890   :  { %3409 = vsyncpa [#allocation14], 1 }

</bundles_post_ra>
